<compile_context>
chip_gen: v7x
topology: tpu7x:2x2x1
jax: 0.10.0
libtpu: 0.0.40
codegen_flags: <defaults>
</compile_context>

<pallas_src>
import math

import jax
import jax.numpy as jnp
from jax.experimental import pallas as pl
from jax.experimental.pallas import tpu as pltpu

HIDDEN = 300
_LANE = 128
_SUBLANE = 8


def _round_up(n, m):
    return ((n + m - 1) // m) * m


# ---------------------------------------------------------------------------
# Kernel: full 5-layer MLP for one batch tile.  All fan_in / fan_out dims are
# zero-padded to multiples of 128 (lane-dense) so every matmul, activation and
# the output store is full-tile (no masked vst).  Weights/x enter the MXU as
# bf16 with f32 accumulation; the epilogue (bias, ReLU, sigmoid) stays f32.
# ---------------------------------------------------------------------------
def mlp_kernel(x_ref,
               w1_ref, b1_ref,
               w2_ref, b2_ref,
               w3_ref, b3_ref,
               w4_ref, b4_ref,
               w5_ref, b5_ref,
               o_ref):
    h = jnp.dot(x_ref[...], w1_ref[...],
                preferred_element_type=jnp.float32) + b1_ref[...]
    h = jnp.maximum(h, 0.0)

    h = jnp.dot(h.astype(jnp.bfloat16), w2_ref[...],
                preferred_element_type=jnp.float32) + b2_ref[...]
    h = jnp.maximum(h, 0.0)

    h = jnp.dot(h.astype(jnp.bfloat16), w3_ref[...],
                preferred_element_type=jnp.float32) + b3_ref[...]
    h = jnp.maximum(h, 0.0)

    h = jnp.dot(h.astype(jnp.bfloat16), w4_ref[...],
                preferred_element_type=jnp.float32) + b4_ref[...]
    h = jnp.maximum(h, 0.0)

    z = jnp.dot(h.astype(jnp.bfloat16), w5_ref[...],
                preferred_element_type=jnp.float32) + b5_ref[...]
    o_ref[...] = jax.nn.sigmoid(z).astype(o_ref.dtype)


# ---------------------------------------------------------------------------
# One-time parameter preparation (perf-review item 2): pad to 128 multiples,
# cast weights to bf16, keep biases f32 as (1, fan_out_pad) rows.
# ---------------------------------------------------------------------------
def prepare_params(params):
    prepared = []
    padded_dims = []
    for (w, b) in params:
        fi = _round_up(w.shape[0], _LANE)
        fo = _round_up(w.shape[1], _LANE)
        wp = (jnp.zeros((fi, fo), jnp.float32)
              .at[:w.shape[0], :w.shape[1]].set(w)).astype(jnp.bfloat16)
        bp = jnp.zeros((1, fo), jnp.float32).at[0, :b.shape[0]].set(b)
        prepared.append((wp, bp))
        padded_dims.append((fi, fo))
    return prepared, padded_dims


def _choose_tile_b(batch, target):
    """Perf-review item 3: near-even tiles (<=7 padded rows each), capped at `target`."""
    n_tiles = max(1, math.ceil(batch / target))
    return _round_up(math.ceil(batch / n_tiles), _SUBLANE)


def _batch_semantics():
    """Perf-review item 4: on v7x actually split the batch axis across the 2 TCs."""
    try:
        kind = jax.devices()[0].device_kind.lower()
    except Exception:
        kind = ""
    if "7" in kind and hasattr(pltpu, "CORE_PARALLEL"):
        return (pltpu.CORE_PARALLEL,)
    return ("parallel",)


def neuralnet3_forward(x, prepared, padded_dims, out_size, *,
                       target_tile_b=1024, aggressive=True):
    """x: (B, in_size) float32. prepared/padded_dims from prepare_params."""
    B, in_size = x.shape
    in_pad = padded_dims[0][0]
    out_pad = padded_dims[-1][1]

    tile_b = _choose_tile_b(B, target_tile_b)
    b_pad = _round_up(B, tile_b)
    grid_b = b_pad // tile_b

    # Only the activations are padded per call (weights were prepared once).
    xp = (jnp.zeros((b_pad, in_pad), jnp.float32)
          .at[:B, :in_size].set(x)).astype(jnp.bfloat16)

    flat_args = [xp]
    for (w, b) in prepared:
        flat_args.append(w)
        flat_args.append(b)

    # Advisory cost estimate (perf-review item 8).
    flops = 2 * b_pad * sum(fi * fo for (fi, fo) in padded_dims)
    bytes_accessed = (xp.size * 2
                      + sum(w.size * 2 + b.size * 4 for (w, b) in prepared)
                      + b_pad * out_pad * 4)
    cost = pl.CostEstimate(flops=flops,
                           transcendentals=b_pad * out_pad,
                           bytes_accessed=bytes_accessed)

    def build(single_buffer_weights, semantics):
        in_specs = [pl.BlockSpec((tile_b, in_pad), lambda i: (i, 0))]
        for (fi, fo) in padded_dims:
            if single_buffer_weights:
                # Constant index_map: block never changes, so single-buffer the
                # resident weights/biases (halves their VMEM footprint; v7x headroom).
                in_specs.append(pl.BlockSpec((fi, fo), lambda i: (0, 0),
                                             pipeline_mode=pl.Buffered(1)))
                in_specs.append(pl.BlockSpec((1, fo), lambda i: (0, 0),
                                             pipeline_mode=pl.Buffered(1)))
            else:
                in_specs.append(pl.BlockSpec((fi, fo), lambda i: (0, 0)))
                in_specs.append(pl.BlockSpec((1, fo), lambda i: (0, 0)))
        return pl.pallas_call(
            mlp_kernel,
            out_shape=jax.ShapeDtypeStruct((b_pad, out_pad), jnp.float32),
            grid=(grid_b,),
            in_specs=in_specs,
            out_specs=pl.BlockSpec((tile_b, out_pad), lambda i: (i, 0)),
            compiler_params=pltpu.CompilerParams(
                dimension_semantics=semantics,
                # Explicit limit (v5e scoped default is only 16 MiB); footprint at
                # tile_b<=1024 is ~10 MiB, well inside every generation's VMEM.
                vmem_limit_bytes=32 * 1024 * 1024),
            cost_estimate=cost,
        )

    if aggressive:
        # Guarded aggressive config (CORE_PARALLEL on v7x + single-buffered weights);
        # falls back to the previously-validated plain config if lowering rejects it.
        try:
            out = build(True, _batch_semantics())(*flat_args)
            out = jax.block_until_ready(out)
        except Exception:
            out = build(False, ("parallel",))(*flat_args)
    else:
        out = build(False, ("parallel",))(*flat_args)

    return out[:B, :out_size]


# ---------------------------------------------------------------------------
# Init + references
# ---------------------------------------------------------------------------
def init_params(key, in_size, out_size):
    """Deterministic init mirroring nn.Linear's U(-1/sqrt(fan_in), 1/sqrt(fan_in))."""
    dims = [(in_size, HIDDEN), (HIDDEN, HIDDEN), (HIDDEN, HIDDEN),
            (HIDDEN, HIDDEN), (HIDDEN, out_size)]
    params = []
    for (fan_in, fan_out) in dims:
        key, kw, kb = jax.random.split(key, 3)
        bound = 1.0 / jnp.sqrt(fan_in)
        w = jax.random.uniform(kw, (fan_in, fan_out), jnp.float32, -bound, bound)
        b = jax.random.uniform(kb, (fan_out,), jnp.float32, -bound, bound)
        params.append((w, b))
    return params


def reference_forward_f32(x, params):
    h = x
    for i, (w, b) in enumerate(params):
        h = h @ w + b
        if i < len(params) - 1:
            h = jnp.maximum(h, 0.0)
    return jax.nn.sigmoid(h)


def reference_forward_bf16(x, params):
    """Emulates the kernel's bf16-feed / f32-accumulate numerics."""
    h = x.astype(jnp.bfloat16)
    for i, (w, b) in enumerate(params):
        h = jnp.dot(h, w.astype(jnp.bfloat16),
                    preferred_element_type=jnp.float32) + b
        if i < len(params) - 1:
            h = jnp.maximum(h, 0.0).astype(jnp.bfloat16)
    return jax.nn.sigmoid(h)


if __name__ == "__main__":
    key = jax.random.PRNGKey(0)
    k_x, k_p = jax.random.split(key)

    B, IN_SIZE, OUT_SIZE = 8, 32, 4
    x = jax.random.normal(k_x, (B, IN_SIZE), jnp.float32)
    params = init_params(k_p, IN_SIZE, OUT_SIZE)

    # One-time parameter prep (padding + bf16 cast hoisted out of the forward).
    prepared, padded_dims = prepare_params(params)

    y = neuralnet3_forward(x, prepared, padded_dims, OUT_SIZE)
    y = jax.block_until_ready(y)
    assert y.shape == (B, OUT_SIZE)

    # Tight check vs a reference using the same bf16-feed / f32-accum numerics.
    y_bf16_ref = reference_forward_bf16(x, params)
    assert jnp.allclose(y, y_bf16_ref, atol=1e-4, rtol=1e-4), "mismatch vs bf16 reference"

    # Looser sanity check vs the full-f32 PyTorch-equivalent forward.
    y_f32_ref = reference_forward_f32(x, params)
    assert jnp.allclose(y, y_f32_ref, atol=3e-2, rtol=3e-2), "mismatch vs f32 reference"

    print("KERNEL_OK")
</pallas_src>

<mosaic_0001>
module attributes {stable_mosaic.version = 11 : i64} {
  func.func @mlp_kernel(%arg0: i32, %arg1: memref<8x128xbf16, #tpu.memory_space<vmem>>, %arg2: memref<128x384xbf16, #tpu.memory_space<vmem>>, %arg3: memref<1x384xf32, #tpu.memory_space<vmem>>, %arg4: memref<384x384xbf16, #tpu.memory_space<vmem>>, %arg5: memref<1x384xf32, #tpu.memory_space<vmem>>, %arg6: memref<384x384xbf16, #tpu.memory_space<vmem>>, %arg7: memref<1x384xf32, #tpu.memory_space<vmem>>, %arg8: memref<384x384xbf16, #tpu.memory_space<vmem>>, %arg9: memref<1x384xf32, #tpu.memory_space<vmem>>, %arg10: memref<384x128xbf16, #tpu.memory_space<vmem>>, %arg11: memref<1x128xf32, #tpu.memory_space<vmem>>, %arg12: memref<8x128xf32, #tpu.memory_space<vmem>>) attributes {dimension_semantics = [#tpu.dimension_semantics<parallel>], iteration_bounds = array<i64: 1>, scalar_prefetch = 0 : i64, scratch_operands = 0 : i64, tpu.core_type = #tpu.core_type<tc>, window_params = [{transform_indices = @transform_0, window_bounds = array<i64: 8, 128>}, {pipeline_mode = #tpu.pipeline_mode<synchronous>, transform_indices = @transform_1, window_bounds = array<i64: 128, 384>}, {pipeline_mode = #tpu.pipeline_mode<synchronous>, transform_indices = @transform_2, window_bounds = array<i64: 1, 384>}, {pipeline_mode = #tpu.pipeline_mode<synchronous>, transform_indices = @transform_3, window_bounds = array<i64: 384, 384>}, {pipeline_mode = #tpu.pipeline_mode<synchronous>, transform_indices = @transform_4, window_bounds = array<i64: 1, 384>}, {pipeline_mode = #tpu.pipeline_mode<synchronous>, transform_indices = @transform_5, window_bounds = array<i64: 384, 384>}, {pipeline_mode = #tpu.pipeline_mode<synchronous>, transform_indices = @transform_6, window_bounds = array<i64: 1, 384>}, {pipeline_mode = #tpu.pipeline_mode<synchronous>, transform_indices = @transform_7, window_bounds = array<i64: 384, 384>}, {pipeline_mode = #tpu.pipeline_mode<synchronous>, transform_indices = @transform_8, window_bounds = array<i64: 1, 384>}, {pipeline_mode = #tpu.pipeline_mode<synchronous>, transform_indices = @transform_9, window_bounds = array<i64: 384, 128>}, {pipeline_mode = #tpu.pipeline_mode<synchronous>, transform_indices = @transform_10, window_bounds = array<i64: 1, 128>}, {transform_indices = @transform_11, window_bounds = array<i64: 8, 128>}]} {
    %c0 = arith.constant 0 : index
    %c0_0 = arith.constant 0 : index
    %0 = vector.load %arg1[%c0, %c0_0] : memref<8x128xbf16, #tpu.memory_space<vmem>>, vector<8x128xbf16>
    %c0_1 = arith.constant 0 : index
    %c0_2 = arith.constant 0 : index
    %1 = vector.load %arg2[%c0_1, %c0_2] : memref<128x384xbf16, #tpu.memory_space<vmem>>, vector<128x384xbf16>
    %cst = arith.constant dense<0.000000e+00> : vector<8x384xf32>
    %2 = tpu.matmul %0, %1, %cst {dimension_numbers = #tpu.dot_dimension_numbers<[1], [0], [0], [1], [0, 0, 1, 1], [], []>} : vector<8x128xbf16>, vector<128x384xbf16>, vector<8x384xf32> -> vector<8x384xf32>
    %c0_3 = arith.constant 0 : index
    %c0_4 = arith.constant 0 : index
    %3 = vector.load %arg3[%c0_3, %c0_4] : memref<1x384xf32, #tpu.memory_space<vmem>>, vector<1x384xf32>
    %4 = vector.broadcast %3 : vector<1x384xf32> to vector<8x384xf32>
    %5 = arith.addf %2, %4 : vector<8x384xf32>
    %cst_5 = arith.constant 0.000000e+00 : f32
    %6 = vector.broadcast %cst_5 : f32 to vector<8x384xf32>
    %7 = arith.maximumf %5, %6 : vector<8x384xf32>
    %8 = arith.truncf %7 : vector<8x384xf32> to vector<8x384xbf16>
    %c0_6 = arith.constant 0 : index
    %c0_7 = arith.constant 0 : index
    %9 = vector.load %arg4[%c0_6, %c0_7] : memref<384x384xbf16, #tpu.memory_space<vmem>>, vector<384x384xbf16>
    %cst_8 = arith.constant dense<0.000000e+00> : vector<8x384xf32>
    %10 = tpu.matmul %8, %9, %cst_8 {dimension_numbers = #tpu.dot_dimension_numbers<[1], [0], [0], [1], [0, 0, 1, 1], [], []>} : vector<8x384xbf16>, vector<384x384xbf16>, vector<8x384xf32> -> vector<8x384xf32>
    %c0_9 = arith.constant 0 : index
    %c0_10 = arith.constant 0 : index
    %11 = vector.load %arg5[%c0_9, %c0_10] : memref<1x384xf32, #tpu.memory_space<vmem>>, vector<1x384xf32>
    %12 = vector.broadcast %11 : vector<1x384xf32> to vector<8x384xf32>
    %13 = arith.addf %10, %12 : vector<8x384xf32>
    %cst_11 = arith.constant 0.000000e+00 : f32
    %14 = vector.broadcast %cst_11 : f32 to vector<8x384xf32>
    %15 = arith.maximumf %13, %14 : vector<8x384xf32>
    %16 = arith.truncf %15 : vector<8x384xf32> to vector<8x384xbf16>
    %c0_12 = arith.constant 0 : index
    %c0_13 = arith.constant 0 : index
    %17 = vector.load %arg6[%c0_12, %c0_13] : memref<384x384xbf16, #tpu.memory_space<vmem>>, vector<384x384xbf16>
    %cst_14 = arith.constant dense<0.000000e+00> : vector<8x384xf32>
    %18 = tpu.matmul %16, %17, %cst_14 {dimension_numbers = #tpu.dot_dimension_numbers<[1], [0], [0], [1], [0, 0, 1, 1], [], []>} : vector<8x384xbf16>, vector<384x384xbf16>, vector<8x384xf32> -> vector<8x384xf32>
    %c0_15 = arith.constant 0 : index
    %c0_16 = arith.constant 0 : index
    %19 = vector.load %arg7[%c0_15, %c0_16] : memref<1x384xf32, #tpu.memory_space<vmem>>, vector<1x384xf32>
    %20 = vector.broadcast %19 : vector<1x384xf32> to vector<8x384xf32>
    %21 = arith.addf %18, %20 : vector<8x384xf32>
    %cst_17 = arith.constant 0.000000e+00 : f32
    %22 = vector.broadcast %cst_17 : f32 to vector<8x384xf32>
    %23 = arith.maximumf %21, %22 : vector<8x384xf32>
    %24 = arith.truncf %23 : vector<8x384xf32> to vector<8x384xbf16>
    %c0_18 = arith.constant 0 : index
    %c0_19 = arith.constant 0 : index
    %25 = vector.load %arg8[%c0_18, %c0_19] : memref<384x384xbf16, #tpu.memory_space<vmem>>, vector<384x384xbf16>
    %cst_20 = arith.constant dense<0.000000e+00> : vector<8x384xf32>
    %26 = tpu.matmul %24, %25, %cst_20 {dimension_numbers = #tpu.dot_dimension_numbers<[1], [0], [0], [1], [0, 0, 1, 1], [], []>} : vector<8x384xbf16>, vector<384x384xbf16>, vector<8x384xf32> -> vector<8x384xf32>
    %c0_21 = arith.constant 0 : index
    %c0_22 = arith.constant 0 : index
    %27 = vector.load %arg9[%c0_21, %c0_22] : memref<1x384xf32, #tpu.memory_space<vmem>>, vector<1x384xf32>
    %28 = vector.broadcast %27 : vector<1x384xf32> to vector<8x384xf32>
    %29 = arith.addf %26, %28 : vector<8x384xf32>
    %cst_23 = arith.constant 0.000000e+00 : f32
    %30 = vector.broadcast %cst_23 : f32 to vector<8x384xf32>
    %31 = arith.maximumf %29, %30 : vector<8x384xf32>
    %32 = arith.truncf %31 : vector<8x384xf32> to vector<8x384xbf16>
    %c0_24 = arith.constant 0 : index
    %c0_25 = arith.constant 0 : index
    %33 = vector.load %arg10[%c0_24, %c0_25] : memref<384x128xbf16, #tpu.memory_space<vmem>>, vector<384x128xbf16>
    %cst_26 = arith.constant dense<0.000000e+00> : vector<8x128xf32>
    %34 = tpu.matmul %32, %33, %cst_26 {dimension_numbers = #tpu.dot_dimension_numbers<[1], [0], [0], [1], [0, 0, 1, 1], [], []>} : vector<8x384xbf16>, vector<384x128xbf16>, vector<8x128xf32> -> vector<8x128xf32>
    %c0_27 = arith.constant 0 : index
    %c0_28 = arith.constant 0 : index
    %35 = vector.load %arg11[%c0_27, %c0_28] : memref<1x128xf32, #tpu.memory_space<vmem>>, vector<1x128xf32>
    %36 = vector.broadcast %35 : vector<1x128xf32> to vector<8x128xf32>
    %37 = arith.addf %34, %36 : vector<8x128xf32>
    %38 = arith.negf %37 : vector<8x128xf32>
    %39 = math.exp %38 : vector<8x128xf32>
    %cst_29 = arith.constant 1.000000e+00 : f32
    %40 = vector.broadcast %cst_29 : f32 to vector<8x128xf32>
    %41 = arith.addf %40, %39 : vector<8x128xf32>
    %42 = arith.divf %40, %41 : vector<8x128xf32>
    %c0_30 = arith.constant 0 : index
    %c0_31 = arith.constant 0 : index
    %43 = vector.load %arg12[%c0_30, %c0_31] : memref<8x128xf32, #tpu.memory_space<vmem>>, vector<8x128xf32>
    tpu.vector_store %arg12[%c0_30, %c0_31], %42 {strides = array<i32>} : memref<8x128xf32, #tpu.memory_space<vmem>>, vector<8x128xf32>,
    return
  }
  func.func @transform_0(%arg0: i32) -> (i32, i32) {
    %c0_i32 = arith.constant 0 : i32
    %c0_i32_0 = arith.constant 0 : i32
    return %arg0, %c0_i32 : i32, i32
  }
  func.func @transform_1(%arg0: i32) -> (i32, i32) {
    %c0_i32 = arith.constant 0 : i32
    %c0_i32_0 = arith.constant 0 : i32
    %c0_i32_1 = arith.constant 0 : i32
    return %c0_i32, %c0_i32_0 : i32, i32
  }
  func.func @transform_2(%arg0: i32) -> (i32, i32) {
    %c0_i32 = arith.constant 0 : i32
    %c0_i32_0 = arith.constant 0 : i32
    %c0_i32_1 = arith.constant 0 : i32
    return %c0_i32, %c0_i32_0 : i32, i32
  }
  func.func @transform_3(%arg0: i32) -> (i32, i32) {
    %c0_i32 = arith.constant 0 : i32
    %c0_i32_0 = arith.constant 0 : i32
    %c0_i32_1 = arith.constant 0 : i32
    return %c0_i32, %c0_i32_0 : i32, i32
  }
  func.func @transform_4(%arg0: i32) -> (i32, i32) {
    %c0_i32 = arith.constant 0 : i32
    %c0_i32_0 = arith.constant 0 : i32
    %c0_i32_1 = arith.constant 0 : i32
    return %c0_i32, %c0_i32_0 : i32, i32
  }
  func.func @transform_5(%arg0: i32) -> (i32, i32) {
    %c0_i32 = arith.constant 0 : i32
    %c0_i32_0 = arith.constant 0 : i32
    %c0_i32_1 = arith.constant 0 : i32
    return %c0_i32, %c0_i32_0 : i32, i32
  }
  func.func @transform_6(%arg0: i32) -> (i32, i32) {
    %c0_i32 = arith.constant 0 : i32
    %c0_i32_0 = arith.constant 0 : i32
    %c0_i32_1 = arith.constant 0 : i32
    return %c0_i32, %c0_i32_0 : i32, i32
  }
  func.func @transform_7(%arg0: i32) -> (i32, i32) {
    %c0_i32 = arith.constant 0 : i32
    %c0_i32_0 = arith.constant 0 : i32
    %c0_i32_1 = arith.constant 0 : i32
    return %c0_i32, %c0_i32_0 : i32, i32
  }
  func.func @transform_8(%arg0: i32) -> (i32, i32) {
    %c0_i32 = arith.constant 0 : i32
    %c0_i32_0 = arith.constant 0 : i32
    %c0_i32_1 = arith.constant 0 : i32
    return %c0_i32, %c0_i32_0 : i32, i32
  }
  func.func @transform_9(%arg0: i32) -> (i32, i32) {
    %c0_i32 = arith.constant 0 : i32
    %c0_i32_0 = arith.constant 0 : i32
    %c0_i32_1 = arith.constant 0 : i32
    return %c0_i32, %c0_i32_0 : i32, i32
  }
  func.func @transform_10(%arg0: i32) -> (i32, i32) {
    %c0_i32 = arith.constant 0 : i32
    %c0_i32_0 = arith.constant 0 : i32
    %c0_i32_1 = arith.constant 0 : i32
    return %c0_i32, %c0_i32_0 : i32, i32
  }
  func.func @transform_11(%arg0: i32) -> (i32, i32) {
    %c0_i32 = arith.constant 0 : i32
    %c0_i32_0 = arith.constant 0 : i32
    return %arg0, %c0_i32 : i32, i32
  }
}

module attributes {stable_mosaic.version = 11 : i64} {
  func.func @mlp_kernel(%arg0: i32, %arg1: memref<8x128xbf16, #tpu.memory_space<vmem>>, %arg2: memref<128x384xbf16, #tpu.memory_space<vmem>>, %arg3: memref<1x384xf32, #tpu.memory_space<vmem>>, %arg4: memref<384x384xbf16, #tpu.memory_space<vmem>>, %arg5: memref<1x384xf32, #tpu.memory_space<vmem>>, %arg6: memref<384x384xbf16, #tpu.memory_space<vmem>>, %arg7: memref<1x384xf32, #tpu.memory_space<vmem>>, %arg8: memref<384x384xbf16, #tpu.memory_space<vmem>>, %arg9: memref<1x384xf32, #tpu.memory_space<vmem>>, %arg10: memref<384x128xbf16, #tpu.memory_space<vmem>>, %arg11: memref<1x128xf32, #tpu.memory_space<vmem>>, %arg12: memref<8x128xf32, #tpu.memory_space<vmem>>) attributes {dimension_semantics = [#tpu.dimension_semantics<parallel>], iteration_bounds = array<i64: 1>, scalar_prefetch = 0 : i64, scratch_operands = 0 : i64, tpu.core_type = #tpu.core_type<tc>, window_params = [{transform_indices = @transform_0, window_bounds = array<i64: 8, 128>}, {pipeline_mode = #tpu.pipeline_mode<synchronous>, transform_indices = @transform_1, window_bounds = array<i64: 128, 384>}, {pipeline_mode = #tpu.pipeline_mode<synchronous>, transform_indices = @transform_2, window_bounds = array<i64: 1, 384>}, {pipeline_mode = #tpu.pipeline_mode<synchronous>, transform_indices = @transform_3, window_bounds = array<i64: 384, 384>}, {pipeline_mode = #tpu.pipeline_mode<synchronous>, transform_indices = @transform_4, window_bounds = array<i64: 1, 384>}, {pipeline_mode = #tpu.pipeline_mode<synchronous>, transform_indices = @transform_5, window_bounds = array<i64: 384, 384>}, {pipeline_mode = #tpu.pipeline_mode<synchronous>, transform_indices = @transform_6, window_bounds = array<i64: 1, 384>}, {pipeline_mode = #tpu.pipeline_mode<synchronous>, transform_indices = @transform_7, window_bounds = array<i64: 384, 384>}, {pipeline_mode = #tpu.pipeline_mode<synchronous>, transform_indices = @transform_8, window_bounds = array<i64: 1, 384>}, {pipeline_mode = #tpu.pipeline_mode<synchronous>, transform_indices = @transform_9, window_bounds = array<i64: 384, 128>}, {pipeline_mode = #tpu.pipeline_mode<synchronous>, transform_indices = @transform_10, window_bounds = array<i64: 1, 128>}, {transform_indices = @transform_11, window_bounds = array<i64: 8, 128>}]} {
    %c0 = arith.constant 0 : index
    %c0_0 = arith.constant 0 : index
    %0 = vector.load %arg1[%c0, %c0_0] : memref<8x128xbf16, #tpu.memory_space<vmem>>, vector<8x128xbf16>
    %c0_1 = arith.constant 0 : index
    %c0_2 = arith.constant 0 : index
    %1 = vector.load %arg2[%c0_1, %c0_2] : memref<128x384xbf16, #tpu.memory_space<vmem>>, vector<128x384xbf16>
    %cst = arith.constant dense<0.000000e+00> : vector<8x384xf32>
    %2 = tpu.matmul %0, %1, %cst {dimension_numbers = #tpu.dot_dimension_numbers<[1], [0], [0], [1], [0, 0, 1, 1], [], []>} : vector<8x128xbf16>, vector<128x384xbf16>, vector<8x384xf32> -> vector<8x384xf32>
    %c0_3 = arith.constant 0 : index
    %c0_4 = arith.constant 0 : index
    %3 = vector.load %arg3[%c0_3, %c0_4] : memref<1x384xf32, #tpu.memory_space<vmem>>, vector<1x384xf32>
    %4 = vector.broadcast %3 : vector<1x384xf32> to vector<8x384xf32>
    %5 = arith.addf %2, %4 : vector<8x384xf32>
    %cst_5 = arith.constant 0.000000e+00 : f32
    %6 = vector.broadcast %cst_5 : f32 to vector<8x384xf32>
    %7 = arith.maximumf %5, %6 : vector<8x384xf32>
    %8 = arith.truncf %7 : vector<8x384xf32> to vector<8x384xbf16>
    %c0_6 = arith.constant 0 : index
    %c0_7 = arith.constant 0 : index
    %9 = vector.load %arg4[%c0_6, %c0_7] : memref<384x384xbf16, #tpu.memory_space<vmem>>, vector<384x384xbf16>
    %cst_8 = arith.constant dense<0.000000e+00> : vector<8x384xf32>
    %10 = tpu.matmul %8, %9, %cst_8 {dimension_numbers = #tpu.dot_dimension_numbers<[1], [0], [0], [1], [0, 0, 1, 1], [], []>} : vector<8x384xbf16>, vector<384x384xbf16>, vector<8x384xf32> -> vector<8x384xf32>
    %c0_9 = arith.constant 0 : index
    %c0_10 = arith.constant 0 : index
    %11 = vector.load %arg5[%c0_9, %c0_10] : memref<1x384xf32, #tpu.memory_space<vmem>>, vector<1x384xf32>
    %12 = vector.broadcast %11 : vector<1x384xf32> to vector<8x384xf32>
    %13 = arith.addf %10, %12 : vector<8x384xf32>
    %cst_11 = arith.constant 0.000000e+00 : f32
    %14 = vector.broadcast %cst_11 : f32 to vector<8x384xf32>
    %15 = arith.maximumf %13, %14 : vector<8x384xf32>
    %16 = arith.truncf %15 : vector<8x384xf32> to vector<8x384xbf16>
    %c0_12 = arith.constant 0 : index
    %c0_13 = arith.constant 0 : index
    %17 = vector.load %arg6[%c0_12, %c0_13] : memref<384x384xbf16, #tpu.memory_space<vmem>>, vector<384x384xbf16>
    %cst_14 = arith.constant dense<0.000000e+00> : vector<8x384xf32>
    %18 = tpu.matmul %16, %17, %cst_14 {dimension_numbers = #tpu.dot_dimension_numbers<[1], [0], [0], [1], [0, 0, 1, 1], [], []>} : vector<8x384xbf16>, vector<384x384xbf16>, vector<8x384xf32> -> vector<8x384xf32>
    %c0_15 = arith.constant 0 : index
    %c0_16 = arith.constant 0 : index
    %19 = vector.load %arg7[%c0_15, %c0_16] : memref<1x384xf32, #tpu.memory_space<vmem>>, vector<1x384xf32>
    %20 = vector.broadcast %19 : vector<1x384xf32> to vector<8x384xf32>
    %21 = arith.addf %18, %20 : vector<8x384xf32>
    %cst_17 = arith.constant 0.000000e+00 : f32
    %22 = vector.broadcast %cst_17 : f32 to vector<8x384xf32>
    %23 = arith.maximumf %21, %22 : vector<8x384xf32>
    %24 = arith.truncf %23 : vector<8x384xf32> to vector<8x384xbf16>
    %c0_18 = arith.constant 0 : index
    %c0_19 = arith.constant 0 : index
    %25 = vector.load %arg8[%c0_18, %c0_19] : memref<384x384xbf16, #tpu.memory_space<vmem>>, vector<384x384xbf16>
    %cst_20 = arith.constant dense<0.000000e+00> : vector<8x384xf32>
    %26 = tpu.matmul %24, %25, %cst_20 {dimension_numbers = #tpu.dot_dimension_numbers<[1], [0], [0], [1], [0, 0, 1, 1], [], []>} : vector<8x384xbf16>, vector<384x384xbf16>, vector<8x384xf32> -> vector<8x384xf32>
    %c0_21 = arith.constant 0 : index
    %c0_22 = arith.constant 0 : index
    %27 = vector.load %arg9[%c0_21, %c0_22] : memref<1x384xf32, #tpu.memory_space<vmem>>, vector<1x384xf32>
    %28 = vector.broadcast %27 : vector<1x384xf32> to vector<8x384xf32>
    %29 = arith.addf %26, %28 : vector<8x384xf32>
    %cst_23 = arith.constant 0.000000e+00 : f32
    %30 = vector.broadcast %cst_23 : f32 to vector<8x384xf32>
    %31 = arith.maximumf %29, %30 : vector<8x384xf32>
    %32 = arith.truncf %31 : vector<8x384xf32> to vector<8x384xbf16>
    %c0_24 = arith.constant 0 : index
    %c0_25 = arith.constant 0 : index
    %33 = vector.load %arg10[%c0_24, %c0_25] : memref<384x128xbf16, #tpu.memory_space<vmem>>, vector<384x128xbf16>
    %cst_26 = arith.constant dense<0.000000e+00> : vector<8x128xf32>
    %34 = tpu.matmul %32, %33, %cst_26 {dimension_numbers = #tpu.dot_dimension_numbers<[1], [0], [0], [1], [0, 0, 1, 1], [], []>} : vector<8x384xbf16>, vector<384x128xbf16>, vector<8x128xf32> -> vector<8x128xf32>
    %c0_27 = arith.constant 0 : index
    %c0_28 = arith.constant 0 : index
    %35 = vector.load %arg11[%c0_27, %c0_28] : memref<1x128xf32, #tpu.memory_space<vmem>>, vector<1x128xf32>
    %36 = vector.broadcast %35 : vector<1x128xf32> to vector<8x128xf32>
    %37 = arith.addf %34, %36 : vector<8x128xf32>
    %38 = arith.negf %37 : vector<8x128xf32>
    %39 = math.exp %38 : vector<8x128xf32>
    %cst_29 = arith.constant 1.000000e+00 : f32
    %40 = vector.broadcast %cst_29 : f32 to vector<8x128xf32>
    %41 = arith.addf %40, %39 : vector<8x128xf32>
    %42 = arith.divf %40, %41 : vector<8x128xf32>
    %c0_30 = arith.constant 0 : index
    %c0_31 = arith.constant 0 : index
    %43 = vector.load %arg12[%c0_30, %c0_31] : memref<8x128xf32, #tpu.memory_space<vmem>>, vector<8x128xf32>
    tpu.vector_store %arg12[%c0_30, %c0_31], %42 {strides = array<i32>} : memref<8x128xf32, #tpu.memory_space<vmem>>, vector<8x128xf32>,
    return
  }
  func.func @transform_0(%arg0: i32) -> (i32, i32) {
    %c0_i32 = arith.constant 0 : i32
    %c0_i32_0 = arith.constant 0 : i32
    return %arg0, %c0_i32 : i32, i32
  }
  func.func @transform_1(%arg0: i32) -> (i32, i32) {
    %c0_i32 = arith.constant 0 : i32
    %c0_i32_0 = arith.constant 0 : i32
    %c0_i32_1 = arith.constant 0 : i32
    return %c0_i32, %c0_i32_0 : i32, i32
  }
  func.func @transform_2(%arg0: i32) -> (i32, i32) {
    %c0_i32 = arith.constant 0 : i32
    %c0_i32_0 = arith.constant 0 : i32
    %c0_i32_1 = arith.constant 0 : i32
    return %c0_i32, %c0_i32_0 : i32, i32
  }
  func.func @transform_3(%arg0: i32) -> (i32, i32) {
    %c0_i32 = arith.constant 0 : i32
    %c0_i32_0 = arith.constant 0 : i32
    %c0_i32_1 = arith.constant 0 : i32
    return %c0_i32, %c0_i32_0 : i32, i32
  }
  func.func @transform_4(%arg0: i32) -> (i32, i32) {
    %c0_i32 = arith.constant 0 : i32
    %c0_i32_0 = arith.constant 0 : i32
    %c0_i32_1 = arith.constant 0 : i32
    return %c0_i32, %c0_i32_0 : i32, i32
  }
  func.func @transform_5(%arg0: i32) -> (i32, i32) {
    %c0_i32 = arith.constant 0 : i32
    %c0_i32_0 = arith.constant 0 : i32
    %c0_i32_1 = arith.constant 0 : i32
    return %c0_i32, %c0_i32_0 : i32, i32
  }
  func.func @transform_6(%arg0: i32) -> (i32, i32) {
    %c0_i32 = arith.constant 0 : i32
    %c0_i32_0 = arith.constant 0 : i32
    %c0_i32_1 = arith.constant 0 : i32
    return %c0_i32, %c0_i32_0 : i32, i32
  }
  func.func @transform_7(%arg0: i32) -> (i32, i32) {
    %c0_i32 = arith.constant 0 : i32
    %c0_i32_0 = arith.constant 0 : i32
    %c0_i32_1 = arith.constant 0 : i32
    return %c0_i32, %c0_i32_0 : i32, i32
  }
  func.func @transform_8(%arg0: i32) -> (i32, i32) {
    %c0_i32 = arith.constant 0 : i32
    %c0_i32_0 = arith.constant 0 : i32
    %c0_i32_1 = arith.constant 0 : i32
    return %c0_i32, %c0_i32_0 : i32, i32
  }
  func.func @transform_9(%arg0: i32) -> (i32, i32) {
    %c0_i32 = arith.constant 0 : i32
    %c0_i32_0 = arith.constant 0 : i32
    %c0_i32_1 = arith.constant 0 : i32
    return %c0_i32, %c0_i32_0 : i32, i32
  }
  func.func @transform_10(%arg0: i32) -> (i32, i32) {
    %c0_i32 = arith.constant 0 : i32
    %c0_i32_0 = arith.constant 0 : i32
    %c0_i32_1 = arith.constant 0 : i32
    return %c0_i32, %c0_i32_0 : i32, i32
  }
  func.func @transform_11(%arg0: i32) -> (i32, i32) {
    %c0_i32 = arith.constant 0 : i32
    %c0_i32_0 = arith.constant 0 : i32
    return %arg0, %c0_i32 : i32, i32
  }
}

</mosaic_0001>

<bundles_post_ra>
// kernel: tpu_custom_call.1
= control target key start
LH: loop header
LB: loop body
LE: loop exit
PB: predicated region body
PF: predicated region fallthrough
CT: control target
= control target key end

     0   :  { %16 = vsyncpa [#allocation3], 0  ;;  %s3995_s0 = inlined_call_operand.hbm [shape: bf16[8,128], index: 0, kind: input, shape index: {}]   ;;  %s3996_s1 = inlined_call_operand.hbm [shape: bf16[128,384], index: 1, kind: input, shape index: {}]   ;;  %s3997_s2 = inlined_call_operand.vmem [shape: f32[1,384], index: 2, kind: input, shape index: {}]   ;;  %s3998_s3 = inlined_call_operand.hbm [shape: bf16[384,384], index: 3, kind: input, shape index: {}]   ;;  %s3999_s4 = inlined_call_operand.vmem [shape: f32[1,384], index: 4, kind: input, shape index: {}]   ;;  %s4000_s5 = inlined_call_operand.hbm [shape: bf16[384,384], index: 5, kind: input, shape index: {}]   ;;  %s4001_s6 = inlined_call_operand.vmem [shape: f32[1,384], index: 6, kind: input, shape index: {}]   ;;  %s4002_s7 = inlined_call_operand.hbm [shape: bf16[384,384], index: 7, kind: input, shape index: {}]   ;;  %s4003_s8 = inlined_call_operand.vmem [shape: f32[1,384], index: 8, kind: input, shape index: {}]   ;;  %s4004_s9 = inlined_call_operand.hbm [shape: bf16[384,128], index: 9, kind: input, shape index: {}]   ;;  %s4005_s10 = inlined_call_operand.vmem [shape: f32[1,128], index: 10, kind: input, shape index: {}]   ;;  %s4006_s11 = inlined_call_operand.hbm [shape: f32[8,128], index: 11, kind: output, shape index: {}]  }
   0x1   :  { %17 = vsyncpa [#allocation6], 0 }
   0x2   :  { %18 = vsyncpa [#allocation9], 0 }
   0x3   :  { %19 = vsyncpa [#allocation12], 0 }
   0x4   :  { %20 = vsyncpa [#allocation4], 0  ;;  %s3727_s17 = smov [#allocation5]   ;;  %s3563_s21 = scalar_lea.hbm %s3996_s1, 3072 }
   0x5   :  { %s36_s18 = sshll.u32 %s3727_s17, 4  ;;  %p3564_p0 = scmp.ne.s32.totalorder %s3996_s1, %s3563_s21  ;;  %s37_s18 = int_to_ptr.vmem [resolvable:$true] %s36_s18 }
   0x6   :  { %p3567_p1 = scmp.lt.u32.totalorder %s3563_s21, %s3996_s1 }
   0x8   :  { %p3569_p2 = pnand %p3567_p1, %p3564_p0 }
   0xa   :  { %3572 = shalt.err (!%p3569_p2)
}
   0xb   :  { %s3573_s26 = scalar_lea.vmem %s37_s18, 3072  ;;  %p3578_p4 = scmp.lt.s32.totalorder %s37_s18, %s37_s18 }
   0xc   :  { %p3574_p3 = scmp.ne.s32.totalorder %s37_s18, %s3573_s26  ;;  %p3579_p5 = scmp.lt.s32.totalorder %s3573_s26, %s3573_s26 }
   0xe   :  { %p3580_p6 = por %p3579_p5, %p3578_p4 }
  0x10   :  { %p3581_p7 = pnand %p3580_p6, %p3574_p3 }
  0x12   :  { %3584 = shalt.err (!%p3581_p7)
}
  0x13   :  { %s3728_s27 = smov 192   ;;  %s3729_s28 = smov 12  }
  0x14   :  { %42 = dma.hbm_to_vmem [thread:$0]  %s3996_s1, 3072, %s37_s18, [#allocation6], %s3728_s27, %s3728_s27, %s3729_s28  }
  0x15   :  { %s3730_s12 = smov [#allocation8]   ;;  %s3731_s14 = smov [#allocation2]  }
  0x16   :  { %s64_s13 = sshll.u32 %s3730_s12, 4  ;;  %s27_s15 = sshll.u32 %s3731_s14, 4  ;;  %s65_s13 = int_to_ptr.vmem [resolvable:$true] %s64_s13  ;;  %s28_s15 = int_to_ptr.vmem [resolvable:$true] %s27_s15 }
  0x17   :  { %s3585_s19 = scalar_lea.hbm %s4000_s5, 9216 }
  0x18   :  { %p3586_p8 = scmp.ne.s32.totalorder %s4000_s5, %s3585_s19  ;;  %p3589_p9 = scmp.lt.u32.totalorder %s3585_s19, %s4000_s5 }
  0x1a   :  { %p3591_p10 = pnand %p3589_p9, %p3586_p8 }
  0x1c   :  { %3594 = shalt.err (!%p3591_p10)
}
  0x1d   :  { %s3595_s1 = scalar_lea.vmem %s65_s13, 9216  ;;  %p3600_p12 = scmp.lt.s32.totalorder %s65_s13, %s65_s13 }
  0x1e   :  { %p3596_p11 = scmp.ne.s32.totalorder %s65_s13, %s3595_s1  ;;  %p3601_p13 = scmp.lt.s32.totalorder %s3595_s1, %s3595_s1 }
  0x20   :  { %p3602_p0 = por %p3601_p13, %p3600_p12 }
  0x22   :  { %p3603_p1 = pnand %p3602_p0, %p3596_p11 }
  0x24   :  { %3606 = shalt.err (!%p3603_p1)
}
  0x25   :  { %70 = dma.hbm_to_vmem [thread:$0]  %s4000_s5, 9216, %s65_s13, [#allocation9], %s3728_s27, %s3728_s27, %s3729_s28  }
  0x26   :  { %s3607_s29 = scalar_lea.hbm %s3995_s0, 64 }
  0x27   :  { %p3608_p2 = scmp.ne.s32.totalorder %s3995_s0, %s3607_s29  ;;  %p3611_p3 = scmp.lt.u32.totalorder %s3607_s29, %s3995_s0 }
  0x29   :  { %p3613_p4 = pnand %p3611_p3, %p3608_p2 }
  0x2b   :  { %3616 = shalt.err (!%p3613_p4)
}
  0x2c   :  { %s3617_s17 = scalar_lea.vmem %s28_s15, 64  ;;  %p3622_p6 = scmp.lt.s32.totalorder %s28_s15, %s28_s15 }
  0x2d   :  { %p3618_p5 = scmp.ne.s32.totalorder %s28_s15, %s3617_s17  ;;  %p3623_p7 = scmp.lt.s32.totalorder %s3617_s17, %s3617_s17 }
  0x2f   :  { %p3624_p8 = por %p3623_p7, %p3622_p6 }
  0x31   :  { %p3625_p9 = pnand %p3624_p8, %p3618_p5 }
  0x33   :  { %3628 = shalt.err (!%p3625_p9)
}
  0x34   :  { %30 = dma.hbm_to_vmem [thread:$0]  %s3995_s0, 64, %s28_s15, [#allocation3]  }
  0x35   :  { %s3732_s19 = smov [#allocation7]   ;;  %s3733_s21 = smov [#allocation10]  }
  0x36   :  { %s50_s20 = sshll.u32 %s3732_s19, 4  ;;  %s78_s22 = sshll.u32 %s3733_s21, 4  ;;  %s51_s20 = int_to_ptr.vmem [resolvable:$true] %s50_s20  ;;  %s79_s22 = int_to_ptr.vmem [resolvable:$true] %s78_s22 }
  0x37   :  { %s3629_s18 = scalar_lea.hbm %s3998_s3, 9216 }
  0x38   :  { %p3630_p10 = scmp.ne.s32.totalorder %s3998_s3, %s3629_s18  ;;  %p3633_p11 = scmp.lt.u32.totalorder %s3629_s18, %s3998_s3 }
  0x3a   :  { %p3635_p12 = pnand %p3633_p11, %p3630_p10 }
  0x3c   :  { %3638 = shalt.err (!%p3635_p12)
}
  0x3d   :  { %s3639_s0 = scalar_lea.vmem %s51_s20, 9216  ;;  %p3644_p0 = scmp.lt.s32.totalorder %s51_s20, %s51_s20 }
  0x3e   :  { %p3640_p13 = scmp.ne.s32.totalorder %s51_s20, %s3639_s0  ;;  %p3645_p1 = scmp.lt.s32.totalorder %s3639_s0, %s3639_s0 }
  0x40   :  { %p3646_p2 = por %p3645_p1, %p3644_p0 }
  0x42   :  { %p3647_p3 = pnand %p3646_p2, %p3640_p13 }
  0x44   :  { %3650 = shalt.err (!%p3647_p3)
}
  0x45   :  { %56 = dma.hbm_to_vmem [thread:$0]  %s3998_s3, 9216, %s51_s20, [#allocation6], %s3728_s27, %s3728_s27, %s3729_s28  }
  0x46   :  { %s3651_s16 = scalar_lea.hbm %s4002_s7, 9216 }
  0x47   :  { %p3652_p4 = scmp.ne.s32.totalorder %s4002_s7, %s3651_s16  ;;  %p3655_p5 = scmp.lt.u32.totalorder %s3651_s16, %s4002_s7 }
  0x49   :  { %p3657_p6 = pnand %p3655_p5, %p3652_p4 }
  0x4b   :  { %3660 = shalt.err (!%p3657_p6)
}
  0x4c   :  { %s3661_s21 = scalar_lea.vmem %s79_s22, 9216  ;;  %p3666_p8 = scmp.lt.s32.totalorder %s79_s22, %s79_s22 }
  0x4d   :  { %p3662_p7 = scmp.ne.s32.totalorder %s79_s22, %s3661_s21  ;;  %p3667_p9 = scmp.lt.s32.totalorder %s3661_s21, %s3661_s21 }
  0x4f   :  { %p3668_p10 = por %p3667_p9, %p3666_p8 }
  0x51   :  { %p3669_p11 = pnand %p3668_p10, %p3662_p7 }
  0x53   :  { %3672 = shalt.err (!%p3669_p11)
}
  0x54   :  { %84 = dma.hbm_to_vmem [thread:$0]  %s4002_s7, 9216, %s79_s22, [#allocation9], %s3728_s27, %s3728_s27, %s3729_s28  }
  0x55   :  { %s3734_s23 = smov [#allocation11]   ;;  %s3673_s25 = scalar_lea.hbm %s4004_s9, 3072 }
  0x56   :  { %s92_s1 = sshll.u32 %s3734_s23, 4  ;;  %p3674_p12 = scmp.ne.s32.totalorder %s4004_s9, %s3673_s25  ;;  %s93_s1 = int_to_ptr.vmem [resolvable:$true] %s92_s1 }
  0x57   :  { %p3677_p13 = scmp.lt.u32.totalorder %s3673_s25, %s4004_s9 }
  0x59   :  { %p3679_p0 = pnand %p3677_p13, %p3674_p12 }
  0x5b   :  { %3682 = shalt.err (!%p3679_p0)
}
  0x5c   :  { %s3683_s30 = scalar_lea.vmem %s93_s1, 3072  ;;  %p3688_p2 = scmp.lt.s32.totalorder %s93_s1, %s93_s1 }
  0x5d   :  { %p3684_p1 = scmp.ne.s32.totalorder %s93_s1, %s3683_s30  ;;  %p3689_p3 = scmp.lt.s32.totalorder %s3683_s30, %s3683_s30 }
  0x5f   :  { %p3690_p4 = por %p3689_p3, %p3688_p2 }
  0x61   :  { %p3691_p5 = pnand %p3690_p4, %p3684_p1 }
  0x63   :  { %3694 = shalt.err (!%p3691_p5)
}
  0x64   :  { %s3735_s7 = smov 64   ;;  %s3736_s27 = smov 4  }
  0x65   :  { %98 = dma.hbm_to_vmem [thread:$0]  %s4004_s9, 3072, %s93_s1, [#allocation12], %s3735_s7, %s3735_s7, %s3736_s27  }
  0x66   :  { %3717 = dma.done.wait [#allocation3], 64  }
  0x67   :  { %3718 = vsyncadd [#allocation3], 4294967232 }
  0x68   :  { %3719 = dma.done.wait [#allocation6], 12288  }
  0x69   :  { %3720 = vsyncadd [#allocation6], 4294955008 }
  0x6a   :  { %3721 = dma.done.wait [#allocation9], 18432  }
  0x6b   :  { %3722 = vsyncadd [#allocation9], 4294948864 }
  0x6c   :  { %3723 = dma.done.wait [#allocation12], 3072  }
  0x6d   :  { %3724 = vsyncadd [#allocation12], 4294964224  ;;  %v3737_v0 = vmov 0.0   ;;  %v3738_v1 = vmov 0   ;;  %vm3739_vm0 = vmmov 0   ;;  %s3740_s13 = smov [#allocation13]  }
  0x6e   :  { %3083 = vmatprep.subr.bf16.mxu1 %v3737_v0  ;;  %330 = vmatprep.mubr.bf16.mxu0 %v3738_v1  ;;  %v3215_v2 = vld [vmem:[#allocation5 + $0x4] ss:$12 sps:$4 sm:$0xff]   ;;  %v3217_v3 = vld [vmem:[#allocation5] ss:$12 sps:$4 sm:$0xff]   ;;  %v3218_v4 = vld [vmem:[#allocation5 + $0x1c] ss:$12 sps:$4 sm:$0xff]  }
  0x6f   :  { %3099 = vmatprep.mubr.msk.bf16.mxu1 %vm3739_vm0, %v3737_v0  ;;  %298 = vmatprep.subr.bf16.mxu0 %v3215_v2  ;;  %v3220_v5 = vld [vmem:[#allocation5 + $0x18] ss:$12 sps:$4 sm:$0xff]   ;;  %v3221_v6 = vld [vmem:[#allocation5 + $0x34] ss:$12 sps:$4 sm:$0xff]   ;;  %v3223_v7 = vld [vmem:[#allocation5 + $0x30] ss:$12 sps:$4 sm:$0xff]  }
  0x70   :  { %299 = vmatpush1.bf16.msra.mxu0 %v3217_v3  ;;  %v3224_v8 = vld [vmem:[#allocation5 + $0x4c] ss:$12 sps:$4 sm:$0xff]   ;;  %v3226_v9 = vld [vmem:[#allocation5 + $0x48] ss:$12 sps:$4 sm:$0xff]   ;;  %v3227_v11 = vld [vmem:[#allocation5 + $0x64] ss:$12 sps:$4 sm:$0xff]  }
  0x71   :  { %300 = vmatprep.subr.bf16.mxu0 %v3218_v4  ;;  %v3239_v10 = vld [vmem:[#allocation5 + $0x8] ss:$12 sps:$4 sm:$0xff]   ;;  %v3240_v12 = vld [vmem:[#allocation5 + $0x20] ss:$12 sps:$4 sm:$0xff]   ;;  %v3241_v15 = vld [vmem:[#allocation5 + $0x38] ss:$12 sps:$4 sm:$0xff]  }
  0x72   :  { %3084 = vmatpush3.bf16.msra.mxu1 %v3239_v10  ;;  %v3229_v13 = vld [vmem:[#allocation5 + $0x60] ss:$12 sps:$4 sm:$0xff]   ;;  %v3230_v14 = vld [vmem:[#allocation5 + $0x7c] ss:$12 sps:$4 sm:$0xff]   ;;  %v3232_v16 = vld [vmem:[#allocation5 + $0x78] ss:$12 sps:$4 sm:$0xff]  }
  0x73   :  { %3085 = vmatprep.subr.bf16.mxu1 %v3737_v0  ;;  %v3233_v17 = vld [vmem:[#allocation5 + $0x94] ss:$12 sps:$4 sm:$0xff]   ;;  %v3242_v18 = vld [vmem:[#allocation5 + $0x50] ss:$12 sps:$4 sm:$0xff]   ;;  %v3236_v20 = vld [vmem:[#allocation5 + $0xac] ss:$12 sps:$4 sm:$0xff]  }
  0x74   :  { %301 = vmatpush1.bf16.msra.mxu0 %v3220_v5  ;;  %v3235_v19 = vld [vmem:[#allocation5 + $0x90] ss:$12 sps:$4 sm:$0xff]   ;;  %v3243_v21 = vld [vmem:[#allocation5 + $0x68] ss:$12 sps:$4 sm:$0xff]   ;;  %v3244_v24 = vld [vmem:[#allocation5 + $0x80] ss:$12 sps:$4 sm:$0xff]  }
  0x75   :  { %302 = vmatprep.subr.bf16.mxu0 %v3221_v6  ;;  %v3238_v22 = vld [vmem:[#allocation5 + $0xa8] ss:$12 sps:$4 sm:$0xff]   ;;  %v3249_v23 = vld [vmem:[#allocation7 + $0x4] ss:$12 sps:$4 sm:$0xff]   ;;  %v120_v25 = vld [vmem:[#allocation2] sm:$0xf] }
  0x76   :  { %3086 = vmatpush3.bf16.msra.mxu1 %v3240_v12  ;;  %v3247_v26 = vld [vmem:[#allocation7] ss:$12 sps:$4 sm:$0xff]   ;;  %v3252_v27 = vld [vmem:[#allocation7 + $0x1c] ss:$12 sps:$4 sm:$0xff]   ;;  %v3245_v28 = vld [vmem:[#allocation5 + $0x98] ss:$12 sps:$4 sm:$0xff]  }
  0x77   :  { %3087 = vmatprep.subr.bf16.mxu1 %v3737_v0  ;;  %v3250_v29 = vld [vmem:[#allocation7 + $0x18] ss:$12 sps:$4 sm:$0xff]   ;;  %v3255_v30 = vld [vmem:[#allocation7 + $0x34] ss:$12 sps:$4 sm:$0xff]   ;;  %v3246_v31 = vld [vmem:[#allocation5 + $0xb0] ss:$12 sps:$4 sm:$0xff]  }
  0x78   :  { %303 = vmatpush1.bf16.msra.mxu0 %v3223_v7  ;;  %v3274_v32 = vld [vmem:[#allocation7 + $0xc8] ss:$12 sps:$4 sm:$0xff]   ;;  %v3253_v33 = vld [vmem:[#allocation7 + $0x30] ss:$12 sps:$4 sm:$0xff]   ;;  %v3258_v34 = vld [vmem:[#allocation7 + $0x4c] ss:$12 sps:$4 sm:$0xff]  }
  0x79   :  { %304 = vmatprep.subr.bf16.mxu0 %v3224_v8  ;;  %v3275_v35 = vld [vmem:[#allocation7 + $0x8] ss:$12 sps:$4 sm:$0xff]   ;;  %v3279_v36 = vld [vmem:[#allocation7 + $0xe0] ss:$12 sps:$4 sm:$0xff]   ;;  %v3261_v38 = vld [vmem:[#allocation7 + $0x64] ss:$12 sps:$4 sm:$0xff]  }
  0x7a   :  { %3088 = vmatpush3.bf16.msra.mxu1 %v3241_v15  ;;  %v3256_v37 = vld [vmem:[#allocation7 + $0x48] ss:$12 sps:$4 sm:$0xff]   ;;  %v3280_v39 = vld [vmem:[#allocation7 + $0x20] ss:$12 sps:$4 sm:$0xff]   ;;  %v3284_v40 = vld [vmem:[#allocation7 + $0xf8] ss:$12 sps:$4 sm:$0xff]  }
  0x7b   :  { %3089 = vmatprep.subr.bf16.mxu1 %v3737_v0  ;;  %v3259_v41 = vld [vmem:[#allocation7 + $0x60] ss:$12 sps:$4 sm:$0xff]   ;;  %v3264_v42 = vld [vmem:[#allocation7 + $0x7c] ss:$12 sps:$4 sm:$0xff]   ;;  %v3262_v43 = vld [vmem:[#allocation7 + $0x78] ss:$12 sps:$4 sm:$0xff]  }
  0x7c   :  { %305 = vmatpush1.bf16.msra.mxu0 %v3226_v9  ;;  %v3285_v44 = vld [vmem:[#allocation7 + $0x38] ss:$12 sps:$4 sm:$0xff]   ;;  %v3289_v45 = vld [vmem:[#allocation7 + $0x110] ss:$12 sps:$4 sm:$0xff]   ;;  %v3267_v46 = vld [vmem:[#allocation7 + $0x94] ss:$12 sps:$4 sm:$0xff]  }
  0x7d   :  { %306 = vmatprep.subr.bf16.mxu0 %v3227_v11  ;;  %v3290_v47 = vld [vmem:[#allocation7 + $0x50] ss:$12 sps:$4 sm:$0xff]   ;;  %v3294_v48 = vld [vmem:[#allocation7 + $0x128] ss:$12 sps:$4 sm:$0xff]   ;;  %v3270_v50 = vld [vmem:[#allocation7 + $0xac] ss:$12 sps:$4 sm:$0xff]  }
  0x7e   :  { %3090 = vmatpush3.bf16.msra.mxu1 %v3242_v18  ;;  %v3265_v49 = vld [vmem:[#allocation7 + $0x90] ss:$12 sps:$4 sm:$0xff]   ;;  %v3295_v51 = vld [vmem:[#allocation7 + $0x68] ss:$12 sps:$4 sm:$0xff]   ;;  %v3299_v52 = vld [vmem:[#allocation7 + $0x140] ss:$12 sps:$4 sm:$0xff]  }
  0x7f   :  { %3091 = vmatprep.subr.bf16.mxu1 %v3737_v0  ;;  %v3268_v53 = vld [vmem:[#allocation7 + $0xa8] ss:$12 sps:$4 sm:$0xff]   ;;  %v3273_v54 = vld [vmem:[#allocation7 + $0xc4] ss:$12 sps:$4 sm:$0xff]   ;;  %v3300_v55 = vld [vmem:[#allocation7 + $0x80] ss:$12 sps:$4 sm:$0xff]  }
  0x80   :  { %307 = vmatpush1.bf16.msra.mxu0 %v3229_v13  ;;  %v3271_v56 = vld [vmem:[#allocation7 + $0xc0] ss:$12 sps:$4 sm:$0xff]   ;;  %v3278_v57 = vld [vmem:[#allocation7 + $0xdc] ss:$12 sps:$4 sm:$0xff]   ;;  %v3276_v58 = vld [vmem:[#allocation7 + $0xd8] ss:$12 sps:$4 sm:$0xff]  }
  0x81   :  { %308 = vmatprep.subr.bf16.mxu0 %v3230_v14  ;;  %v3283_v59 = vld [vmem:[#allocation7 + $0xf4] ss:$12 sps:$4 sm:$0xff]   ;;  %v3281_v60 = vld [vmem:[#allocation7 + $0xf0] ss:$12 sps:$4 sm:$0xff]   ;;  %v3288_v61 = vld [vmem:[#allocation7 + $0x10c] ss:$12 sps:$4 sm:$0xff]   ;;  %v155_v14 = vlaneseq }
  0x82   :  { %3092 = vmatpush3.bf16.msra.mxu1 %v3243_v21  ;;  %v3286_v62 = vld [vmem:[#allocation7 + $0x108] ss:$12 sps:$4 sm:$0xff]   ;;  %v3293_v63 = vld [vmem:[#allocation7 + $0x124] ss:$12 sps:$4 sm:$0xff]   ;;  %v3291_v2 = vld [vmem:[#allocation7 + $0x120] ss:$12 sps:$4 sm:$0xff]  }
  0x83   :  { %3093 = vmatprep.subr.bf16.mxu1 %v3737_v0  ;;  %v3298_v3 = vld [vmem:[#allocation7 + $0x13c] ss:$12 sps:$4 sm:$0xff]   ;;  %v3296_v4 = vld [vmem:[#allocation7 + $0x138] ss:$12 sps:$4 sm:$0xff]   ;;  %v3303_v5 = vld [vmem:[#allocation7 + $0x154] ss:$12 sps:$4 sm:$0xff]  }
  0x84   :  { %309 = vmatpush1.bf16.msra.mxu0 %v3232_v16  ;;  %v3304_v6 = vld [vmem:[#allocation7 + $0x158] ss:$12 sps:$4 sm:$0xff]   ;;  %v3301_v7 = vld [vmem:[#allocation7 + $0x150] ss:$12 sps:$4 sm:$0xff]   ;;  %v3306_v11 = vld [vmem:[#allocation7 + $0x168] ss:$12 sps:$4 sm:$0xff]  }
  0x85   :  { %310 = vmatprep.subr.bf16.mxu0 %v3233_v17  ;;  %v3305_v8 = vld [vmem:[#allocation7 + $0x98] ss:$12 sps:$4 sm:$0xff]   ;;  %v3309_v10 = vld [vmem:[#allocation7 + $0x170] ss:$12 sps:$4 sm:$0xff]   ;;  %v156_v15 = vshrl.u32 %v155_v14, 7  ;;  %s2672_s19 = sshll.u32 %s3740_s13, 4  ;;  %s2673_s19 = int_to_ptr.vmem [resolvable:$true] %s2672_s19 }
  0x86   :  { %3094 = vmatpush3.bf16.msra.mxu1 %v3244_v24  ;;  %v3308_v9 = vld [vmem:[#allocation7 + $0x16c] ss:$12 sps:$4 sm:$0xff]   ;;  %v3310_v12 = vld [vmem:[#allocation7 + $0xb0] ss:$12 sps:$4 sm:$0xff]   ;;  %s3695_s21 = scalar_lea.vmem %s2673_s19, 128  ;;  %p3700_p7 = scmp.lt.s32.totalorder %s2673_s19, %s2673_s19 }
  0x87   :  { %3095 = vmatprep.subr.bf16.mxu1 %v3737_v0  ;;  %v3313_v13 = vld [vmem:[#allocation7 + $0x184] ss:$12 sps:$4 sm:$0xff]   ;;  %v3897_v16 = vsub.s32 0, %v156_v15  ;;  %v3902_v17 = vld [vmem:[%s3997_s2] sm:$0x7]  ;;  %v3904_v18 = vsub.s32 1, %v156_v15  ;;  %p3696_p6 = scmp.ne.s32.totalorder %s2673_s19, %s3695_s21  ;;  %p3701_p8 = scmp.lt.s32.totalorder %s3695_s21, %s3695_s21 }
  0x88   :  { %311 = vmatpush1.bf16.msra.mxu0 %v3235_v19  ;;  %v3361_v14 = vld [vmem:[#allocation8 + $0x90] ss:$12 sps:$4 sm:$0xff]  }
  0x89   :  { %312 = vmatprep.subr.bf16.mxu0 %v3236_v20  ;;  %v158_v19 = vrot.slane %v3902_v17, %v3897_v16  ;;  %v162_v20 = vrot.slane %v3902_v17, %v3904_v18  ;;  %p3702_p9 = por %p3701_p8, %p3700_p7 }
  0x8a   :  { %3096 = vmatpush3.bf16.msra.mxu1 %v3245_v28 }
  0x8b   :  { %3097 = vmatprep.subr.bf16.mxu1 %v3737_v0  ;;  %p3703_p10 = pnand %p3702_p9, %p3696_p6 }
  0x8c   :  { %313 = vmatpush1.bf16.msra.mxu0 %v3238_v22 }
  0x8d   :  { %882 = vmatprep.subr.bf16.mxu0 %v3249_v23 }
  0x8e   :  { %3098 = vmatpush3.bf16.msra.mxu1 %v3246_v31  ;;  %v3314_v31 = vld [vmem:[#allocation7 + $0x188] ss:$12 sps:$4 sm:$0xff]  }
  0x8f   :  { %331 = vmatmul.mubr.bf16.vlgmr.msra.gmra.mrb[0].mxu0 %v120_v25  ;;  %2959 = vmatprep.subr.bf16.mxu1 %v3274_v32 }
  0x90   :  { %883 = vmatpush1.bf16.msra.mxu0 %v3247_v26 }
  0x91   :  { %884 = vmatprep.subr.bf16.mxu0 %v3252_v27  ;;  %3100 = vmatmul.mubr.bf16.vlgmr.msra.gmra.mrb[0].mxu1 %v120_v25 }
  0x92   :  { %2960 = vmatpush3.bf16.msra.mxu1 %v3275_v35  ;;  %v3318_v35 = vld [vmem:[#allocation7 + $0x1a0] ss:$12 sps:$4 sm:$0xff]  }
  0x93   :  { %2961 = vmatprep.subr.bf16.mxu1 %v3279_v36 }
  0x94   :  { %885 = vmatpush1.bf16.msra.mxu0 %v3250_v29 }
  0x95   :  { %886 = vmatprep.subr.bf16.mxu0 %v3255_v30  ;;  %v3311_v30 = vld [vmem:[#allocation7 + $0x180] ss:$12 sps:$4 sm:$0xff]  }
  0x96   :  { %2962 = vmatpush3.bf16.msra.mxu1 %v3280_v39 }
  0x97   :  { %2963 = vmatprep.subr.bf16.mxu1 %v3284_v40 }
  0x98   :  { %887 = vmatpush1.bf16.msra.mxu0 %v3253_v33  ;;  %v3317_v33 = vld [vmem:[#allocation7 + $0x19c] ss:$12 sps:$4 sm:$0xff]  }
  0x99   :  { %888 = vmatprep.subr.bf16.mxu0 %v3258_v34  ;;  %v3315_v34 = vld [vmem:[#allocation7 + $0x198] ss:$12 sps:$4 sm:$0xff]  }
  0x9a   :  { %2964 = vmatpush3.bf16.msra.mxu1 %v3285_v44  ;;  %v3323_v44 = vld [vmem:[#allocation7 + $0x1c8] ss:$12 sps:$4 sm:$0xff]  }
  0x9b   :  { %2965 = vmatprep.subr.bf16.mxu1 %v3289_v45  ;;  %v3326_v45 = vld [vmem:[#allocation7 + $0x1d0] ss:$12 sps:$4 sm:$0xff]  }
  0x9c   :  { %889 = vmatpush1.bf16.msra.mxu0 %v3256_v37  ;;  %v3321_v37 = vld [vmem:[#allocation7 + $0x1b4] ss:$12 sps:$4 sm:$0xff]  }
  0x9d   :  { %890 = vmatprep.subr.bf16.mxu0 %v3261_v38 }
  0x9e   :  { %2966 = vmatpush3.bf16.msra.mxu1 %v3290_v47  ;;  %v3916_v47 = vsub.s32 2, %v156_v15  ;;  %v3366_v15 = vld [vmem:[#allocation8 + $0xac] ss:$12 sps:$4 sm:$0xff]  }
  0x9f   :  { %2967 = vmatprep.subr.bf16.mxu1 %v3294_v48  ;;  %v3327_v48 = vld [vmem:[#allocation7 + $0x1e0] ss:$12 sps:$4 sm:$0xff]  }
  0xa0   :  { %891 = vmatpush1.bf16.msra.mxu0 %v3259_v41  ;;  %v3319_v41 = vld [vmem:[#allocation7 + $0x1b0] ss:$12 sps:$4 sm:$0xff]  }
  0xa1   :  { %892 = vmatprep.subr.bf16.mxu0 %v3264_v42  ;;  %v3322_v42 = vld [vmem:[#allocation7 + $0x1b8] ss:$12 sps:$4 sm:$0xff]  }
  0xa2   :  { %2968 = vmatpush3.bf16.msra.mxu1 %v3295_v51  ;;  %v166_v51 = vrot.slane %v3902_v17, %v3916_v47  ;;  %v3364_v17 = vld [vmem:[#allocation8 + $0xa8] ss:$12 sps:$4 sm:$0xff]  }
  0xa3   :  { %2969 = vmatprep.subr.bf16.mxu1 %v3299_v52  ;;  %v3331_v52 = vld [vmem:[#allocation7 + $0x1f8] ss:$12 sps:$4 sm:$0xff]  }
  0xa4   :  { %893 = vmatpush1.bf16.msra.mxu0 %v3262_v43  ;;  %v3325_v43 = vld [vmem:[#allocation7 + $0x1cc] ss:$12 sps:$4 sm:$0xff]  }
  0xa5   :  { %894 = vmatprep.subr.bf16.mxu0 %v3267_v46  ;;  %v3329_v46 = vld [vmem:[#allocation7 + $0x1e4] ss:$12 sps:$4 sm:$0xff]  }
  0xa6   :  { %2970 = vmatpush3.bf16.msra.mxu1 %v3300_v55 }
  0xa7   :  { %2971 = vmatprep.subr.bf16.mxu1 %v3304_v6  ;;  %v3349_v6 = vld [vmem:[#allocation8 + $0x30] ss:$12 sps:$4 sm:$0xff]  }
  0xa8   :  { %895 = vmatpush1.bf16.msra.mxu0 %v3265_v49  ;;  %v3330_v49 = vld [vmem:[#allocation7 + $0x1e8] ss:$12 sps:$4 sm:$0xff]  }
  0xa9   :  { %896 = vmatprep.subr.bf16.mxu0 %v3270_v50  ;;  %v3333_v50 = vld [vmem:[#allocation7 + $0x1fc] ss:$12 sps:$4 sm:$0xff]  }
  0xaa   :  { %2972 = vmatpush3.bf16.msra.mxu1 %v3305_v8  ;;  %v3352_v8 = vld [vmem:[#allocation8 + $0x48] ss:$12 sps:$4 sm:$0xff]  }
  0xab   :  { %2973 = vmatprep.subr.bf16.mxu1 %v3309_v10  ;;  %v3355_v10 = vld [vmem:[#allocation8 + $0x60] ss:$12 sps:$4 sm:$0xff]  }
  0xac   :  { %897 = vmatpush1.bf16.msra.mxu0 %v3268_v53  ;;  %v3334_v53 = vld [vmem:[#allocation7 + $0x200] ss:$12 sps:$4 sm:$0xff]  }
  0xad   :  { %898 = vmatprep.subr.bf16.mxu0 %v3273_v54  ;;  %v3337_v54 = vld [vmem:[#allocation7 + $0x214] ss:$12 sps:$4 sm:$0xff]  }
  0xae   :  { %2974 = vmatpush3.bf16.msra.mxu1 %v3310_v12  ;;  %v3358_v12 = vld [vmem:[#allocation8 + $0x78] ss:$12 sps:$4 sm:$0xff]  }
  0xaf   :  { %3103 = vmatprep.subr.bf16.mxu1 %v3737_v0 }
  0xb0   :  { %899 = vmatpush1.bf16.msra.mxu0 %v3271_v56  ;;  %v3335_v56 = vld [vmem:[#allocation7 + $0x210] ss:$12 sps:$4 sm:$0xff]  }
  0xb1   :  { %900 = vmatprep.subr.bf16.mxu0 %v3278_v57  ;;  %v3338_v57 = vld [vmem:[#allocation7 + $0x218] ss:$12 sps:$4 sm:$0xff]  }
  0xb4   :  { %901 = vmatpush1.bf16.msra.mxu0 %v3276_v58  ;;  %v3341_v58 = vld [vmem:[#allocation7 + $0x22c] ss:$12 sps:$4 sm:$0xff]  }
  0xb5   :  { %902 = vmatprep.subr.bf16.mxu0 %v3283_v59 }
  0xb8   :  { %903 = vmatpush1.bf16.msra.mxu0 %v3281_v60  ;;  %v3339_v60 = vld [vmem:[#allocation7 + $0x228] ss:$12 sps:$4 sm:$0xff]  }
  0xb9   :  { %904 = vmatprep.subr.bf16.mxu0 %v3288_v61  ;;  %v3342_v61 = vld [vmem:[#allocation7 + $0x230] ss:$12 sps:$4 sm:$0xff]  }
  0xbc   :  { %905 = vmatpush1.bf16.msra.mxu0 %v3286_v62  ;;  %v3345_v62 = vld [vmem:[#allocation8 + $0x4] ss:$12 sps:$4 sm:$0xff]  }
  0xbd   :  { %906 = vmatprep.subr.bf16.mxu0 %v3293_v63 }
  0xc0   :  { %907 = vmatpush1.bf16.msra.mxu0 %v3291_v2  ;;  %v3343_v2 = vld [vmem:[#allocation8] ss:$12 sps:$4 sm:$0xff]  }
  0xc1   :  { %908 = vmatprep.subr.bf16.mxu0 %v3298_v3  ;;  %v3348_v3 = vld [vmem:[#allocation8 + $0x1c] ss:$12 sps:$4 sm:$0xff]  }
  0xc4   :  { %909 = vmatpush1.bf16.msra.mxu0 %v3296_v4  ;;  %v3346_v4 = vld [vmem:[#allocation8 + $0x18] ss:$12 sps:$4 sm:$0xff]  }
  0xc5   :  { %910 = vmatprep.subr.bf16.mxu0 %v3303_v5  ;;  %v3351_v5 = vld [vmem:[#allocation8 + $0x34] ss:$12 sps:$4 sm:$0xff]  }
  0xc8   :  { %911 = vmatpush1.bf16.msra.mxu0 %v3301_v7  ;;  %v3354_v7 = vld [vmem:[#allocation8 + $0x4c] ss:$12 sps:$4 sm:$0xff]  }
  0xc9   :  { %912 = vmatprep.subr.bf16.mxu0 %v3308_v9  ;;  %v3357_v9 = vld [vmem:[#allocation8 + $0x64] ss:$12 sps:$4 sm:$0xff]  }
  0xcc   :  { %913 = vmatpush1.bf16.msra.mxu0 %v3306_v11  ;;  %v3360_v11 = vld [vmem:[#allocation8 + $0x7c] ss:$12 sps:$4 sm:$0xff]  }
  0xcd   :  { %923 = vmatprep.subr.bf16.mxu0 %v3313_v13  ;;  %v3363_v13 = vld [vmem:[#allocation8 + $0x94] ss:$12 sps:$4 sm:$0xff]  }
 0x162   :  { %v332_v21 = vpop.f32.mrb[0].mxu0 }
 0x163   :  { %v333_v22 = vadd.f32 %v332_v21, %v158_v19  ;;  %v334_v23 = vpop.f32.mrb[1].mxu0  ;;  %v3369_v19 = vld [vmem:[#allocation8 + $0xc4] ss:$12 sps:$4 sm:$0xff]   ;;  %v3371_v21 = vld [vmem:[#allocation8 + $0x8] ss:$12 sps:$4 sm:$0xff]  }
 0x164   :  { %v335_v24 = vadd.f32 %v334_v23, %v162_v20  ;;  %v336_v25 = vpop.f32.mrb[2].mxu0  ;;  %v373_v36 = vpop.f32.mrb[0].mxu1  ;;  %v3370_v20 = vld [vmem:[#allocation8 + $0xc8] ss:$12 sps:$4 sm:$0xff]   ;;  %v3375_v23 = vld [vmem:[#allocation8 + $0xe0] ss:$12 sps:$4 sm:$0xff]  }
 0x165   :  { %v379_v26 = vmax.f32 %v333_v22, 0.0  ;;  %v337_v27 = vpop.f32.mrb[3].mxu0  ;;  %v3101_v38 = vpop.f32.mrb[1].mxu1  ;;  %v374_v55 = vadd.f32 %v373_v36, %v166_v51  ;;  %v3367_v22 = vld [vmem:[#allocation8 + $0xc0] ss:$12 sps:$4 sm:$0xff]  }
 0x166   :  { %v380_v28 = vmax.f32 %v335_v24, 0.0  ;;  %v376_v39 = vpop.f32.mrb[2].mxu1  ;;  %v3374_v24 = vld [vmem:[#allocation8 + $0xdc] ss:$12 sps:$4 sm:$0xff]   ;;  %v3376_v25 = vld [vmem:[#allocation8 + $0x20] ss:$12 sps:$4 sm:$0xff]  }
 0x167   :  { %v382_v32 = vpack.c.bf16 %v379_v26, %v379_v26  ;;  %v3102_v40 = vpop.f32.mrb[3].mxu1  ;;  %v381_v59 = vmax.f32 %v374_v55, 0.0  ;;  %v3380_v26 = vld [vmem:[#allocation8 + $0xf8] ss:$12 sps:$4 sm:$0xff]   ;;  %v3395_v38 = vld [vmem:[#allocation8 + $0x140] ss:$12 sps:$4 sm:$0xff]  }
 0x168   :  { %v383_v29 = vpack.c.bf16 %v380_v28, %v380_v28  ;;  %v3372_v27 = vld [vmem:[#allocation8 + $0xd8] ss:$12 sps:$4 sm:$0xff]   ;;  %v3379_v28 = vld [vmem:[#allocation8 + $0xf4] ss:$12 sps:$4 sm:$0xff]   ;;  %v3394_v40 = vld [vmem:[#allocation8 + $0x13c] ss:$12 sps:$4 sm:$0xff]  }
 0x169   :  { %v384_v63 = vpack.c.bf16 %v381_v59, %v381_v59  ;;  %v3389_v36 = vld [vmem:[#allocation8 + $0x124] ss:$12 sps:$4 sm:$0xff]   ;;  %v3387_v39 = vld [vmem:[#allocation8 + $0x120] ss:$12 sps:$4 sm:$0xff]  }
 0x16a   :  { %914 = vmatprep.mubr.bf16.mxu0 %v383_v29  ;;  %996 = vmatprep.mubr.bf16.mxu1 %v383_v29  ;;  %v3381_v29 = vld [vmem:[#allocation8 + $0x38] ss:$12 sps:$4 sm:$0xff]   ;;  %v3406_v51 = vld [vmem:[#allocation8 + $0xb0] ss:$12 sps:$4 sm:$0xff]  }
 0x16b   :  { %915 = vmatmul.mubr.bf16.vlgmr.msra.gmra.mrb[4].mxu0 %v382_v32  ;;  %997 = vmatmul.mubr.bf16.vlgmr.msra.gmra.mrb[4].mxu1 %v382_v32  ;;  %v3384_v32 = vld [vmem:[#allocation8 + $0x10c] ss:$12 sps:$4 sm:$0xff]  }
 0x16c   :  { %924 = vmatpush1.bf16.msra.mxu0 %v3311_v30  ;;  %3104 = vmatpush3.bf16.msra.mxu1 %v3314_v31  ;;  %v3385_v30 = vld [vmem:[#allocation8 + $0x110] ss:$12 sps:$4 sm:$0xff]  }
 0x16d   :  { %925 = vmatprep.subr.bf16.mxu0 %v3317_v33  ;;  %3105 = vmatprep.subr.bf16.mxu1 %v3737_v0  ;;  %v3377_v31 = vld [vmem:[#allocation8 + $0xf0] ss:$12 sps:$4 sm:$0xff]  }
 0x16e   :  { %955 = vmatprep.mubr.bf16.mxu0 %v3738_v1  ;;  %3119 = vmatprep.mubr.msk.bf16.mxu1 %vm3739_vm0, %v3737_v0  ;;  %v3386_v33 = vld [vmem:[#allocation8 + $0x50] ss:$12 sps:$4 sm:$0xff]  }
 0x170   :  { %926 = vmatpush1.bf16.msra.mxu0 %v3315_v34  ;;  %3106 = vmatpush3.bf16.msra.mxu1 %v3318_v35  ;;  %v3390_v34 = vld [vmem:[#allocation8 + $0x128] ss:$12 sps:$4 sm:$0xff]  }
 0x171   :  { %927 = vmatprep.subr.bf16.mxu0 %v3321_v37  ;;  %3107 = vmatprep.subr.bf16.mxu1 %v3737_v0  ;;  %v3382_v35 = vld [vmem:[#allocation8 + $0x108] ss:$12 sps:$4 sm:$0xff]  }
 0x172   :  { %v3391_v37 = vld [vmem:[#allocation8 + $0x68] ss:$12 sps:$4 sm:$0xff]  }
 0x174   :  { %928 = vmatpush1.bf16.msra.mxu0 %v3319_v41  ;;  %3108 = vmatpush3.bf16.msra.mxu1 %v3322_v42  ;;  %v3396_v41 = vld [vmem:[#allocation8 + $0x80] ss:$12 sps:$4 sm:$0xff]   ;;  %v3392_v42 = vld [vmem:[#allocation8 + $0x138] ss:$12 sps:$4 sm:$0xff]  }
 0x175   :  { %929 = vmatprep.subr.bf16.mxu0 %v3325_v43  ;;  %3109 = vmatprep.subr.bf16.mxu1 %v3737_v0  ;;  %v3399_v43 = vld [vmem:[#allocation8 + $0x154] ss:$12 sps:$4 sm:$0xff]  }
 0x178   :  { %930 = vmatpush1.bf16.msra.mxu0 %v3323_v44  ;;  %3110 = vmatpush3.bf16.msra.mxu1 %v3326_v45  ;;  %v3400_v44 = vld [vmem:[#allocation8 + $0x158] ss:$12 sps:$4 sm:$0xff]   ;;  %v3397_v45 = vld [vmem:[#allocation8 + $0x150] ss:$12 sps:$4 sm:$0xff]  }
 0x179   :  { %931 = vmatprep.subr.bf16.mxu0 %v3329_v46  ;;  %3111 = vmatprep.subr.bf16.mxu1 %v3737_v0  ;;  %v3401_v46 = vld [vmem:[#allocation8 + $0x98] ss:$12 sps:$4 sm:$0xff]  }
 0x17c   :  { %932 = vmatpush1.bf16.msra.mxu0 %v3327_v48  ;;  %3112 = vmatpush3.bf16.msra.mxu1 %v3330_v49  ;;  %v3404_v48 = vld [vmem:[#allocation8 + $0x16c] ss:$12 sps:$4 sm:$0xff]   ;;  %v3405_v49 = vld [vmem:[#allocation8 + $0x170] ss:$12 sps:$4 sm:$0xff]  }
 0x17d   :  { %933 = vmatprep.subr.bf16.mxu0 %v3333_v50  ;;  %3113 = vmatprep.subr.bf16.mxu1 %v3737_v0  ;;  %v3402_v50 = vld [vmem:[#allocation8 + $0x168] ss:$12 sps:$4 sm:$0xff]  }
 0x180   :  { %934 = vmatpush1.bf16.msra.mxu0 %v3331_v52  ;;  %3114 = vmatpush3.bf16.msra.mxu1 %v3334_v53  ;;  %v3409_v52 = vld [vmem:[#allocation8 + $0x184] ss:$12 sps:$4 sm:$0xff]  }
 0x181   :  { %935 = vmatprep.subr.bf16.mxu0 %v3337_v54  ;;  %3115 = vmatprep.subr.bf16.mxu1 %v3737_v0 }
 0x184   :  { %936 = vmatpush1.bf16.msra.mxu0 %v3335_v56  ;;  %3116 = vmatpush3.bf16.msra.mxu1 %v3338_v57 }
 0x185   :  { %937 = vmatprep.subr.bf16.mxu0 %v3341_v58  ;;  %3117 = vmatprep.subr.bf16.mxu1 %v3737_v0  ;;  %v481_v58 = vld [vmem:[%s3999_s4] sm:$0x7] }
 0x186   :  { %v494_v59 = vrot.slane %v481_v58, %v3916_v47 }
 0x188   :  { %938 = vmatpush1.bf16.msra.mxu0 %v3339_v60  ;;  %3118 = vmatpush3.bf16.msra.mxu1 %v3342_v61  ;;  %v486_v60 = vrot.slane %v481_v58, %v3897_v16  ;;  %v490_v61 = vrot.slane %v481_v58, %v3904_v18  ;;  %v3462_v58 = vld [vmem:[#allocation10 + $0xac] ss:$12 sps:$4 sm:$0xff]  }
 0x189   :  { %1547 = vmatprep.subr.bf16.mxu1 %v3345_v62  ;;  %2990 = vmatprep.subr.bf16.mxu0 %v3370_v20  ;;  %v3413_v20 = vld [vmem:[#allocation8 + $0x19c] ss:$12 sps:$4 sm:$0xff]  }
 0x18b   :  { %956 = vmatmul.mubr.bf16.vlgmr.msra.gmra.mrb[4].mxu0 %v384_v63  ;;  %3120 = vmatmul.mubr.bf16.vlgmr.msra.gmra.mrb[8].mxu1 %v384_v63 }
 0x18c   :  { %1548 = vmatpush1.bf16.msra.mxu1 %v3343_v2  ;;  %2991 = vmatpush3.bf16.msra.mxu0 %v3371_v21  ;;  %v3411_v21 = vld [vmem:[#allocation8 + $0x198] ss:$12 sps:$4 sm:$0xff]  }
 0x18d   :  { %1549 = vmatprep.subr.bf16.mxu1 %v3348_v3  ;;  %2992 = vmatprep.subr.bf16.mxu0 %v3375_v23  ;;  %v3417_v23 = vld [vmem:[#allocation8 + $0x1b4] ss:$12 sps:$4 sm:$0xff]  }
 0x190   :  { %1550 = vmatpush1.bf16.msra.mxu1 %v3346_v4  ;;  %2993 = vmatpush3.bf16.msra.mxu0 %v3376_v25  ;;  %v3418_v25 = vld [vmem:[#allocation8 + $0x1b8] ss:$12 sps:$4 sm:$0xff]  }
 0x191   :  { %1551 = vmatprep.subr.bf16.mxu1 %v3351_v5  ;;  %2994 = vmatprep.subr.bf16.mxu0 %v3380_v26  ;;  %v3421_v26 = vld [vmem:[#allocation8 + $0x1cc] ss:$12 sps:$4 sm:$0xff]  }
 0x194   :  { %1552 = vmatpush1.bf16.msra.mxu1 %v3349_v6  ;;  %2995 = vmatpush3.bf16.msra.mxu0 %v3381_v29  ;;  %v3425_v29 = vld [vmem:[#allocation8 + $0x1e4] ss:$12 sps:$4 sm:$0xff]  }
 0x195   :  { %1553 = vmatprep.subr.bf16.mxu1 %v3354_v7  ;;  %2996 = vmatprep.subr.bf16.mxu0 %v3385_v30  ;;  %v3423_v30 = vld [vmem:[#allocation8 + $0x1e0] ss:$12 sps:$4 sm:$0xff]  }
 0x198   :  { %1554 = vmatpush1.bf16.msra.mxu1 %v3352_v8  ;;  %2997 = vmatpush3.bf16.msra.mxu0 %v3386_v33  ;;  %v3427_v33 = vld [vmem:[#allocation8 + $0x1f8] ss:$12 sps:$4 sm:$0xff]  }
 0x199   :  { %1555 = vmatprep.subr.bf16.mxu1 %v3357_v9  ;;  %2998 = vmatprep.subr.bf16.mxu0 %v3390_v34  ;;  %v3430_v34 = vld [vmem:[#allocation8 + $0x200] ss:$12 sps:$4 sm:$0xff]  }
 0x19c   :  { %1556 = vmatpush1.bf16.msra.mxu1 %v3355_v10  ;;  %2999 = vmatpush3.bf16.msra.mxu0 %v3391_v37  ;;  %v3434_v37 = vld [vmem:[#allocation8 + $0x218] ss:$12 sps:$4 sm:$0xff]  }
 0x19d   :  { %1557 = vmatprep.subr.bf16.mxu1 %v3360_v11  ;;  %3000 = vmatprep.subr.bf16.mxu0 %v3395_v38  ;;  %v3437_v38 = vld [vmem:[#allocation8 + $0x22c] ss:$12 sps:$4 sm:$0xff]  }
 0x1a0   :  { %1558 = vmatpush1.bf16.msra.mxu1 %v3358_v12  ;;  %3001 = vmatpush3.bf16.msra.mxu0 %v3396_v41 }
 0x1a1   :  { %1559 = vmatprep.subr.bf16.mxu1 %v3363_v13  ;;  %3002 = vmatprep.subr.bf16.mxu0 %v3400_v44 }
 0x1a4   :  { %1560 = vmatpush1.bf16.msra.mxu1 %v3361_v14  ;;  %3003 = vmatpush3.bf16.msra.mxu0 %v3401_v46  ;;  %v3442_v46 = vld [vmem:[#allocation10 + $0x18] ss:$12 sps:$4 sm:$0xff]  }
 0x1a5   :  { %1561 = vmatprep.subr.bf16.mxu1 %v3366_v15  ;;  %3004 = vmatprep.subr.bf16.mxu0 %v3405_v49  ;;  %v3407_v15 = vld [vmem:[#allocation8 + $0x180] ss:$12 sps:$4 sm:$0xff]   ;;  %v3445_v49 = vld [vmem:[#allocation10 + $0x30] ss:$12 sps:$4 sm:$0xff]  }
 0x1a8   :  { %1562 = vmatpush1.bf16.msra.mxu1 %v3364_v17  ;;  %3005 = vmatpush3.bf16.msra.mxu0 %v3406_v51  ;;  %v3410_v17 = vld [vmem:[#allocation8 + $0x188] ss:$12 sps:$4 sm:$0xff]  }
 0x1a9   :  { %1563 = vmatprep.subr.bf16.mxu1 %v3369_v19  ;;  %3123 = vmatprep.subr.bf16.mxu0 %v3737_v0  ;;  %v3448_v51 = vld [vmem:[#allocation10 + $0x48] ss:$12 sps:$4 sm:$0xff]  }
 0x1ac   :  { %1564 = vmatpush1.bf16.msra.mxu1 %v3367_v22  ;;  %v3414_v22 = vld [vmem:[#allocation8 + $0x1a0] ss:$12 sps:$4 sm:$0xff]  }
 0x1ad   :  { %1565 = vmatprep.subr.bf16.mxu1 %v3374_v24  ;;  %v3415_v24 = vld [vmem:[#allocation8 + $0x1b0] ss:$12 sps:$4 sm:$0xff]  }
 0x1b0   :  { %1566 = vmatpush1.bf16.msra.mxu1 %v3372_v27  ;;  %v3419_v27 = vld [vmem:[#allocation8 + $0x1c8] ss:$12 sps:$4 sm:$0xff]  }
 0x1b1   :  { %1567 = vmatprep.subr.bf16.mxu1 %v3379_v28  ;;  %v3422_v28 = vld [vmem:[#allocation8 + $0x1d0] ss:$12 sps:$4 sm:$0xff]  }
 0x1b4   :  { %1568 = vmatpush1.bf16.msra.mxu1 %v3377_v31  ;;  %v3426_v31 = vld [vmem:[#allocation8 + $0x1e8] ss:$12 sps:$4 sm:$0xff]  }
 0x1b5   :  { %1569 = vmatprep.subr.bf16.mxu1 %v3384_v32  ;;  %v3429_v32 = vld [vmem:[#allocation8 + $0x1fc] ss:$12 sps:$4 sm:$0xff]  }
 0x1b8   :  { %1570 = vmatpush1.bf16.msra.mxu1 %v3382_v35  ;;  %v3433_v35 = vld [vmem:[#allocation8 + $0x214] ss:$12 sps:$4 sm:$0xff]  }
 0x1b9   :  { %1571 = vmatprep.subr.bf16.mxu1 %v3389_v36  ;;  %v3431_v36 = vld [vmem:[#allocation8 + $0x210] ss:$12 sps:$4 sm:$0xff]  }
 0x1bc   :  { %1572 = vmatpush1.bf16.msra.mxu1 %v3387_v39  ;;  %v3435_v39 = vld [vmem:[#allocation8 + $0x228] ss:$12 sps:$4 sm:$0xff]  }
 0x1bd   :  { %1573 = vmatprep.subr.bf16.mxu1 %v3394_v40  ;;  %v3438_v40 = vld [vmem:[#allocation8 + $0x230] ss:$12 sps:$4 sm:$0xff]  }
 0x1c0   :  { %1574 = vmatpush1.bf16.msra.mxu1 %v3392_v42  ;;  %v3441_v42 = vld [vmem:[#allocation10 + $0x4] ss:$12 sps:$4 sm:$0xff]  }
 0x1c1   :  { %1575 = vmatprep.subr.bf16.mxu1 %v3399_v43  ;;  %v3439_v43 = vld [vmem:[#allocation10] ss:$12 sps:$4 sm:$0xff]  }
 0x1c4   :  { %1576 = vmatpush1.bf16.msra.mxu1 %v3397_v45  ;;  %v3444_v45 = vld [vmem:[#allocation10 + $0x1c] ss:$12 sps:$4 sm:$0xff]  }
 0x1c5   :  { %1577 = vmatprep.subr.bf16.mxu1 %v3404_v48  ;;  %v3447_v48 = vld [vmem:[#allocation10 + $0x34] ss:$12 sps:$4 sm:$0xff]  }
 0x1c8   :  { %1578 = vmatpush1.bf16.msra.mxu1 %v3402_v50  ;;  %v3450_v50 = vld [vmem:[#allocation10 + $0x4c] ss:$12 sps:$4 sm:$0xff]  }
 0x1c9   :  { %1588 = vmatprep.subr.bf16.mxu1 %v3409_v52  ;;  %v3453_v52 = vld [vmem:[#allocation10 + $0x64] ss:$12 sps:$4 sm:$0xff]  }
 0x23e   :  { %v2975_v53 = vpop.f32.mrb[4].mxu1 }
 0x23f   :  { %v2976_v54 = vpop.f32.mrb[5].mxu1 }
 0x240   :  { %v2977_v55 = vadd.f32 %v2976_v54, %v2975_v53  ;;  %v2978_v56 = vpop.f32.mrb[6].mxu1  ;;  %v3451_v53 = vld [vmem:[#allocation10 + $0x60] ss:$12 sps:$4 sm:$0xff]   ;;  %v3456_v54 = vld [vmem:[#allocation10 + $0x7c] ss:$12 sps:$4 sm:$0xff]  }
 0x241   :  { %v2979_v57 = vpop.f32.mrb[7].mxu1  ;;  %v3459_v56 = vld [vmem:[#allocation10 + $0x94] ss:$12 sps:$4 sm:$0xff]  }
 0x242   :  { %v999_v62 = vadd.f32 %v2977_v55, %v494_v59  ;;  %v3454_v55 = vld [vmem:[#allocation10 + $0x78] ss:$12 sps:$4 sm:$0xff]   ;;  %v3457_v57 = vld [vmem:[#allocation10 + $0x90] ss:$12 sps:$4 sm:$0xff]   ;;  %v3460_v59 = vld [vmem:[#allocation10 + $0xa8] ss:$12 sps:$4 sm:$0xff]  }
 0x25e   :  { %v957_v63 = vpop.f32.mrb[4].mxu0  ;;  %v1038_v2 = vpop.f32.mrb[8].mxu1 }
 0x25f   :  { %v3183_v3 = vadd.f32 %v957_v63, %v486_v60  ;;  %v3931_v4 = vadd.f32 %v1038_v2, %v999_v62  ;;  %v959_v5 = vpop.f32.mrb[5].mxu0  ;;  %v3121_v6 = vpop.f32.mrb[9].mxu1  ;;  %v3465_v60 = vld [vmem:[#allocation10 + $0xc4] ss:$12 sps:$4 sm:$0xff]   ;;  %v3467_v62 = vld [vmem:[#allocation10 + $0x8] ss:$12 sps:$4 sm:$0xff]  }
 0x260   :  { %v3184_v7 = vadd.f32 %v959_v5, %v490_v61  ;;  %v961_v8 = vpop.f32.mrb[6].mxu0  ;;  %v1041_v9 = vpop.f32.mrb[10].mxu1  ;;  %v3466_v61 = vld [vmem:[#allocation10 + $0xc8] ss:$12 sps:$4 sm:$0xff]   ;;  %v3463_v63 = vld [vmem:[#allocation10 + $0xc0] ss:$12 sps:$4 sm:$0xff]  }
 0x261   :  { %v1044_v10 = vmax.f32 %v3183_v3, 0.0  ;;  %v962_v11 = vpop.f32.mrb[7].mxu0  ;;  %v3122_v12 = vpop.f32.mrb[11].mxu1  ;;  %v1046_v41 = vmax.f32 %v3931_v4, 0.0  ;;  %v3471_v2 = vld [vmem:[#allocation10 + $0xe0] ss:$12 sps:$4 sm:$0xff]  }
 0x262   :  { %v1045_v13 = vmax.f32 %v3184_v7, 0.0  ;;  %v3470_v3 = vld [vmem:[#allocation10 + $0xdc] ss:$12 sps:$4 sm:$0xff]   ;;  %v3472_v4 = vld [vmem:[#allocation10 + $0x20] ss:$12 sps:$4 sm:$0xff]  }
 0x263   :  { %v1047_v19 = vpack.c.bf16 %v1044_v10, %v1044_v10  ;;  %v1049_v44 = vpack.c.bf16 %v1046_v41, %v1046_v41  ;;  %v3476_v5 = vld [vmem:[#allocation10 + $0xf8] ss:$12 sps:$4 sm:$0xff]   ;;  %v3475_v7 = vld [vmem:[#allocation10 + $0xf4] ss:$12 sps:$4 sm:$0xff]   ;;  %v3481_v9 = vld [vmem:[#allocation10 + $0x110] ss:$12 sps:$4 sm:$0xff]  }
 0x264   :  { %v1048_v14 = vpack.c.bf16 %v1045_v13, %v1045_v13  ;;  %v3468_v6 = vld [vmem:[#allocation10 + $0xd8] ss:$12 sps:$4 sm:$0xff]   ;;  %v3473_v10 = vld [vmem:[#allocation10 + $0xf0] ss:$12 sps:$4 sm:$0xff]   ;;  %v3486_v13 = vld [vmem:[#allocation10 + $0x128] ss:$12 sps:$4 sm:$0xff]  }
 0x265   :  { %v3477_v8 = vld [vmem:[#allocation10 + $0x38] ss:$12 sps:$4 sm:$0xff]   ;;  %v3482_v12 = vld [vmem:[#allocation10 + $0x50] ss:$12 sps:$4 sm:$0xff]  }
 0x266   :  { %1579 = vmatprep.mubr.bf16.mxu1 %v1048_v14  ;;  %1661 = vmatprep.mubr.bf16.mxu0 %v1048_v14  ;;  %v3480_v11 = vld [vmem:[#allocation10 + $0x10c] ss:$12 sps:$4 sm:$0xff]   ;;  %v3478_v14 = vld [vmem:[#allocation10 + $0x108] ss:$12 sps:$4 sm:$0xff]  }
 0x267   :  { %1580 = vmatmul.mubr.bf16.vlgmr.msra.gmra.mrb[12].mxu1 %v1047_v19  ;;  %1662 = vmatmul.mubr.bf16.vlgmr.msra.gmra.mrb[8].mxu0 %v1047_v19  ;;  %v3491_v19 = vld [vmem:[#allocation10 + $0x140] ss:$12 sps:$4 sm:$0xff]  }
 0x268   :  { %1589 = vmatpush1.bf16.msra.mxu1 %v3407_v15  ;;  %3124 = vmatpush3.bf16.msra.mxu0 %v3410_v17  ;;  %v3485_v15 = vld [vmem:[#allocation10 + $0x124] ss:$12 sps:$4 sm:$0xff]   ;;  %v3487_v17 = vld [vmem:[#allocation10 + $0x68] ss:$12 sps:$4 sm:$0xff]  }
 0x269   :  { %1590 = vmatprep.subr.bf16.mxu1 %v3413_v20  ;;  %3125 = vmatprep.subr.bf16.mxu0 %v3737_v0  ;;  %v3483_v20 = vld [vmem:[#allocation10 + $0x120] ss:$12 sps:$4 sm:$0xff]  }
 0x26a   :  { %1620 = vmatprep.mubr.bf16.mxu1 %v3738_v1  ;;  %3139 = vmatprep.mubr.msk.bf16.mxu0 %vm3739_vm0, %v3737_v0 }
 0x26c   :  { %1591 = vmatpush1.bf16.msra.mxu1 %v3411_v21  ;;  %3126 = vmatpush3.bf16.msra.mxu0 %v3414_v22  ;;  %v3490_v21 = vld [vmem:[#allocation10 + $0x13c] ss:$12 sps:$4 sm:$0xff]   ;;  %v3492_v22 = vld [vmem:[#allocation10 + $0x80] ss:$12 sps:$4 sm:$0xff]  }
 0x26d   :  { %1592 = vmatprep.subr.bf16.mxu1 %v3417_v23  ;;  %3127 = vmatprep.subr.bf16.mxu0 %v3737_v0  ;;  %v3488_v23 = vld [vmem:[#allocation10 + $0x138] ss:$12 sps:$4 sm:$0xff]  }
 0x270   :  { %1593 = vmatpush1.bf16.msra.mxu1 %v3415_v24  ;;  %3128 = vmatpush3.bf16.msra.mxu0 %v3418_v25  ;;  %v3495_v24 = vld [vmem:[#allocation10 + $0x154] ss:$12 sps:$4 sm:$0xff]   ;;  %v3496_v25 = vld [vmem:[#allocation10 + $0x158] ss:$12 sps:$4 sm:$0xff]  }
 0x271   :  { %1594 = vmatprep.subr.bf16.mxu1 %v3421_v26  ;;  %3129 = vmatprep.subr.bf16.mxu0 %v3737_v0  ;;  %v3493_v26 = vld [vmem:[#allocation10 + $0x150] ss:$12 sps:$4 sm:$0xff]  }
 0x274   :  { %1595 = vmatpush1.bf16.msra.mxu1 %v3419_v27  ;;  %3130 = vmatpush3.bf16.msra.mxu0 %v3422_v28  ;;  %v3497_v27 = vld [vmem:[#allocation10 + $0x98] ss:$12 sps:$4 sm:$0xff]  }
 0x275   :  { %1596 = vmatprep.subr.bf16.mxu1 %v3425_v29  ;;  %3131 = vmatprep.subr.bf16.mxu0 %v3737_v0  ;;  %v3500_v28 = vld [vmem:[#allocation10 + $0x16c] ss:$12 sps:$4 sm:$0xff]   ;;  %v3501_v29 = vld [vmem:[#allocation10 + $0x170] ss:$12 sps:$4 sm:$0xff]  }
 0x278   :  { %1597 = vmatpush1.bf16.msra.mxu1 %v3423_v30  ;;  %3132 = vmatpush3.bf16.msra.mxu0 %v3426_v31  ;;  %v3498_v30 = vld [vmem:[#allocation10 + $0x168] ss:$12 sps:$4 sm:$0xff]   ;;  %v3502_v31 = vld [vmem:[#allocation10 + $0xb0] ss:$12 sps:$4 sm:$0xff]  }
 0x279   :  { %1598 = vmatprep.subr.bf16.mxu1 %v3429_v32  ;;  %3133 = vmatprep.subr.bf16.mxu0 %v3737_v0  ;;  %v3505_v32 = vld [vmem:[#allocation10 + $0x184] ss:$12 sps:$4 sm:$0xff]  }
 0x27c   :  { %1599 = vmatpush1.bf16.msra.mxu1 %v3427_v33  ;;  %3134 = vmatpush3.bf16.msra.mxu0 %v3430_v34 }
 0x27d   :  { %1600 = vmatprep.subr.bf16.mxu1 %v3433_v35  ;;  %3135 = vmatprep.subr.bf16.mxu0 %v3737_v0 }
 0x280   :  { %1601 = vmatpush1.bf16.msra.mxu1 %v3431_v36  ;;  %3136 = vmatpush3.bf16.msra.mxu0 %v3434_v37 }
 0x281   :  { %1602 = vmatprep.subr.bf16.mxu1 %v3437_v38  ;;  %3137 = vmatprep.subr.bf16.mxu0 %v3737_v0  ;;  %v1146_v38 = vld [vmem:[%s4001_s6] sm:$0x7] }
 0x282   :  { %v1155_v41 = vrot.slane %v1146_v38, %v3904_v18 }
 0x284   :  { %1603 = vmatpush1.bf16.msra.mxu1 %v3435_v39  ;;  %3138 = vmatpush3.bf16.msra.mxu0 %v3438_v40  ;;  %v1159_v39 = vrot.slane %v1146_v38, %v3916_v47  ;;  %v1151_v40 = vrot.slane %v1146_v38, %v3897_v16  ;;  %v3551_v38 = vld [vmem:[#allocation11 + $0x68] sm:$0xff]  }
 0x285   :  { %2212 = vmatprep.subr.bf16.mxu0 %v3441_v42  ;;  %3021 = vmatprep.subr.bf16.mxu1 %v3466_v61  ;;  %v3509_v61 = vld [vmem:[#allocation10 + $0x19c] ss:$12 sps:$4 sm:$0xff]  }
 0x287   :  { %1621 = vmatmul.mubr.bf16.vlgmr.msra.gmra.mrb[12].mxu1 %v1049_v44  ;;  %3140 = vmatmul.mubr.bf16.vlgmr.msra.gmra.mrb[12].mxu0 %v1049_v44 }
 0x288   :  { %2213 = vmatpush1.bf16.msra.mxu0 %v3439_v43  ;;  %3022 = vmatpush3.bf16.msra.mxu1 %v3467_v62  ;;  %v3507_v62 = vld [vmem:[#allocation10 + $0x198] ss:$12 sps:$4 sm:$0xff]  }
 0x289   :  { %2214 = vmatprep.subr.bf16.mxu0 %v3444_v45  ;;  %3023 = vmatprep.subr.bf16.mxu1 %v3471_v2  ;;  %v3513_v2 = vld [vmem:[#allocation10 + $0x1b4] ss:$12 sps:$4 sm:$0xff]  }
 0x28c   :  { %2215 = vmatpush1.bf16.msra.mxu0 %v3442_v46  ;;  %3024 = vmatpush3.bf16.msra.mxu1 %v3472_v4  ;;  %v3514_v4 = vld [vmem:[#allocation10 + $0x1b8] ss:$12 sps:$4 sm:$0xff]  }
 0x28d   :  { %2216 = vmatprep.subr.bf16.mxu0 %v3447_v48  ;;  %3025 = vmatprep.subr.bf16.mxu1 %v3476_v5  ;;  %v3517_v5 = vld [vmem:[#allocation10 + $0x1cc] ss:$12 sps:$4 sm:$0xff]  }
 0x290   :  { %2217 = vmatpush1.bf16.msra.mxu0 %v3445_v49  ;;  %3026 = vmatpush3.bf16.msra.mxu1 %v3477_v8  ;;  %v3521_v8 = vld [vmem:[#allocation10 + $0x1e4] ss:$12 sps:$4 sm:$0xff]  }
 0x291   :  { %2218 = vmatprep.subr.bf16.mxu0 %v3450_v50  ;;  %3027 = vmatprep.subr.bf16.mxu1 %v3481_v9  ;;  %v3522_v9 = vld [vmem:[#allocation10 + $0x1e8] ss:$12 sps:$4 sm:$0xff]  }
 0x294   :  { %2219 = vmatpush1.bf16.msra.mxu0 %v3448_v51  ;;  %3028 = vmatpush3.bf16.msra.mxu1 %v3482_v12  ;;  %v3526_v12 = vld [vmem:[#allocation10 + $0x200] ss:$12 sps:$4 sm:$0xff]  }
 0x295   :  { %2220 = vmatprep.subr.bf16.mxu0 %v3453_v52  ;;  %3029 = vmatprep.subr.bf16.mxu1 %v3486_v13  ;;  %v3529_v13 = vld [vmem:[#allocation10 + $0x214] ss:$12 sps:$4 sm:$0xff]  }
 0x298   :  { %2221 = vmatpush1.bf16.msra.mxu0 %v3451_v53  ;;  %3030 = vmatpush3.bf16.msra.mxu1 %v3487_v17  ;;  %v3533_v17 = vld [vmem:[#allocation10 + $0x22c] ss:$12 sps:$4 sm:$0xff]  }
 0x299   :  { %2222 = vmatprep.subr.bf16.mxu0 %v3456_v54  ;;  %3031 = vmatprep.subr.bf16.mxu1 %v3491_v19  ;;  %v3531_v19 = vld [vmem:[#allocation10 + $0x228] ss:$12 sps:$4 sm:$0xff]  }
 0x29c   :  { %2223 = vmatpush1.bf16.msra.mxu0 %v3454_v55  ;;  %3032 = vmatpush3.bf16.msra.mxu1 %v3492_v22 }
 0x29d   :  { %2224 = vmatprep.subr.bf16.mxu0 %v3459_v56  ;;  %3033 = vmatprep.subr.bf16.mxu1 %v3496_v25  ;;  %v3537_v25 = vld [vmem:[#allocation11] sm:$0xff]  }
 0x2a0   :  { %2225 = vmatpush1.bf16.msra.mxu0 %v3457_v57  ;;  %3034 = vmatpush3.bf16.msra.mxu1 %v3497_v27  ;;  %v3538_v27 = vld [vmem:[#allocation11 + $0x88] sm:$0xff]  }
 0x2a1   :  { %2226 = vmatprep.subr.bf16.mxu0 %v3462_v58  ;;  %3035 = vmatprep.subr.bf16.mxu1 %v3501_v29  ;;  %v3503_v58 = vld [vmem:[#allocation10 + $0x180] ss:$12 sps:$4 sm:$0xff]   ;;  %v3542_v29 = vld [vmem:[#allocation11 + $0x50] sm:$0xff]  }
 0x2a4   :  { %2227 = vmatpush1.bf16.msra.mxu0 %v3460_v59  ;;  %3036 = vmatpush3.bf16.msra.mxu1 %v3502_v31  ;;  %v3506_v59 = vld [vmem:[#allocation10 + $0x188] ss:$12 sps:$4 sm:$0xff]  }
 0x2a5   :  { %2228 = vmatprep.subr.bf16.mxu0 %v3465_v60  ;;  %3143 = vmatprep.subr.bf16.mxu1 %v3737_v0  ;;  %v3543_v31 = vld [vmem:[#allocation11 + $0x10] sm:$0xff]  }
 0x2a8   :  { %2229 = vmatpush1.bf16.msra.mxu0 %v3463_v63  ;;  %v3510_v63 = vld [vmem:[#allocation10 + $0x1a0] ss:$12 sps:$4 sm:$0xff]  }
 0x2a9   :  { %2230 = vmatprep.subr.bf16.mxu0 %v3470_v3  ;;  %v3511_v3 = vld [vmem:[#allocation10 + $0x1b0] ss:$12 sps:$4 sm:$0xff]  }
 0x2ac   :  { %2231 = vmatpush1.bf16.msra.mxu0 %v3468_v6  ;;  %v3515_v6 = vld [vmem:[#allocation10 + $0x1c8] ss:$12 sps:$4 sm:$0xff]  }
 0x2ad   :  { %2232 = vmatprep.subr.bf16.mxu0 %v3475_v7  ;;  %v3518_v7 = vld [vmem:[#allocation10 + $0x1d0] ss:$12 sps:$4 sm:$0xff]  }
 0x2b0   :  { %2233 = vmatpush1.bf16.msra.mxu0 %v3473_v10  ;;  %v3525_v10 = vld [vmem:[#allocation10 + $0x1fc] ss:$12 sps:$4 sm:$0xff]  }
 0x2b1   :  { %2234 = vmatprep.subr.bf16.mxu0 %v3480_v11  ;;  %v3523_v11 = vld [vmem:[#allocation10 + $0x1f8] ss:$12 sps:$4 sm:$0xff]  }
 0x2b4   :  { %2235 = vmatpush1.bf16.msra.mxu0 %v3478_v14  ;;  %v3527_v14 = vld [vmem:[#allocation10 + $0x210] ss:$12 sps:$4 sm:$0xff]  }
 0x2b5   :  { %2236 = vmatprep.subr.bf16.mxu0 %v3485_v15  ;;  %v3530_v15 = vld [vmem:[#allocation10 + $0x218] ss:$12 sps:$4 sm:$0xff]  }
 0x2b8   :  { %2237 = vmatpush1.bf16.msra.mxu0 %v3483_v20  ;;  %v3534_v20 = vld [vmem:[#allocation10 + $0x230] ss:$12 sps:$4 sm:$0xff]  }
 0x2b9   :  { %2238 = vmatprep.subr.bf16.mxu0 %v3490_v21 }
 0x2bc   :  { %2239 = vmatpush1.bf16.msra.mxu0 %v3488_v23  ;;  %v3535_v23 = vld [vmem:[#allocation11 + $0x80] sm:$0xff]  }
 0x2bd   :  { %2240 = vmatprep.subr.bf16.mxu0 %v3495_v24  ;;  %v3536_v24 = vld [vmem:[#allocation11 + $0x40] sm:$0xff]  }
 0x2c0   :  { %2241 = vmatpush1.bf16.msra.mxu0 %v3493_v26  ;;  %v3539_v26 = vld [vmem:[#allocation11 + $0x48] sm:$0xff]  }
 0x2c1   :  { %2242 = vmatprep.subr.bf16.mxu0 %v3500_v28  ;;  %v3540_v28 = vld [vmem:[#allocation11 + $0x8] sm:$0xff]  }
 0x2c4   :  { %2243 = vmatpush1.bf16.msra.mxu0 %v3498_v30  ;;  %v3541_v30 = vld [vmem:[#allocation11 + $0x90] sm:$0xff]  }
 0x2c5   :  { %2253 = vmatprep.subr.bf16.mxu0 %v3505_v32  ;;  %v3545_v32 = vld [vmem:[#allocation11 + $0x58] sm:$0xff]  }
 0x33a   :  { %v3006_v33 = vpop.f32.mrb[8].mxu0 }
 0x33b   :  { %v3007_v34 = vpop.f32.mrb[9].mxu0 }
 0x33c   :  { %v3008_v35 = vadd.f32 %v3007_v34, %v3006_v33  ;;  %v3009_v36 = vpop.f32.mrb[10].mxu0  ;;  %v3544_v33 = vld [vmem:[#allocation11 + $0x98] sm:$0xff]  }
 0x33d   :  { %v3010_v37 = vpop.f32.mrb[11].mxu0  ;;  %v3546_v34 = vld [vmem:[#allocation11 + $0x18] sm:$0xff]   ;;  %v3547_v36 = vld [vmem:[#allocation11 + $0xa0] sm:$0xff]  }
 0x33e   :  { %v1664_v42 = vadd.f32 %v3008_v35, %v1159_v39  ;;  %v3548_v35 = vld [vmem:[#allocation11 + $0x60] sm:$0xff]   ;;  %v3550_v39 = vld [vmem:[#allocation11 + $0xa8] sm:$0xff]  }
 0x33f   :  { %v3549_v37 = vld [vmem:[#allocation11 + $0x20] sm:$0xff]  }
 0x35a   :  { %v1622_v43 = vpop.f32.mrb[12].mxu1  ;;  %v1703_v44 = vpop.f32.mrb[12].mxu0 }
 0x35b   :  { %v3185_v45 = vadd.f32 %v1622_v43, %v1151_v40  ;;  %v3951_v46 = vadd.f32 %v1703_v44, %v1664_v42  ;;  %v1624_v48 = vpop.f32.mrb[13].mxu1  ;;  %v3141_v49 = vpop.f32.mrb[13].mxu0  ;;  %v3552_v40 = vld [vmem:[#allocation11 + $0x28] sm:$0xff]   ;;  %v3554_v42 = vld [vmem:[#allocation11 + $0x70] sm:$0xff]   ;;  %v3556_v44 = vld [vmem:[#allocation11 + $0xb8] sm:$0xff]  }
 0x35c   :  { %v3186_v50 = vadd.f32 %v1624_v48, %v1155_v41  ;;  %v1626_v51 = vpop.f32.mrb[14].mxu1  ;;  %v1706_v52 = vpop.f32.mrb[14].mxu0  ;;  %v3553_v41 = vld [vmem:[#allocation11 + $0xb0] sm:$0xff]  }
 0x35d   :  { %v1709_v53 = vmax.f32 %v3185_v45, 0.0  ;;  %v1627_v54 = vpop.f32.mrb[15].mxu1  ;;  %v3142_v55 = vpop.f32.mrb[15].mxu0  ;;  %v1711_v21 = vmax.f32 %v3951_v46, 0.0  ;;  %v3555_v43 = vld [vmem:[#allocation11 + $0x30] sm:$0xff]   ;;  %v3557_v45 = vld [vmem:[#allocation11 + $0x78] sm:$0xff]  }
 0x35e   :  { %v1710_v56 = vmax.f32 %v3186_v50, 0.0  ;;  %v3558_v46 = vld [vmem:[#allocation11 + $0x38] sm:$0xff]  }
 0x35f   :  { %v1712_v60 = vpack.c.bf16 %v1709_v53, %v1709_v53  ;;  %v1714_v22 = vpack.c.bf16 %v1711_v21, %v1711_v21  ;;  %v1811_v53 = vld [vmem:[%s4003_s8] sm:$0x7] }
 0x360   :  { %v1713_v57 = vpack.c.bf16 %v1710_v56, %v1710_v56  ;;  %v1824_v54 = vrot.slane %v1811_v53, %v3916_v47  ;;  %v1820_v55 = vrot.slane %v1811_v53, %v3904_v18 }
 0x362   :  { %2244 = vmatprep.mubr.bf16.mxu0 %v1713_v57  ;;  %2326 = vmatprep.mubr.bf16.mxu1 %v1713_v57 }
 0x363   :  { %2245 = vmatmul.mubr.bf16.vlgmr.msra.gmra.mrb[16].mxu0 %v1712_v60  ;;  %2327 = vmatmul.mubr.bf16.vlgmr.msra.gmra.mrb[16].mxu1 %v1712_v60 }
 0x364   :  { %2254 = vmatpush1.bf16.msra.mxu0 %v3503_v58  ;;  %3144 = vmatpush3.bf16.msra.mxu1 %v3506_v59 }
 0x365   :  { %2255 = vmatprep.subr.bf16.mxu0 %v3509_v61  ;;  %3145 = vmatprep.subr.bf16.mxu1 %v3737_v0 }
 0x366   :  { %2285 = vmatprep.mubr.bf16.mxu0 %v3738_v1  ;;  %3159 = vmatprep.mubr.msk.bf16.mxu1 %vm3739_vm0, %v3737_v0  ;;  %v3519_v1 = vld [vmem:[#allocation10 + $0x1e0] ss:$12 sps:$4 sm:$0xff]  }
 0x368   :  { %2256 = vmatpush1.bf16.msra.mxu0 %v3507_v62  ;;  %3146 = vmatpush3.bf16.msra.mxu1 %v3510_v63 }
 0x369   :  { %2257 = vmatprep.subr.bf16.mxu0 %v3513_v2  ;;  %3147 = vmatprep.subr.bf16.mxu1 %v3737_v0 }
 0x36c   :  { %2258 = vmatpush1.bf16.msra.mxu0 %v3511_v3  ;;  %3148 = vmatpush3.bf16.msra.mxu1 %v3514_v4 }
 0x36d   :  { %2259 = vmatprep.subr.bf16.mxu0 %v3517_v5  ;;  %3149 = vmatprep.subr.bf16.mxu1 %v3737_v0 }
 0x370   :  { %2260 = vmatpush1.bf16.msra.mxu0 %v3515_v6  ;;  %3150 = vmatpush3.bf16.msra.mxu1 %v3518_v7 }
 0x371   :  { %2261 = vmatprep.subr.bf16.mxu0 %v3521_v8  ;;  %3151 = vmatprep.subr.bf16.mxu1 %v3737_v0 }
 0x374   :  { %2262 = vmatpush1.bf16.msra.mxu0 %v3519_v1  ;;  %3152 = vmatpush3.bf16.msra.mxu1 %v3522_v9 }
 0x375   :  { %2263 = vmatprep.subr.bf16.mxu0 %v3525_v10  ;;  %3153 = vmatprep.subr.bf16.mxu1 %v3737_v0 }
 0x378   :  { %2264 = vmatpush1.bf16.msra.mxu0 %v3523_v11  ;;  %3154 = vmatpush3.bf16.msra.mxu1 %v3526_v12  ;;  %v2924_v12 = vld [vmem:[%s4005_s10] ss:$0 sm:$0xff] }
 0x379   :  { %2265 = vmatprep.subr.bf16.mxu0 %v3529_v13  ;;  %3155 = vmatprep.subr.bf16.mxu1 %v3737_v0 }
 0x37c   :  { %2266 = vmatpush1.bf16.msra.mxu0 %v3527_v14  ;;  %3156 = vmatpush3.bf16.msra.mxu1 %v3530_v15 }
 0x37d   :  { %2267 = vmatprep.subr.bf16.mxu0 %v3533_v17  ;;  %3157 = vmatprep.subr.bf16.mxu1 %v3737_v0 }
 0x380   :  { %2268 = vmatpush1.bf16.msra.mxu0 %v3531_v19  ;;  %3158 = vmatpush3.bf16.msra.mxu1 %v3534_v20 }
 0x381   :  { %3163 = vmatprep.subr.bf16.mxu0 %v3737_v0  ;;  %3052 = vmatprep.subr.bf16.mxu1 %v3536_v24 }
 0x383   :  { %2286 = vmatmul.mubr.bf16.vlgmr.msra.gmra.mrb[16].mxu0 %v1714_v22  ;;  %3160 = vmatmul.mubr.bf16.vlgmr.msra.gmra.mrb[20].mxu1 %v1714_v22 }
 0x384   :  { %3179 = vmatprep.mubr.msk.bf16.mxu0 %vm3739_vm0, %v3737_v0  ;;  %3164 = vmatpush3.bf16.msra.mxu0 %v3535_v23 }
 0x385   :  { %3053 = vmatpush3.bf16.msra.mxu1 %v3537_v25  ;;  %3165 = vmatprep.subr.bf16.mxu0 %v3737_v0 }
 0x386   :  { %3054 = vmatprep.subr.bf16.mxu1 %v3539_v26 }
 0x388   :  { %3166 = vmatpush3.bf16.msra.mxu0 %v3538_v27 }
 0x389   :  { %3055 = vmatpush3.bf16.msra.mxu1 %v3540_v28  ;;  %3167 = vmatprep.subr.bf16.mxu0 %v3737_v0 }
 0x38a   :  { %3056 = vmatprep.subr.bf16.mxu1 %v3542_v29 }
 0x38c   :  { %3168 = vmatpush3.bf16.msra.mxu0 %v3541_v30 }
 0x38d   :  { %3057 = vmatpush3.bf16.msra.mxu1 %v3543_v31  ;;  %3169 = vmatprep.subr.bf16.mxu0 %v3737_v0 }
 0x38e   :  { %3058 = vmatprep.subr.bf16.mxu1 %v3545_v32 }
 0x390   :  { %3170 = vmatpush3.bf16.msra.mxu0 %v3544_v33 }
 0x391   :  { %3059 = vmatpush3.bf16.msra.mxu1 %v3546_v34  ;;  %3171 = vmatprep.subr.bf16.mxu0 %v3737_v0 }
 0x392   :  { %3060 = vmatprep.subr.bf16.mxu1 %v3548_v35 }
 0x394   :  { %3172 = vmatpush3.bf16.msra.mxu0 %v3547_v36 }
 0x395   :  { %3061 = vmatpush3.bf16.msra.mxu1 %v3549_v37  ;;  %3173 = vmatprep.subr.bf16.mxu0 %v3737_v0 }
 0x396   :  { %3062 = vmatprep.subr.bf16.mxu1 %v3551_v38 }
 0x398   :  { %3174 = vmatpush3.bf16.msra.mxu0 %v3550_v39 }
 0x399   :  { %3063 = vmatpush3.bf16.msra.mxu1 %v3552_v40  ;;  %3175 = vmatprep.subr.bf16.mxu0 %v3737_v0 }
 0x39a   :  { %3064 = vmatprep.subr.bf16.mxu1 %v3554_v42 }
 0x39c   :  { %3176 = vmatpush3.bf16.msra.mxu0 %v3553_v41 }
 0x39d   :  { %3177 = vmatprep.subr.bf16.mxu0 %v3737_v0  ;;  %3065 = vmatpush3.bf16.msra.mxu1 %v3555_v43  ;;  %v1816_v0 = vrot.slane %v1811_v53, %v3897_v16 }
 0x39e   :  { %3066 = vmatprep.subr.bf16.mxu1 %v3557_v45 }
 0x3a0   :  { %3178 = vmatpush3.bf16.msra.mxu0 %v3556_v44 }
 0x3a1   :  { %3067 = vmatpush3.bf16.msra.mxu1 %v3558_v46 }
 0x436   :  { %v3037_v48 = vpop.f32.mrb[16].mxu1 }
 0x437   :  { %v3038_v49 = vpop.f32.mrb[17].mxu1 }
 0x438   :  { %v3039_v50 = vadd.f32 %v3038_v49, %v3037_v48  ;;  %v3040_v51 = vpop.f32.mrb[18].mxu1 }
 0x439   :  { %v3041_v52 = vpop.f32.mrb[19].mxu1 }
 0x43a   :  { %v2329_v56 = vadd.f32 %v3039_v50, %v1824_v54 }
 0x456   :  { %v2287_v57 = vpop.f32.mrb[16].mxu0  ;;  %v2368_v58 = vpop.f32.mrb[20].mxu1 }
 0x457   :  { %v3187_v59 = vadd.f32 %v2287_v57, %v1816_v0  ;;  %v2369_v60 = vadd.f32 %v2368_v58, %v2329_v56  ;;  %v2289_v61 = vpop.f32.mrb[17].mxu0  ;;  %v3161_v62 = vpop.f32.mrb[21].mxu1 }
 0x458   :  { %v3188_v63 = vadd.f32 %v2289_v61, %v1820_v55  ;;  %v2291_v2 = vpop.f32.mrb[18].mxu0  ;;  %v2371_v3 = vpop.f32.mrb[22].mxu1 }
 0x459   :  { %v2374_v4 = vmax.f32 %v3187_v59, 0.0  ;;  %v2376_v5 = vmax.f32 %v2369_v60, 0.0  ;;  %v2292_v6 = vpop.f32.mrb[19].mxu0  ;;  %v3162_v7 = vpop.f32.mrb[23].mxu1 }
 0x45a   :  { %v2375_v8 = vmax.f32 %v3188_v63, 0.0 }
 0x45b   :  { %v2379_v47 = vpack.c.bf16 %v2376_v5, %v2376_v5  ;;  %v2377_v16 = vpack.c.bf16 %v2374_v4, %v2374_v4 }
 0x45c   :  { %v2378_v1 = vpack.c.bf16 %v2375_v8, %v2375_v8 }
 0x45d   :  { %3180 = vmatmul.mubr.bf16.vlgmr.msra.gmra.mrb[20].mxu0 %v2379_v47 }
 0x45e   :  { %2611 = vmatprep.mubr.bf16.mxu1 %v2378_v1 }
 0x45f   :  { %2612 = vmatmul.mubr.bf16.vlgmr.msra.gmra.mrb[24].mxu1 %v2377_v16 }
 0x530   :  { %v2653_v18 = vpop.f32.mrb[20].mxu0 }
 0x531   :  { %v3181_v9 = vpop.f32.mrb[21].mxu0 }
 0x532   :  { %v3068_v10 = vpop.f32.mrb[24].mxu1  ;;  %v2656_v11 = vpop.f32.mrb[22].mxu0 }
 0x533   :  { %v3069_v13 = vpop.f32.mrb[25].mxu1  ;;  %v3182_v14 = vpop.f32.mrb[23].mxu0 }
 0x534   :  { %v3070_v15 = vadd.f32 %v3069_v13, %v3068_v10  ;;  %v3071_v17 = vpop.f32.mrb[26].mxu1 }
 0x535   :  { %v3072_v19 = vpop.f32.mrb[27].mxu1 }
 0x536   :  { %v2614_v20 = vadd.f32 %v3070_v15, %v2924_v12 }
 0x538   :  { %v2654_v21 = vadd.f32 %v2653_v18, %v2614_v20 }
 0x53a   :  { %v2949_v22 = vmul.f32 -1.442695, %v2654_v21 }
 0x53c   :  { %3559 = vpow2.f32 %v2949_v22 }
 0x546   :  { %v3560_v23 = vpop.eup %3559 }
 0x547   :  { %v2662_v24 = vadd.f32 1.0, %v3560_v23 }
 0x549   :  { %3561 = vrcp.f32 %v2662_v24 }
 0x553   :  { %v3562_v25 = vpop.eup %3561 }
 0x554   :  { %2665 = vst [vmem:[#allocation13] sm:$0xff] %v3562_v25 }
 0x555   :  { %3706 = shalt.err (!%p3703_p10)
}
 0x556   :  { %s3707_s20 = scalar_lea.hbm %s4006_s11, 128 }
 0x557   :  { %p3708_p11 = scmp.ne.s32.totalorder %s4006_s11, %s3707_s20  ;;  %p3711_p12 = scmp.lt.u32.totalorder %s3707_s20, %s4006_s11 }
 0x559   :  { %p3713_p13 = pnand %p3711_p12, %p3708_p11 }
 0x55b   :  { %3716 = shalt.err (!%p3713_p13)
}
 0x55c   :  { %2675 = dma.vmem_to_hbm [thread:$0]  %s2673_s19, 128, %s4006_s11, [#allocation4]  }
 0x55d   :  { %3725 = dma.done.wait [#allocation4], 128  }
 0x55e   :  { %3726 = vsyncadd [#allocation4], 4294967168 }
 0x55f   :  { %2679 = vsyncpa [#allocation3], 1 }
 0x560   :  { %2680 = vsyncpa [#allocation6], 1 }
 0x561   :  { %2681 = vsyncpa [#allocation9], 1 }
 0x562   :  { %2682 = vsyncpa [#allocation12], 1 }
 0x563   :  { %2683 = vsyncpa [#allocation4], 1 }

// kernel: tpu_custom_call.1
= control target key start
LH: loop header
LB: loop body
LE: loop exit
PB: predicated region body
PF: predicated region fallthrough
CT: control target
= control target key end

     0   :  { %16 = vsyncpa [#allocation3], 0  ;;  %s3995_s0 = inlined_call_operand.hbm [shape: bf16[8,128], index: 0, kind: input, shape index: {}]   ;;  %s3996_s1 = inlined_call_operand.hbm [shape: bf16[128,384], index: 1, kind: input, shape index: {}]   ;;  %s3997_s2 = inlined_call_operand.vmem [shape: f32[1,384], index: 2, kind: input, shape index: {}]   ;;  %s3998_s3 = inlined_call_operand.hbm [shape: bf16[384,384], index: 3, kind: input, shape index: {}]   ;;  %s3999_s4 = inlined_call_operand.vmem [shape: f32[1,384], index: 4, kind: input, shape index: {}]   ;;  %s4000_s5 = inlined_call_operand.hbm [shape: bf16[384,384], index: 5, kind: input, shape index: {}]   ;;  %s4001_s6 = inlined_call_operand.vmem [shape: f32[1,384], index: 6, kind: input, shape index: {}]   ;;  %s4002_s7 = inlined_call_operand.hbm [shape: bf16[384,384], index: 7, kind: input, shape index: {}]   ;;  %s4003_s8 = inlined_call_operand.vmem [shape: f32[1,384], index: 8, kind: input, shape index: {}]   ;;  %s4004_s9 = inlined_call_operand.hbm [shape: bf16[384,128], index: 9, kind: input, shape index: {}]   ;;  %s4005_s10 = inlined_call_operand.vmem [shape: f32[1,128], index: 10, kind: input, shape index: {}]   ;;  %s4006_s11 = inlined_call_operand.hbm [shape: f32[8,128], index: 11, kind: output, shape index: {}]  }
   0x1   :  { %17 = vsyncpa [#allocation6], 0 }
   0x2   :  { %18 = vsyncpa [#allocation9], 0 }
   0x3   :  { %19 = vsyncpa [#allocation12], 0 }
   0x4   :  { %20 = vsyncpa [#allocation4], 0  ;;  %s3727_s17 = smov [#allocation5]   ;;  %s3563_s21 = scalar_lea.hbm %s3996_s1, 3072 }
   0x5   :  { %s36_s18 = sshll.u32 %s3727_s17, 4  ;;  %p3564_p0 = scmp.ne.s32.totalorder %s3996_s1, %s3563_s21  ;;  %s37_s18 = int_to_ptr.vmem [resolvable:$true] %s36_s18 }
   0x6   :  { %p3567_p1 = scmp.lt.u32.totalorder %s3563_s21, %s3996_s1 }
   0x8   :  { %p3569_p2 = pnand %p3567_p1, %p3564_p0 }
   0xa   :  { %3572 = shalt.err (!%p3569_p2)
}
   0xb   :  { %s3573_s26 = scalar_lea.vmem %s37_s18, 3072  ;;  %p3578_p4 = scmp.lt.s32.totalorder %s37_s18, %s37_s18 }
   0xc   :  { %p3574_p3 = scmp.ne.s32.totalorder %s37_s18, %s3573_s26  ;;  %p3579_p5 = scmp.lt.s32.totalorder %s3573_s26, %s3573_s26 }
   0xe   :  { %p3580_p6 = por %p3579_p5, %p3578_p4 }
  0x10   :  { %p3581_p7 = pnand %p3580_p6, %p3574_p3 }
  0x12   :  { %3584 = shalt.err (!%p3581_p7)
}
  0x13   :  { %s3728_s27 = smov 192   ;;  %s3729_s28 = smov 12  }
  0x14   :  { %42 = dma.hbm_to_vmem [thread:$0]  %s3996_s1, 3072, %s37_s18, [#allocation6], %s3728_s27, %s3728_s27, %s3729_s28  }
  0x15   :  { %s3730_s12 = smov [#allocation8]   ;;  %s3731_s14 = smov [#allocation2]  }
  0x16   :  { %s64_s13 = sshll.u32 %s3730_s12, 4  ;;  %s27_s15 = sshll.u32 %s3731_s14, 4  ;;  %s65_s13 = int_to_ptr.vmem [resolvable:$true] %s64_s13  ;;  %s28_s15 = int_to_ptr.vmem [resolvable:$true] %s27_s15 }
  0x17   :  { %s3585_s19 = scalar_lea.hbm %s4000_s5, 9216 }
  0x18   :  { %p3586_p8 = scmp.ne.s32.totalorder %s4000_s5, %s3585_s19  ;;  %p3589_p9 = scmp.lt.u32.totalorder %s3585_s19, %s4000_s5 }
  0x1a   :  { %p3591_p10 = pnand %p3589_p9, %p3586_p8 }
  0x1c   :  { %3594 = shalt.err (!%p3591_p10)
}
  0x1d   :  { %s3595_s1 = scalar_lea.vmem %s65_s13, 9216  ;;  %p3600_p12 = scmp.lt.s32.totalorder %s65_s13, %s65_s13 }
  0x1e   :  { %p3596_p11 = scmp.ne.s32.totalorder %s65_s13, %s3595_s1  ;;  %p3601_p13 = scmp.lt.s32.totalorder %s3595_s1, %s3595_s1 }
  0x20   :  { %p3602_p0 = por %p3601_p13, %p3600_p12 }
  0x22   :  { %p3603_p1 = pnand %p3602_p0, %p3596_p11 }
  0x24   :  { %3606 = shalt.err (!%p3603_p1)
}
  0x25   :  { %70 = dma.hbm_to_vmem [thread:$0]  %s4000_s5, 9216, %s65_s13, [#allocation9], %s3728_s27, %s3728_s27, %s3729_s28  }
  0x26   :  { %s3607_s29 = scalar_lea.hbm %s3995_s0, 64 }
  0x27   :  { %p3608_p2 = scmp.ne.s32.totalorder %s3995_s0, %s3607_s29  ;;  %p3611_p3 = scmp.lt.u32.totalorder %s3607_s29, %s3995_s0 }
  0x29   :  { %p3613_p4 = pnand %p3611_p3, %p3608_p2 }
  0x2b   :  { %3616 = shalt.err (!%p3613_p4)
}
  0x2c   :  { %s3617_s17 = scalar_lea.vmem %s28_s15, 64  ;;  %p3622_p6 = scmp.lt.s32.totalorder %s28_s15, %s28_s15 }
  0x2d   :  { %p3618_p5 = scmp.ne.s32.totalorder %s28_s15, %s3617_s17  ;;  %p3623_p7 = scmp.lt.s32.totalorder %s3617_s17, %s3617_s17 }
  0x2f   :  { %p3624_p8 = por %p3623_p7, %p3622_p6 }
  0x31   :  { %p3625_p9 = pnand %p3624_p8, %p3618_p5 }
  0x33   :  { %3628 = shalt.err (!%p3625_p9)
}
  0x34   :  { %30 = dma.hbm_to_vmem [thread:$0]  %s3995_s0, 64, %s28_s15, [#allocation3]  }
  0x35   :  { %s3732_s19 = smov [#allocation7]   ;;  %s3733_s21 = smov [#allocation10]  }
  0x36   :  { %s50_s20 = sshll.u32 %s3732_s19, 4  ;;  %s78_s22 = sshll.u32 %s3733_s21, 4  ;;  %s51_s20 = int_to_ptr.vmem [resolvable:$true] %s50_s20  ;;  %s79_s22 = int_to_ptr.vmem [resolvable:$true] %s78_s22 }
  0x37   :  { %s3629_s18 = scalar_lea.hbm %s3998_s3, 9216 }
  0x38   :  { %p3630_p10 = scmp.ne.s32.totalorder %s3998_s3, %s3629_s18  ;;  %p3633_p11 = scmp.lt.u32.totalorder %s3629_s18, %s3998_s3 }
  0x3a   :  { %p3635_p12 = pnand %p3633_p11, %p3630_p10 }
  0x3c   :  { %3638 = shalt.err (!%p3635_p12)
}
  0x3d   :  { %s3639_s0 = scalar_lea.vmem %s51_s20, 9216  ;;  %p3644_p0 = scmp.lt.s32.totalorder %s51_s20, %s51_s20 }
  0x3e   :  { %p3640_p13 = scmp.ne.s32.totalorder %s51_s20, %s3639_s0  ;;  %p3645_p1 = scmp.lt.s32.totalorder %s3639_s0, %s3639_s0 }
  0x40   :  { %p3646_p2 = por %p3645_p1, %p3644_p0 }
  0x42   :  { %p3647_p3 = pnand %p3646_p2, %p3640_p13 }
  0x44   :  { %3650 = shalt.err (!%p3647_p3)
}
  0x45   :  { %56 = dma.hbm_to_vmem [thread:$0]  %s3998_s3, 9216, %s51_s20, [#allocation6], %s3728_s27, %s3728_s27, %s3729_s28  }
  0x46   :  { %s3651_s16 = scalar_lea.hbm %s4002_s7, 9216 }
  0x47   :  { %p3652_p4 = scmp.ne.s32.totalorder %s4002_s7, %s3651_s16  ;;  %p3655_p5 = scmp.lt.u32.totalorder %s3651_s16, %s4002_s7 }
  0x49   :  { %p3657_p6 = pnand %p3655_p5, %p3652_p4 }
  0x4b   :  { %3660 = shalt.err (!%p3657_p6)
}
  0x4c   :  { %s3661_s21 = scalar_lea.vmem %s79_s22, 9216  ;;  %p3666_p8 = scmp.lt.s32.totalorder %s79_s22, %s79_s22 }
  0x4d   :  { %p3662_p7 = scmp.ne.s32.totalorder %s79_s22, %s3661_s21  ;;  %p3667_p9 = scmp.lt.s32.totalorder %s3661_s21, %s3661_s21 }
  0x4f   :  { %p3668_p10 = por %p3667_p9, %p3666_p8 }
  0x51   :  { %p3669_p11 = pnand %p3668_p10, %p3662_p7 }
  0x53   :  { %3672 = shalt.err (!%p3669_p11)
}
  0x54   :  { %84 = dma.hbm_to_vmem [thread:$0]  %s4002_s7, 9216, %s79_s22, [#allocation9], %s3728_s27, %s3728_s27, %s3729_s28  }
  0x55   :  { %s3734_s23 = smov [#allocation11]   ;;  %s3673_s25 = scalar_lea.hbm %s4004_s9, 3072 }
  0x56   :  { %s92_s1 = sshll.u32 %s3734_s23, 4  ;;  %p3674_p12 = scmp.ne.s32.totalorder %s4004_s9, %s3673_s25  ;;  %s93_s1 = int_to_ptr.vmem [resolvable:$true] %s92_s1 }
  0x57   :  { %p3677_p13 = scmp.lt.u32.totalorder %s3673_s25, %s4004_s9 }
  0x59   :  { %p3679_p0 = pnand %p3677_p13, %p3674_p12 }
  0x5b   :  { %3682 = shalt.err (!%p3679_p0)
}
  0x5c   :  { %s3683_s30 = scalar_lea.vmem %s93_s1, 3072  ;;  %p3688_p2 = scmp.lt.s32.totalorder %s93_s1, %s93_s1 }
  0x5d   :  { %p3684_p1 = scmp.ne.s32.totalorder %s93_s1, %s3683_s30  ;;  %p3689_p3 = scmp.lt.s32.totalorder %s3683_s30, %s3683_s30 }
  0x5f   :  { %p3690_p4 = por %p3689_p3, %p3688_p2 }
  0x61   :  { %p3691_p5 = pnand %p3690_p4, %p3684_p1 }
  0x63   :  { %3694 = shalt.err (!%p3691_p5)
}
  0x64   :  { %s3735_s7 = smov 64   ;;  %s3736_s27 = smov 4  }
  0x65   :  { %98 = dma.hbm_to_vmem [thread:$0]  %s4004_s9, 3072, %s93_s1, [#allocation12], %s3735_s7, %s3735_s7, %s3736_s27  }
  0x66   :  { %3717 = dma.done.wait [#allocation3], 64  }
  0x67   :  { %3718 = vsyncadd [#allocation3], 4294967232 }
  0x68   :  { %3719 = dma.done.wait [#allocation6], 12288  }
  0x69   :  { %3720 = vsyncadd [#allocation6], 4294955008 }
  0x6a   :  { %3721 = dma.done.wait [#allocation9], 18432  }
  0x6b   :  { %3722 = vsyncadd [#allocation9], 4294948864 }
  0x6c   :  { %3723 = dma.done.wait [#allocation12], 3072  }
  0x6d   :  { %3724 = vsyncadd [#allocation12], 4294964224  ;;  %v3737_v0 = vmov 0.0   ;;  %v3738_v1 = vmov 0   ;;  %vm3739_vm0 = vmmov 0   ;;  %s3740_s13 = smov [#allocation13]  }
  0x6e   :  { %3083 = vmatprep.subr.bf16.mxu1 %v3737_v0  ;;  %330 = vmatprep.mubr.bf16.mxu0 %v3738_v1  ;;  %v3215_v2 = vld [vmem:[#allocation5 + $0x4] ss:$12 sps:$4 sm:$0xff]   ;;  %v3217_v3 = vld [vmem:[#allocation5] ss:$12 sps:$4 sm:$0xff]   ;;  %v3218_v4 = vld [vmem:[#allocation5 + $0x1c] ss:$12 sps:$4 sm:$0xff]  }
  0x6f   :  { %3099 = vmatprep.mubr.msk.bf16.mxu1 %vm3739_vm0, %v3737_v0  ;;  %298 = vmatprep.subr.bf16.mxu0 %v3215_v2  ;;  %v3220_v5 = vld [vmem:[#allocation5 + $0x18] ss:$12 sps:$4 sm:$0xff]   ;;  %v3221_v6 = vld [vmem:[#allocation5 + $0x34] ss:$12 sps:$4 sm:$0xff]   ;;  %v3223_v7 = vld [vmem:[#allocation5 + $0x30] ss:$12 sps:$4 sm:$0xff]  }
  0x70   :  { %299 = vmatpush1.bf16.msra.mxu0 %v3217_v3  ;;  %v3224_v8 = vld [vmem:[#allocation5 + $0x4c] ss:$12 sps:$4 sm:$0xff]   ;;  %v3226_v9 = vld [vmem:[#allocation5 + $0x48] ss:$12 sps:$4 sm:$0xff]   ;;  %v3227_v11 = vld [vmem:[#allocation5 + $0x64] ss:$12 sps:$4 sm:$0xff]  }
  0x71   :  { %300 = vmatprep.subr.bf16.mxu0 %v3218_v4  ;;  %v3239_v10 = vld [vmem:[#allocation5 + $0x8] ss:$12 sps:$4 sm:$0xff]   ;;  %v3240_v12 = vld [vmem:[#allocation5 + $0x20] ss:$12 sps:$4 sm:$0xff]   ;;  %v3241_v15 = vld [vmem:[#allocation5 + $0x38] ss:$12 sps:$4 sm:$0xff]  }
  0x72   :  { %3084 = vmatpush3.bf16.msra.mxu1 %v3239_v10  ;;  %v3229_v13 = vld [vmem:[#allocation5 + $0x60] ss:$12 sps:$4 sm:$0xff]   ;;  %v3230_v14 = vld [vmem:[#allocation5 + $0x7c] ss:$12 sps:$4 sm:$0xff]   ;;  %v3232_v16 = vld [vmem:[#allocation5 + $0x78] ss:$12 sps:$4 sm:$0xff]  }
  0x73   :  { %3085 = vmatprep.subr.bf16.mxu1 %v3737_v0  ;;  %v3233_v17 = vld [vmem:[#allocation5 + $0x94] ss:$12 sps:$4 sm:$0xff]   ;;  %v3242_v18 = vld [vmem:[#allocation5 + $0x50] ss:$12 sps:$4 sm:$0xff]   ;;  %v3236_v20 = vld [vmem:[#allocation5 + $0xac] ss:$12 sps:$4 sm:$0xff]  }
  0x74   :  { %301 = vmatpush1.bf16.msra.mxu0 %v3220_v5  ;;  %v3235_v19 = vld [vmem:[#allocation5 + $0x90] ss:$12 sps:$4 sm:$0xff]   ;;  %v3243_v21 = vld [vmem:[#allocation5 + $0x68] ss:$12 sps:$4 sm:$0xff]   ;;  %v3244_v24 = vld [vmem:[#allocation5 + $0x80] ss:$12 sps:$4 sm:$0xff]  }
  0x75   :  { %302 = vmatprep.subr.bf16.mxu0 %v3221_v6  ;;  %v3238_v22 = vld [vmem:[#allocation5 + $0xa8] ss:$12 sps:$4 sm:$0xff]   ;;  %v3249_v23 = vld [vmem:[#allocation7 + $0x4] ss:$12 sps:$4 sm:$0xff]   ;;  %v120_v25 = vld [vmem:[#allocation2] sm:$0xf] }
  0x76   :  { %3086 = vmatpush3.bf16.msra.mxu1 %v3240_v12  ;;  %v3247_v26 = vld [vmem:[#allocation7] ss:$12 sps:$4 sm:$0xff]   ;;  %v3252_v27 = vld [vmem:[#allocation7 + $0x1c] ss:$12 sps:$4 sm:$0xff]   ;;  %v3245_v28 = vld [vmem:[#allocation5 + $0x98] ss:$12 sps:$4 sm:$0xff]  }
  0x77   :  { %3087 = vmatprep.subr.bf16.mxu1 %v3737_v0  ;;  %v3250_v29 = vld [vmem:[#allocation7 + $0x18] ss:$12 sps:$4 sm:$0xff]   ;;  %v3255_v30 = vld [vmem:[#allocation7 + $0x34] ss:$12 sps:$4 sm:$0xff]   ;;  %v3246_v31 = vld [vmem:[#allocation5 + $0xb0] ss:$12 sps:$4 sm:$0xff]  }
  0x78   :  { %303 = vmatpush1.bf16.msra.mxu0 %v3223_v7  ;;  %v3274_v32 = vld [vmem:[#allocation7 + $0xc8] ss:$12 sps:$4 sm:$0xff]   ;;  %v3253_v33 = vld [vmem:[#allocation7 + $0x30] ss:$12 sps:$4 sm:$0xff]   ;;  %v3258_v34 = vld [vmem:[#allocation7 + $0x4c] ss:$12 sps:$4 sm:$0xff]  }
  0x79   :  { %304 = vmatprep.subr.bf16.mxu0 %v3224_v8  ;;  %v3275_v35 = vld [vmem:[#allocation7 + $0x8] ss:$12 sps:$4 sm:$0xff]   ;;  %v3279_v36 = vld [vmem:[#allocation7 + $0xe0] ss:$12 sps:$4 sm:$0xff]   ;;  %v3261_v38 = vld [vmem:[#allocation7 + $0x64] ss:$12 sps:$4 sm:$0xff]  }
  0x7a   :  { %3088 = vmatpush3.bf16.msra.mxu1 %v3241_v15  ;;  %v3256_v37 = vld [vmem:[#allocation7 + $0x48] ss:$12 sps:$4 sm:$0xff]   ;;  %v3280_v39 = vld [vmem:[#allocation7 + $0x20] ss:$12 sps:$4 sm:$0xff]   ;;  %v3284_v40 = vld [vmem:[#allocation7 + $0xf8] ss:$12 sps:$4 sm:$0xff]  }
  0x7b   :  { %3089 = vmatprep.subr.bf16.mxu1 %v3737_v0  ;;  %v3259_v41 = vld [vmem:[#allocation7 + $0x60] ss:$12 sps:$4 sm:$0xff]   ;;  %v3264_v42 = vld [vmem:[#allocation7 + $0x7c] ss:$12 sps:$4 sm:$0xff]   ;;  %v3262_v43 = vld [vmem:[#allocation7 + $0x78] ss:$12 sps:$4 sm:$0xff]  }
  0x7c   :  { %305 = vmatpush1.bf16.msra.mxu0 %v3226_v9  ;;  %v3285_v44 = vld [vmem:[#allocation7 + $0x38] ss:$12 sps:$4 sm:$0xff]   ;;  %v3289_v45 = vld [vmem:[#allocation7 + $0x110] ss:$12 sps:$4 sm:$0xff]   ;;  %v3267_v46 = vld [vmem:[#allocation7 + $0x94] ss:$12 sps:$4 sm:$0xff]  }
  0x7d   :  { %306 = vmatprep.subr.bf16.mxu0 %v3227_v11  ;;  %v3290_v47 = vld [vmem:[#allocation7 + $0x50] ss:$12 sps:$4 sm:$0xff]   ;;  %v3294_v48 = vld [vmem:[#allocation7 + $0x128] ss:$12 sps:$4 sm:$0xff]   ;;  %v3270_v50 = vld [vmem:[#allocation7 + $0xac] ss:$12 sps:$4 sm:$0xff]  }
  0x7e   :  { %3090 = vmatpush3.bf16.msra.mxu1 %v3242_v18  ;;  %v3265_v49 = vld [vmem:[#allocation7 + $0x90] ss:$12 sps:$4 sm:$0xff]   ;;  %v3295_v51 = vld [vmem:[#allocation7 + $0x68] ss:$12 sps:$4 sm:$0xff]   ;;  %v3299_v52 = vld [vmem:[#allocation7 + $0x140] ss:$12 sps:$4 sm:$0xff]  }
  0x7f   :  { %3091 = vmatprep.subr.bf16.mxu1 %v3737_v0  ;;  %v3268_v53 = vld [vmem:[#allocation7 + $0xa8] ss:$12 sps:$4 sm:$0xff]   ;;  %v3273_v54 = vld [vmem:[#allocation7 + $0xc4] ss:$12 sps:$4 sm:$0xff]   ;;  %v3300_v55 = vld [vmem:[#allocation7 + $0x80] ss:$12 sps:$4 sm:$0xff]  }
  0x80   :  { %307 = vmatpush1.bf16.msra.mxu0 %v3229_v13  ;;  %v3271_v56 = vld [vmem:[#allocation7 + $0xc0] ss:$12 sps:$4 sm:$0xff]   ;;  %v3278_v57 = vld [vmem:[#allocation7 + $0xdc] ss:$12 sps:$4 sm:$0xff]   ;;  %v3276_v58 = vld [vmem:[#allocation7 + $0xd8] ss:$12 sps:$4 sm:$0xff]  }
  0x81   :  { %308 = vmatprep.subr.bf16.mxu0 %v3230_v14  ;;  %v3283_v59 = vld [vmem:[#allocation7 + $0xf4] ss:$12 sps:$4 sm:$0xff]   ;;  %v3281_v60 = vld [vmem:[#allocation7 + $0xf0] ss:$12 sps:$4 sm:$0xff]   ;;  %v3288_v61 = vld [vmem:[#allocation7 + $0x10c] ss:$12 sps:$4 sm:$0xff]   ;;  %v155_v14 = vlaneseq }
  0x82   :  { %3092 = vmatpush3.bf16.msra.mxu1 %v3243_v21  ;;  %v3286_v62 = vld [vmem:[#allocation7 + $0x108] ss:$12 sps:$4 sm:$0xff]   ;;  %v3293_v63 = vld [vmem:[#allocation7 + $0x124] ss:$12 sps:$4 sm:$0xff]   ;;  %v3291_v2 = vld [vmem:[#allocation7 + $0x120] ss:$12 sps:$4 sm:$0xff]  }
  0x83   :  { %3093 = vmatprep.subr.bf16.mxu1 %v3737_v0  ;;  %v3298_v3 = vld [vmem:[#allocation7 + $0x13c] ss:$12 sps:$4 sm:$0xff]   ;;  %v3296_v4 = vld [vmem:[#allocation7 + $0x138] ss:$12 sps:$4 sm:$0xff]   ;;  %v3303_v5 = vld [vmem:[#allocation7 + $0x154] ss:$12 sps:$4 sm:$0xff]  }
  0x84   :  { %309 = vmatpush1.bf16.msra.mxu0 %v3232_v16  ;;  %v3304_v6 = vld [vmem:[#allocation7 + $0x158] ss:$12 sps:$4 sm:$0xff]   ;;  %v3301_v7 = vld [vmem:[#allocation7 + $0x150] ss:$12 sps:$4 sm:$0xff]   ;;  %v3306_v11 = vld [vmem:[#allocation7 + $0x168] ss:$12 sps:$4 sm:$0xff]  }
  0x85   :  { %310 = vmatprep.subr.bf16.mxu0 %v3233_v17  ;;  %v3305_v8 = vld [vmem:[#allocation7 + $0x98] ss:$12 sps:$4 sm:$0xff]   ;;  %v3309_v10 = vld [vmem:[#allocation7 + $0x170] ss:$12 sps:$4 sm:$0xff]   ;;  %v156_v15 = vshrl.u32 %v155_v14, 7  ;;  %s2672_s19 = sshll.u32 %s3740_s13, 4  ;;  %s2673_s19 = int_to_ptr.vmem [resolvable:$true] %s2672_s19 }
  0x86   :  { %3094 = vmatpush3.bf16.msra.mxu1 %v3244_v24  ;;  %v3308_v9 = vld [vmem:[#allocation7 + $0x16c] ss:$12 sps:$4 sm:$0xff]   ;;  %v3310_v12 = vld [vmem:[#allocation7 + $0xb0] ss:$12 sps:$4 sm:$0xff]   ;;  %s3695_s21 = scalar_lea.vmem %s2673_s19, 128  ;;  %p3700_p7 = scmp.lt.s32.totalorder %s2673_s19, %s2673_s19 }
  0x87   :  { %3095 = vmatprep.subr.bf16.mxu1 %v3737_v0  ;;  %v3313_v13 = vld [vmem:[#allocation7 + $0x184] ss:$12 sps:$4 sm:$0xff]   ;;  %v3897_v16 = vsub.s32 0, %v156_v15  ;;  %v3902_v17 = vld [vmem:[%s3997_s2] sm:$0x7]  ;;  %v3904_v18 = vsub.s32 1, %v156_v15  ;;  %p3696_p6 = scmp.ne.s32.totalorder %s2673_s19, %s3695_s21  ;;  %p3701_p8 = scmp.lt.s32.totalorder %s3695_s21, %s3695_s21 }
  0x88   :  { %311 = vmatpush1.bf16.msra.mxu0 %v3235_v19  ;;  %v3361_v14 = vld [vmem:[#allocation8 + $0x90] ss:$12 sps:$4 sm:$0xff]  }
  0x89   :  { %312 = vmatprep.subr.bf16.mxu0 %v3236_v20  ;;  %v158_v19 = vrot.slane %v3902_v17, %v3897_v16  ;;  %v162_v20 = vrot.slane %v3902_v17, %v3904_v18  ;;  %p3702_p9 = por %p3701_p8, %p3700_p7 }
  0x8a   :  { %3096 = vmatpush3.bf16.msra.mxu1 %v3245_v28 }
  0x8b   :  { %3097 = vmatprep.subr.bf16.mxu1 %v3737_v0  ;;  %p3703_p10 = pnand %p3702_p9, %p3696_p6 }
  0x8c   :  { %313 = vmatpush1.bf16.msra.mxu0 %v3238_v22 }
  0x8d   :  { %882 = vmatprep.subr.bf16.mxu0 %v3249_v23 }
  0x8e   :  { %3098 = vmatpush3.bf16.msra.mxu1 %v3246_v31  ;;  %v3314_v31 = vld [vmem:[#allocation7 + $0x188] ss:$12 sps:$4 sm:$0xff]  }
  0x8f   :  { %331 = vmatmul.mubr.bf16.vlgmr.msra.gmra.mrb[0].mxu0 %v120_v25  ;;  %2959 = vmatprep.subr.bf16.mxu1 %v3274_v32 }
  0x90   :  { %883 = vmatpush1.bf16.msra.mxu0 %v3247_v26 }
  0x91   :  { %884 = vmatprep.subr.bf16.mxu0 %v3252_v27  ;;  %3100 = vmatmul.mubr.bf16.vlgmr.msra.gmra.mrb[0].mxu1 %v120_v25 }
  0x92   :  { %2960 = vmatpush3.bf16.msra.mxu1 %v3275_v35  ;;  %v3318_v35 = vld [vmem:[#allocation7 + $0x1a0] ss:$12 sps:$4 sm:$0xff]  }
  0x93   :  { %2961 = vmatprep.subr.bf16.mxu1 %v3279_v36 }
  0x94   :  { %885 = vmatpush1.bf16.msra.mxu0 %v3250_v29 }
  0x95   :  { %886 = vmatprep.subr.bf16.mxu0 %v3255_v30  ;;  %v3311_v30 = vld [vmem:[#allocation7 + $0x180] ss:$12 sps:$4 sm:$0xff]  }
  0x96   :  { %2962 = vmatpush3.bf16.msra.mxu1 %v3280_v39 }
  0x97   :  { %2963 = vmatprep.subr.bf16.mxu1 %v3284_v40 }
  0x98   :  { %887 = vmatpush1.bf16.msra.mxu0 %v3253_v33  ;;  %v3317_v33 = vld [vmem:[#allocation7 + $0x19c] ss:$12 sps:$4 sm:$0xff]  }
  0x99   :  { %888 = vmatprep.subr.bf16.mxu0 %v3258_v34  ;;  %v3315_v34 = vld [vmem:[#allocation7 + $0x198] ss:$12 sps:$4 sm:$0xff]  }
  0x9a   :  { %2964 = vmatpush3.bf16.msra.mxu1 %v3285_v44  ;;  %v3323_v44 = vld [vmem:[#allocation7 + $0x1c8] ss:$12 sps:$4 sm:$0xff]  }
  0x9b   :  { %2965 = vmatprep.subr.bf16.mxu1 %v3289_v45  ;;  %v3326_v45 = vld [vmem:[#allocation7 + $0x1d0] ss:$12 sps:$4 sm:$0xff]  }
  0x9c   :  { %889 = vmatpush1.bf16.msra.mxu0 %v3256_v37  ;;  %v3321_v37 = vld [vmem:[#allocation7 + $0x1b4] ss:$12 sps:$4 sm:$0xff]  }
  0x9d   :  { %890 = vmatprep.subr.bf16.mxu0 %v3261_v38 }
  0x9e   :  { %2966 = vmatpush3.bf16.msra.mxu1 %v3290_v47  ;;  %v3916_v47 = vsub.s32 2, %v156_v15  ;;  %v3366_v15 = vld [vmem:[#allocation8 + $0xac] ss:$12 sps:$4 sm:$0xff]  }
  0x9f   :  { %2967 = vmatprep.subr.bf16.mxu1 %v3294_v48  ;;  %v3327_v48 = vld [vmem:[#allocation7 + $0x1e0] ss:$12 sps:$4 sm:$0xff]  }
  0xa0   :  { %891 = vmatpush1.bf16.msra.mxu0 %v3259_v41  ;;  %v3319_v41 = vld [vmem:[#allocation7 + $0x1b0] ss:$12 sps:$4 sm:$0xff]  }
  0xa1   :  { %892 = vmatprep.subr.bf16.mxu0 %v3264_v42  ;;  %v3322_v42 = vld [vmem:[#allocation7 + $0x1b8] ss:$12 sps:$4 sm:$0xff]  }
  0xa2   :  { %2968 = vmatpush3.bf16.msra.mxu1 %v3295_v51  ;;  %v166_v51 = vrot.slane %v3902_v17, %v3916_v47  ;;  %v3364_v17 = vld [vmem:[#allocation8 + $0xa8] ss:$12 sps:$4 sm:$0xff]  }
  0xa3   :  { %2969 = vmatprep.subr.bf16.mxu1 %v3299_v52  ;;  %v3331_v52 = vld [vmem:[#allocation7 + $0x1f8] ss:$12 sps:$4 sm:$0xff]  }
  0xa4   :  { %893 = vmatpush1.bf16.msra.mxu0 %v3262_v43  ;;  %v3325_v43 = vld [vmem:[#allocation7 + $0x1cc] ss:$12 sps:$4 sm:$0xff]  }
  0xa5   :  { %894 = vmatprep.subr.bf16.mxu0 %v3267_v46  ;;  %v3329_v46 = vld [vmem:[#allocation7 + $0x1e4] ss:$12 sps:$4 sm:$0xff]  }
  0xa6   :  { %2970 = vmatpush3.bf16.msra.mxu1 %v3300_v55 }
  0xa7   :  { %2971 = vmatprep.subr.bf16.mxu1 %v3304_v6  ;;  %v3349_v6 = vld [vmem:[#allocation8 + $0x30] ss:$12 sps:$4 sm:$0xff]  }
  0xa8   :  { %895 = vmatpush1.bf16.msra.mxu0 %v3265_v49  ;;  %v3330_v49 = vld [vmem:[#allocation7 + $0x1e8] ss:$12 sps:$4 sm:$0xff]  }
  0xa9   :  { %896 = vmatprep.subr.bf16.mxu0 %v3270_v50  ;;  %v3333_v50 = vld [vmem:[#allocation7 + $0x1fc] ss:$12 sps:$4 sm:$0xff]  }
  0xaa   :  { %2972 = vmatpush3.bf16.msra.mxu1 %v3305_v8  ;;  %v3352_v8 = vld [vmem:[#allocation8 + $0x48] ss:$12 sps:$4 sm:$0xff]  }
  0xab   :  { %2973 = vmatprep.subr.bf16.mxu1 %v3309_v10  ;;  %v3355_v10 = vld [vmem:[#allocation8 + $0x60] ss:$12 sps:$4 sm:$0xff]  }
  0xac   :  { %897 = vmatpush1.bf16.msra.mxu0 %v3268_v53  ;;  %v3334_v53 = vld [vmem:[#allocation7 + $0x200] ss:$12 sps:$4 sm:$0xff]  }
  0xad   :  { %898 = vmatprep.subr.bf16.mxu0 %v3273_v54  ;;  %v3337_v54 = vld [vmem:[#allocation7 + $0x214] ss:$12 sps:$4 sm:$0xff]  }
  0xae   :  { %2974 = vmatpush3.bf16.msra.mxu1 %v3310_v12  ;;  %v3358_v12 = vld [vmem:[#allocation8 + $0x78] ss:$12 sps:$4 sm:$0xff]  }
  0xaf   :  { %3103 = vmatprep.subr.bf16.mxu1 %v3737_v0 }
  0xb0   :  { %899 = vmatpush1.bf16.msra.mxu0 %v3271_v56  ;;  %v3335_v56 = vld [vmem:[#allocation7 + $0x210] ss:$12 sps:$4 sm:$0xff]  }
  0xb1   :  { %900 = vmatprep.subr.bf16.mxu0 %v3278_v57  ;;  %v3338_v57 = vld [vmem:[#allocation7 + $0x218] ss:$12 sps:$4 sm:$0xff]  }
  0xb4   :  { %901 = vmatpush1.bf16.msra.mxu0 %v3276_v58  ;;  %v3341_v58 = vld [vmem:[#allocation7 + $0x22c] ss:$12 sps:$4 sm:$0xff]  }
  0xb5   :  { %902 = vmatprep.subr.bf16.mxu0 %v3283_v59 }
  0xb8   :  { %903 = vmatpush1.bf16.msra.mxu0 %v3281_v60  ;;  %v3339_v60 = vld [vmem:[#allocation7 + $0x228] ss:$12 sps:$4 sm:$0xff]  }
  0xb9   :  { %904 = vmatprep.subr.bf16.mxu0 %v3288_v61  ;;  %v3342_v61 = vld [vmem:[#allocation7 + $0x230] ss:$12 sps:$4 sm:$0xff]  }
  0xbc   :  { %905 = vmatpush1.bf16.msra.mxu0 %v3286_v62  ;;  %v3345_v62 = vld [vmem:[#allocation8 + $0x4] ss:$12 sps:$4 sm:$0xff]  }
  0xbd   :  { %906 = vmatprep.subr.bf16.mxu0 %v3293_v63 }
  0xc0   :  { %907 = vmatpush1.bf16.msra.mxu0 %v3291_v2  ;;  %v3343_v2 = vld [vmem:[#allocation8] ss:$12 sps:$4 sm:$0xff]  }
  0xc1   :  { %908 = vmatprep.subr.bf16.mxu0 %v3298_v3  ;;  %v3348_v3 = vld [vmem:[#allocation8 + $0x1c] ss:$12 sps:$4 sm:$0xff]  }
  0xc4   :  { %909 = vmatpush1.bf16.msra.mxu0 %v3296_v4  ;;  %v3346_v4 = vld [vmem:[#allocation8 + $0x18] ss:$12 sps:$4 sm:$0xff]  }
  0xc5   :  { %910 = vmatprep.subr.bf16.mxu0 %v3303_v5  ;;  %v3351_v5 = vld [vmem:[#allocation8 + $0x34] ss:$12 sps:$4 sm:$0xff]  }
  0xc8   :  { %911 = vmatpush1.bf16.msra.mxu0 %v3301_v7  ;;  %v3354_v7 = vld [vmem:[#allocation8 + $0x4c] ss:$12 sps:$4 sm:$0xff]  }
  0xc9   :  { %912 = vmatprep.subr.bf16.mxu0 %v3308_v9  ;;  %v3357_v9 = vld [vmem:[#allocation8 + $0x64] ss:$12 sps:$4 sm:$0xff]  }
  0xcc   :  { %913 = vmatpush1.bf16.msra.mxu0 %v3306_v11  ;;  %v3360_v11 = vld [vmem:[#allocation8 + $0x7c] ss:$12 sps:$4 sm:$0xff]  }
  0xcd   :  { %923 = vmatprep.subr.bf16.mxu0 %v3313_v13  ;;  %v3363_v13 = vld [vmem:[#allocation8 + $0x94] ss:$12 sps:$4 sm:$0xff]  }
 0x162   :  { %v332_v21 = vpop.f32.mrb[0].mxu0 }
 0x163   :  { %v333_v22 = vadd.f32 %v332_v21, %v158_v19  ;;  %v334_v23 = vpop.f32.mrb[1].mxu0  ;;  %v3369_v19 = vld [vmem:[#allocation8 + $0xc4] ss:$12 sps:$4 sm:$0xff]   ;;  %v3371_v21 = vld [vmem:[#allocation8 + $0x8] ss:$12 sps:$4 sm:$0xff]  }
 0x164   :  { %v335_v24 = vadd.f32 %v334_v23, %v162_v20  ;;  %v336_v25 = vpop.f32.mrb[2].mxu0  ;;  %v373_v36 = vpop.f32.mrb[0].mxu1  ;;  %v3370_v20 = vld [vmem:[#allocation8 + $0xc8] ss:$12 sps:$4 sm:$0xff]   ;;  %v3375_v23 = vld [vmem:[#allocation8 + $0xe0] ss:$12 sps:$4 sm:$0xff]  }
 0x165   :  { %v379_v26 = vmax.f32 %v333_v22, 0.0  ;;  %v337_v27 = vpop.f32.mrb[3].mxu0  ;;  %v3101_v38 = vpop.f32.mrb[1].mxu1  ;;  %v374_v55 = vadd.f32 %v373_v36, %v166_v51  ;;  %v3367_v22 = vld [vmem:[#allocation8 + $0xc0] ss:$12 sps:$4 sm:$0xff]  }
 0x166   :  { %v380_v28 = vmax.f32 %v335_v24, 0.0  ;;  %v376_v39 = vpop.f32.mrb[2].mxu1  ;;  %v3374_v24 = vld [vmem:[#allocation8 + $0xdc] ss:$12 sps:$4 sm:$0xff]   ;;  %v3376_v25 = vld [vmem:[#allocation8 + $0x20] ss:$12 sps:$4 sm:$0xff]  }
 0x167   :  { %v382_v32 = vpack.c.bf16 %v379_v26, %v379_v26  ;;  %v3102_v40 = vpop.f32.mrb[3].mxu1  ;;  %v381_v59 = vmax.f32 %v374_v55, 0.0  ;;  %v3380_v26 = vld [vmem:[#allocation8 + $0xf8] ss:$12 sps:$4 sm:$0xff]   ;;  %v3395_v38 = vld [vmem:[#allocation8 + $0x140] ss:$12 sps:$4 sm:$0xff]  }
 0x168   :  { %v383_v29 = vpack.c.bf16 %v380_v28, %v380_v28  ;;  %v3372_v27 = vld [vmem:[#allocation8 + $0xd8] ss:$12 sps:$4 sm:$0xff]   ;;  %v3379_v28 = vld [vmem:[#allocation8 + $0xf4] ss:$12 sps:$4 sm:$0xff]   ;;  %v3394_v40 = vld [vmem:[#allocation8 + $0x13c] ss:$12 sps:$4 sm:$0xff]  }
 0x169   :  { %v384_v63 = vpack.c.bf16 %v381_v59, %v381_v59  ;;  %v3389_v36 = vld [vmem:[#allocation8 + $0x124] ss:$12 sps:$4 sm:$0xff]   ;;  %v3387_v39 = vld [vmem:[#allocation8 + $0x120] ss:$12 sps:$4 sm:$0xff]  }
 0x16a   :  { %914 = vmatprep.mubr.bf16.mxu0 %v383_v29  ;;  %996 = vmatprep.mubr.bf16.mxu1 %v383_v29  ;;  %v3381_v29 = vld [vmem:[#allocation8 + $0x38] ss:$12 sps:$4 sm:$0xff]   ;;  %v3406_v51 = vld [vmem:[#allocation8 + $0xb0] ss:$12 sps:$4 sm:$0xff]  }
 0x16b   :  { %915 = vmatmul.mubr.bf16.vlgmr.msra.gmra.mrb[4].mxu0 %v382_v32  ;;  %997 = vmatmul.mubr.bf16.vlgmr.msra.gmra.mrb[4].mxu1 %v382_v32  ;;  %v3384_v32 = vld [vmem:[#allocation8 + $0x10c] ss:$12 sps:$4 sm:$0xff]  }
 0x16c   :  { %924 = vmatpush1.bf16.msra.mxu0 %v3311_v30  ;;  %3104 = vmatpush3.bf16.msra.mxu1 %v3314_v31  ;;  %v3385_v30 = vld [vmem:[#allocation8 + $0x110] ss:$12 sps:$4 sm:$0xff]  }
 0x16d   :  { %925 = vmatprep.subr.bf16.mxu0 %v3317_v33  ;;  %3105 = vmatprep.subr.bf16.mxu1 %v3737_v0  ;;  %v3377_v31 = vld [vmem:[#allocation8 + $0xf0] ss:$12 sps:$4 sm:$0xff]  }
 0x16e   :  { %955 = vmatprep.mubr.bf16.mxu0 %v3738_v1  ;;  %3119 = vmatprep.mubr.msk.bf16.mxu1 %vm3739_vm0, %v3737_v0  ;;  %v3386_v33 = vld [vmem:[#allocation8 + $0x50] ss:$12 sps:$4 sm:$0xff]  }
 0x170   :  { %926 = vmatpush1.bf16.msra.mxu0 %v3315_v34  ;;  %3106 = vmatpush3.bf16.msra.mxu1 %v3318_v35  ;;  %v3390_v34 = vld [vmem:[#allocation8 + $0x128] ss:$12 sps:$4 sm:$0xff]  }
 0x171   :  { %927 = vmatprep.subr.bf16.mxu0 %v3321_v37  ;;  %3107 = vmatprep.subr.bf16.mxu1 %v3737_v0  ;;  %v3382_v35 = vld [vmem:[#allocation8 + $0x108] ss:$12 sps:$4 sm:$0xff]  }
 0x172   :  { %v3391_v37 = vld [vmem:[#allocation8 + $0x68] ss:$12 sps:$4 sm:$0xff]  }
 0x174   :  { %928 = vmatpush1.bf16.msra.mxu0 %v3319_v41  ;;  %3108 = vmatpush3.bf16.msra.mxu1 %v3322_v42  ;;  %v3396_v41 = vld [vmem:[#allocation8 + $0x80] ss:$12 sps:$4 sm:$0xff]   ;;  %v3392_v42 = vld [vmem:[#allocation8 + $0x138] ss:$12 sps:$4 sm:$0xff]  }
 0x175   :  { %929 = vmatprep.subr.bf16.mxu0 %v3325_v43  ;;  %3109 = vmatprep.subr.bf16.mxu1 %v3737_v0  ;;  %v3399_v43 = vld [vmem:[#allocation8 + $0x154] ss:$12 sps:$4 sm:$0xff]  }
 0x178   :  { %930 = vmatpush1.bf16.msra.mxu0 %v3323_v44  ;;  %3110 = vmatpush3.bf16.msra.mxu1 %v3326_v45  ;;  %v3400_v44 = vld [vmem:[#allocation8 + $0x158] ss:$12 sps:$4 sm:$0xff]   ;;  %v3397_v45 = vld [vmem:[#allocation8 + $0x150] ss:$12 sps:$4 sm:$0xff]  }
 0x179   :  { %931 = vmatprep.subr.bf16.mxu0 %v3329_v46  ;;  %3111 = vmatprep.subr.bf16.mxu1 %v3737_v0  ;;  %v3401_v46 = vld [vmem:[#allocation8 + $0x98] ss:$12 sps:$4 sm:$0xff]  }
 0x17c   :  { %932 = vmatpush1.bf16.msra.mxu0 %v3327_v48  ;;  %3112 = vmatpush3.bf16.msra.mxu1 %v3330_v49  ;;  %v3404_v48 = vld [vmem:[#allocation8 + $0x16c] ss:$12 sps:$4 sm:$0xff]   ;;  %v3405_v49 = vld [vmem:[#allocation8 + $0x170] ss:$12 sps:$4 sm:$0xff]  }
 0x17d   :  { %933 = vmatprep.subr.bf16.mxu0 %v3333_v50  ;;  %3113 = vmatprep.subr.bf16.mxu1 %v3737_v0  ;;  %v3402_v50 = vld [vmem:[#allocation8 + $0x168] ss:$12 sps:$4 sm:$0xff]  }
 0x180   :  { %934 = vmatpush1.bf16.msra.mxu0 %v3331_v52  ;;  %3114 = vmatpush3.bf16.msra.mxu1 %v3334_v53  ;;  %v3409_v52 = vld [vmem:[#allocation8 + $0x184] ss:$12 sps:$4 sm:$0xff]  }
 0x181   :  { %935 = vmatprep.subr.bf16.mxu0 %v3337_v54  ;;  %3115 = vmatprep.subr.bf16.mxu1 %v3737_v0 }
 0x184   :  { %936 = vmatpush1.bf16.msra.mxu0 %v3335_v56  ;;  %3116 = vmatpush3.bf16.msra.mxu1 %v3338_v57 }
 0x185   :  { %937 = vmatprep.subr.bf16.mxu0 %v3341_v58  ;;  %3117 = vmatprep.subr.bf16.mxu1 %v3737_v0  ;;  %v481_v58 = vld [vmem:[%s3999_s4] sm:$0x7] }
 0x186   :  { %v494_v59 = vrot.slane %v481_v58, %v3916_v47 }
 0x188   :  { %938 = vmatpush1.bf16.msra.mxu0 %v3339_v60  ;;  %3118 = vmatpush3.bf16.msra.mxu1 %v3342_v61  ;;  %v486_v60 = vrot.slane %v481_v58, %v3897_v16  ;;  %v490_v61 = vrot.slane %v481_v58, %v3904_v18  ;;  %v3462_v58 = vld [vmem:[#allocation10 + $0xac] ss:$12 sps:$4 sm:$0xff]  }
 0x189   :  { %1547 = vmatprep.subr.bf16.mxu1 %v3345_v62  ;;  %2990 = vmatprep.subr.bf16.mxu0 %v3370_v20  ;;  %v3413_v20 = vld [vmem:[#allocation8 + $0x19c] ss:$12 sps:$4 sm:$0xff]  }
 0x18b   :  { %956 = vmatmul.mubr.bf16.vlgmr.msra.gmra.mrb[4].mxu0 %v384_v63  ;;  %3120 = vmatmul.mubr.bf16.vlgmr.msra.gmra.mrb[8].mxu1 %v384_v63 }
 0x18c   :  { %1548 = vmatpush1.bf16.msra.mxu1 %v3343_v2  ;;  %2991 = vmatpush3.bf16.msra.mxu0 %v3371_v21  ;;  %v3411_v21 = vld [vmem:[#allocation8 + $0x198] ss:$12 sps:$4 sm:$0xff]  }
 0x18d   :  { %1549 = vmatprep.subr.bf16.mxu1 %v3348_v3  ;;  %2992 = vmatprep.subr.bf16.mxu0 %v3375_v23  ;;  %v3417_v23 = vld [vmem:[#allocation8 + $0x1b4] ss:$12 sps:$4 sm:$0xff]  }
 0x190   :  { %1550 = vmatpush1.bf16.msra.mxu1 %v3346_v4  ;;  %2993 = vmatpush3.bf16.msra.mxu0 %v3376_v25  ;;  %v3418_v25 = vld [vmem:[#allocation8 + $0x1b8] ss:$12 sps:$4 sm:$0xff]  }
 0x191   :  { %1551 = vmatprep.subr.bf16.mxu1 %v3351_v5  ;;  %2994 = vmatprep.subr.bf16.mxu0 %v3380_v26  ;;  %v3421_v26 = vld [vmem:[#allocation8 + $0x1cc] ss:$12 sps:$4 sm:$0xff]  }
 0x194   :  { %1552 = vmatpush1.bf16.msra.mxu1 %v3349_v6  ;;  %2995 = vmatpush3.bf16.msra.mxu0 %v3381_v29  ;;  %v3425_v29 = vld [vmem:[#allocation8 + $0x1e4] ss:$12 sps:$4 sm:$0xff]  }
 0x195   :  { %1553 = vmatprep.subr.bf16.mxu1 %v3354_v7  ;;  %2996 = vmatprep.subr.bf16.mxu0 %v3385_v30  ;;  %v3423_v30 = vld [vmem:[#allocation8 + $0x1e0] ss:$12 sps:$4 sm:$0xff]  }
 0x198   :  { %1554 = vmatpush1.bf16.msra.mxu1 %v3352_v8  ;;  %2997 = vmatpush3.bf16.msra.mxu0 %v3386_v33  ;;  %v3427_v33 = vld [vmem:[#allocation8 + $0x1f8] ss:$12 sps:$4 sm:$0xff]  }
 0x199   :  { %1555 = vmatprep.subr.bf16.mxu1 %v3357_v9  ;;  %2998 = vmatprep.subr.bf16.mxu0 %v3390_v34  ;;  %v3430_v34 = vld [vmem:[#allocation8 + $0x200] ss:$12 sps:$4 sm:$0xff]  }
 0x19c   :  { %1556 = vmatpush1.bf16.msra.mxu1 %v3355_v10  ;;  %2999 = vmatpush3.bf16.msra.mxu0 %v3391_v37  ;;  %v3434_v37 = vld [vmem:[#allocation8 + $0x218] ss:$12 sps:$4 sm:$0xff]  }
 0x19d   :  { %1557 = vmatprep.subr.bf16.mxu1 %v3360_v11  ;;  %3000 = vmatprep.subr.bf16.mxu0 %v3395_v38  ;;  %v3437_v38 = vld [vmem:[#allocation8 + $0x22c] ss:$12 sps:$4 sm:$0xff]  }
 0x1a0   :  { %1558 = vmatpush1.bf16.msra.mxu1 %v3358_v12  ;;  %3001 = vmatpush3.bf16.msra.mxu0 %v3396_v41 }
 0x1a1   :  { %1559 = vmatprep.subr.bf16.mxu1 %v3363_v13  ;;  %3002 = vmatprep.subr.bf16.mxu0 %v3400_v44 }
 0x1a4   :  { %1560 = vmatpush1.bf16.msra.mxu1 %v3361_v14  ;;  %3003 = vmatpush3.bf16.msra.mxu0 %v3401_v46  ;;  %v3442_v46 = vld [vmem:[#allocation10 + $0x18] ss:$12 sps:$4 sm:$0xff]  }
 0x1a5   :  { %1561 = vmatprep.subr.bf16.mxu1 %v3366_v15  ;;  %3004 = vmatprep.subr.bf16.mxu0 %v3405_v49  ;;  %v3407_v15 = vld [vmem:[#allocation8 + $0x180] ss:$12 sps:$4 sm:$0xff]   ;;  %v3445_v49 = vld [vmem:[#allocation10 + $0x30] ss:$12 sps:$4 sm:$0xff]  }
 0x1a8   :  { %1562 = vmatpush1.bf16.msra.mxu1 %v3364_v17  ;;  %3005 = vmatpush3.bf16.msra.mxu0 %v3406_v51  ;;  %v3410_v17 = vld [vmem:[#allocation8 + $0x188] ss:$12 sps:$4 sm:$0xff]  }
 0x1a9   :  { %1563 = vmatprep.subr.bf16.mxu1 %v3369_v19  ;;  %3123 = vmatprep.subr.bf16.mxu0 %v3737_v0  ;;  %v3448_v51 = vld [vmem:[#allocation10 + $0x48] ss:$12 sps:$4 sm:$0xff]  }
 0x1ac   :  { %1564 = vmatpush1.bf16.msra.mxu1 %v3367_v22  ;;  %v3414_v22 = vld [vmem:[#allocation8 + $0x1a0] ss:$12 sps:$4 sm:$0xff]  }
 0x1ad   :  { %1565 = vmatprep.subr.bf16.mxu1 %v3374_v24  ;;  %v3415_v24 = vld [vmem:[#allocation8 + $0x1b0] ss:$12 sps:$4 sm:$0xff]  }
 0x1b0   :  { %1566 = vmatpush1.bf16.msra.mxu1 %v3372_v27  ;;  %v3419_v27 = vld [vmem:[#allocation8 + $0x1c8] ss:$12 sps:$4 sm:$0xff]  }
 0x1b1   :  { %1567 = vmatprep.subr.bf16.mxu1 %v3379_v28  ;;  %v3422_v28 = vld [vmem:[#allocation8 + $0x1d0] ss:$12 sps:$4 sm:$0xff]  }
 0x1b4   :  { %1568 = vmatpush1.bf16.msra.mxu1 %v3377_v31  ;;  %v3426_v31 = vld [vmem:[#allocation8 + $0x1e8] ss:$12 sps:$4 sm:$0xff]  }
 0x1b5   :  { %1569 = vmatprep.subr.bf16.mxu1 %v3384_v32  ;;  %v3429_v32 = vld [vmem:[#allocation8 + $0x1fc] ss:$12 sps:$4 sm:$0xff]  }
 0x1b8   :  { %1570 = vmatpush1.bf16.msra.mxu1 %v3382_v35  ;;  %v3433_v35 = vld [vmem:[#allocation8 + $0x214] ss:$12 sps:$4 sm:$0xff]  }
 0x1b9   :  { %1571 = vmatprep.subr.bf16.mxu1 %v3389_v36  ;;  %v3431_v36 = vld [vmem:[#allocation8 + $0x210] ss:$12 sps:$4 sm:$0xff]  }
 0x1bc   :  { %1572 = vmatpush1.bf16.msra.mxu1 %v3387_v39  ;;  %v3435_v39 = vld [vmem:[#allocation8 + $0x228] ss:$12 sps:$4 sm:$0xff]  }
 0x1bd   :  { %1573 = vmatprep.subr.bf16.mxu1 %v3394_v40  ;;  %v3438_v40 = vld [vmem:[#allocation8 + $0x230] ss:$12 sps:$4 sm:$0xff]  }
 0x1c0   :  { %1574 = vmatpush1.bf16.msra.mxu1 %v3392_v42  ;;  %v3441_v42 = vld [vmem:[#allocation10 + $0x4] ss:$12 sps:$4 sm:$0xff]  }
 0x1c1   :  { %1575 = vmatprep.subr.bf16.mxu1 %v3399_v43  ;;  %v3439_v43 = vld [vmem:[#allocation10] ss:$12 sps:$4 sm:$0xff]  }
 0x1c4   :  { %1576 = vmatpush1.bf16.msra.mxu1 %v3397_v45  ;;  %v3444_v45 = vld [vmem:[#allocation10 + $0x1c] ss:$12 sps:$4 sm:$0xff]  }
 0x1c5   :  { %1577 = vmatprep.subr.bf16.mxu1 %v3404_v48  ;;  %v3447_v48 = vld [vmem:[#allocation10 + $0x34] ss:$12 sps:$4 sm:$0xff]  }
 0x1c8   :  { %1578 = vmatpush1.bf16.msra.mxu1 %v3402_v50  ;;  %v3450_v50 = vld [vmem:[#allocation10 + $0x4c] ss:$12 sps:$4 sm:$0xff]  }
 0x1c9   :  { %1588 = vmatprep.subr.bf16.mxu1 %v3409_v52  ;;  %v3453_v52 = vld [vmem:[#allocation10 + $0x64] ss:$12 sps:$4 sm:$0xff]  }
 0x23e   :  { %v2975_v53 = vpop.f32.mrb[4].mxu1 }
 0x23f   :  { %v2976_v54 = vpop.f32.mrb[5].mxu1 }
 0x240   :  { %v2977_v55 = vadd.f32 %v2976_v54, %v2975_v53  ;;  %v2978_v56 = vpop.f32.mrb[6].mxu1  ;;  %v3451_v53 = vld [vmem:[#allocation10 + $0x60] ss:$12 sps:$4 sm:$0xff]   ;;  %v3456_v54 = vld [vmem:[#allocation10 + $0x7c] ss:$12 sps:$4 sm:$0xff]  }
 0x241   :  { %v2979_v57 = vpop.f32.mrb[7].mxu1  ;;  %v3459_v56 = vld [vmem:[#allocation10 + $0x94] ss:$12 sps:$4 sm:$0xff]  }
 0x242   :  { %v999_v62 = vadd.f32 %v2977_v55, %v494_v59  ;;  %v3454_v55 = vld [vmem:[#allocation10 + $0x78] ss:$12 sps:$4 sm:$0xff]   ;;  %v3457_v57 = vld [vmem:[#allocation10 + $0x90] ss:$12 sps:$4 sm:$0xff]   ;;  %v3460_v59 = vld [vmem:[#allocation10 + $0xa8] ss:$12 sps:$4 sm:$0xff]  }
 0x25e   :  { %v957_v63 = vpop.f32.mrb[4].mxu0  ;;  %v1038_v2 = vpop.f32.mrb[8].mxu1 }
 0x25f   :  { %v3183_v3 = vadd.f32 %v957_v63, %v486_v60  ;;  %v3931_v4 = vadd.f32 %v1038_v2, %v999_v62  ;;  %v959_v5 = vpop.f32.mrb[5].mxu0  ;;  %v3121_v6 = vpop.f32.mrb[9].mxu1  ;;  %v3465_v60 = vld [vmem:[#allocation10 + $0xc4] ss:$12 sps:$4 sm:$0xff]   ;;  %v3467_v62 = vld [vmem:[#allocation10 + $0x8] ss:$12 sps:$4 sm:$0xff]  }
 0x260   :  { %v3184_v7 = vadd.f32 %v959_v5, %v490_v61  ;;  %v961_v8 = vpop.f32.mrb[6].mxu0  ;;  %v1041_v9 = vpop.f32.mrb[10].mxu1  ;;  %v3466_v61 = vld [vmem:[#allocation10 + $0xc8] ss:$12 sps:$4 sm:$0xff]   ;;  %v3463_v63 = vld [vmem:[#allocation10 + $0xc0] ss:$12 sps:$4 sm:$0xff]  }
 0x261   :  { %v1044_v10 = vmax.f32 %v3183_v3, 0.0  ;;  %v962_v11 = vpop.f32.mrb[7].mxu0  ;;  %v3122_v12 = vpop.f32.mrb[11].mxu1  ;;  %v1046_v41 = vmax.f32 %v3931_v4, 0.0  ;;  %v3471_v2 = vld [vmem:[#allocation10 + $0xe0] ss:$12 sps:$4 sm:$0xff]  }
 0x262   :  { %v1045_v13 = vmax.f32 %v3184_v7, 0.0  ;;  %v3470_v3 = vld [vmem:[#allocation10 + $0xdc] ss:$12 sps:$4 sm:$0xff]   ;;  %v3472_v4 = vld [vmem:[#allocation10 + $0x20] ss:$12 sps:$4 sm:$0xff]  }
 0x263   :  { %v1047_v19 = vpack.c.bf16 %v1044_v10, %v1044_v10  ;;  %v1049_v44 = vpack.c.bf16 %v1046_v41, %v1046_v41  ;;  %v3476_v5 = vld [vmem:[#allocation10 + $0xf8] ss:$12 sps:$4 sm:$0xff]   ;;  %v3475_v7 = vld [vmem:[#allocation10 + $0xf4] ss:$12 sps:$4 sm:$0xff]   ;;  %v3481_v9 = vld [vmem:[#allocation10 + $0x110] ss:$12 sps:$4 sm:$0xff]  }
 0x264   :  { %v1048_v14 = vpack.c.bf16 %v1045_v13, %v1045_v13  ;;  %v3468_v6 = vld [vmem:[#allocation10 + $0xd8] ss:$12 sps:$4 sm:$0xff]   ;;  %v3473_v10 = vld [vmem:[#allocation10 + $0xf0] ss:$12 sps:$4 sm:$0xff]   ;;  %v3486_v13 = vld [vmem:[#allocation10 + $0x128] ss:$12 sps:$4 sm:$0xff]  }
 0x265   :  { %v3477_v8 = vld [vmem:[#allocation10 + $0x38] ss:$12 sps:$4 sm:$0xff]   ;;  %v3482_v12 = vld [vmem:[#allocation10 + $0x50] ss:$12 sps:$4 sm:$0xff]  }
 0x266   :  { %1579 = vmatprep.mubr.bf16.mxu1 %v1048_v14  ;;  %1661 = vmatprep.mubr.bf16.mxu0 %v1048_v14  ;;  %v3480_v11 = vld [vmem:[#allocation10 + $0x10c] ss:$12 sps:$4 sm:$0xff]   ;;  %v3478_v14 = vld [vmem:[#allocation10 + $0x108] ss:$12 sps:$4 sm:$0xff]  }
 0x267   :  { %1580 = vmatmul.mubr.bf16.vlgmr.msra.gmra.mrb[12].mxu1 %v1047_v19  ;;  %1662 = vmatmul.mubr.bf16.vlgmr.msra.gmra.mrb[8].mxu0 %v1047_v19  ;;  %v3491_v19 = vld [vmem:[#allocation10 + $0x140] ss:$12 sps:$4 sm:$0xff]  }
 0x268   :  { %1589 = vmatpush1.bf16.msra.mxu1 %v3407_v15  ;;  %3124 = vmatpush3.bf16.msra.mxu0 %v3410_v17  ;;  %v3485_v15 = vld [vmem:[#allocation10 + $0x124] ss:$12 sps:$4 sm:$0xff]   ;;  %v3487_v17 = vld [vmem:[#allocation10 + $0x68] ss:$12 sps:$4 sm:$0xff]  }
 0x269   :  { %1590 = vmatprep.subr.bf16.mxu1 %v3413_v20  ;;  %3125 = vmatprep.subr.bf16.mxu0 %v3737_v0  ;;  %v3483_v20 = vld [vmem:[#allocation10 + $0x120] ss:$12 sps:$4 sm:$0xff]  }
 0x26a   :  { %1620 = vmatprep.mubr.bf16.mxu1 %v3738_v1  ;;  %3139 = vmatprep.mubr.msk.bf16.mxu0 %vm3739_vm0, %v3737_v0 }
 0x26c   :  { %1591 = vmatpush1.bf16.msra.mxu1 %v3411_v21  ;;  %3126 = vmatpush3.bf16.msra.mxu0 %v3414_v22  ;;  %v3490_v21 = vld [vmem:[#allocation10 + $0x13c] ss:$12 sps:$4 sm:$0xff]   ;;  %v3492_v22 = vld [vmem:[#allocation10 + $0x80] ss:$12 sps:$4 sm:$0xff]  }
 0x26d   :  { %1592 = vmatprep.subr.bf16.mxu1 %v3417_v23  ;;  %3127 = vmatprep.subr.bf16.mxu0 %v3737_v0  ;;  %v3488_v23 = vld [vmem:[#allocation10 + $0x138] ss:$12 sps:$4 sm:$0xff]  }
 0x270   :  { %1593 = vmatpush1.bf16.msra.mxu1 %v3415_v24  ;;  %3128 = vmatpush3.bf16.msra.mxu0 %v3418_v25  ;;  %v3495_v24 = vld [vmem:[#allocation10 + $0x154] ss:$12 sps:$4 sm:$0xff]   ;;  %v3496_v25 = vld [vmem:[#allocation10 + $0x158] ss:$12 sps:$4 sm:$0xff]  }
 0x271   :  { %1594 = vmatprep.subr.bf16.mxu1 %v3421_v26  ;;  %3129 = vmatprep.subr.bf16.mxu0 %v3737_v0  ;;  %v3493_v26 = vld [vmem:[#allocation10 + $0x150] ss:$12 sps:$4 sm:$0xff]  }
 0x274   :  { %1595 = vmatpush1.bf16.msra.mxu1 %v3419_v27  ;;  %3130 = vmatpush3.bf16.msra.mxu0 %v3422_v28  ;;  %v3497_v27 = vld [vmem:[#allocation10 + $0x98] ss:$12 sps:$4 sm:$0xff]  }
 0x275   :  { %1596 = vmatprep.subr.bf16.mxu1 %v3425_v29  ;;  %3131 = vmatprep.subr.bf16.mxu0 %v3737_v0  ;;  %v3500_v28 = vld [vmem:[#allocation10 + $0x16c] ss:$12 sps:$4 sm:$0xff]   ;;  %v3501_v29 = vld [vmem:[#allocation10 + $0x170] ss:$12 sps:$4 sm:$0xff]  }
 0x278   :  { %1597 = vmatpush1.bf16.msra.mxu1 %v3423_v30  ;;  %3132 = vmatpush3.bf16.msra.mxu0 %v3426_v31  ;;  %v3498_v30 = vld [vmem:[#allocation10 + $0x168] ss:$12 sps:$4 sm:$0xff]   ;;  %v3502_v31 = vld [vmem:[#allocation10 + $0xb0] ss:$12 sps:$4 sm:$0xff]  }
 0x279   :  { %1598 = vmatprep.subr.bf16.mxu1 %v3429_v32  ;;  %3133 = vmatprep.subr.bf16.mxu0 %v3737_v0  ;;  %v3505_v32 = vld [vmem:[#allocation10 + $0x184] ss:$12 sps:$4 sm:$0xff]  }
 0x27c   :  { %1599 = vmatpush1.bf16.msra.mxu1 %v3427_v33  ;;  %3134 = vmatpush3.bf16.msra.mxu0 %v3430_v34 }
 0x27d   :  { %1600 = vmatprep.subr.bf16.mxu1 %v3433_v35  ;;  %3135 = vmatprep.subr.bf16.mxu0 %v3737_v0 }
 0x280   :  { %1601 = vmatpush1.bf16.msra.mxu1 %v3431_v36  ;;  %3136 = vmatpush3.bf16.msra.mxu0 %v3434_v37 }
 0x281   :  { %1602 = vmatprep.subr.bf16.mxu1 %v3437_v38  ;;  %3137 = vmatprep.subr.bf16.mxu0 %v3737_v0  ;;  %v1146_v38 = vld [vmem:[%s4001_s6] sm:$0x7] }
 0x282   :  { %v1155_v41 = vrot.slane %v1146_v38, %v3904_v18 }
 0x284   :  { %1603 = vmatpush1.bf16.msra.mxu1 %v3435_v39  ;;  %3138 = vmatpush3.bf16.msra.mxu0 %v3438_v40  ;;  %v1159_v39 = vrot.slane %v1146_v38, %v3916_v47  ;;  %v1151_v40 = vrot.slane %v1146_v38, %v3897_v16  ;;  %v3551_v38 = vld [vmem:[#allocation11 + $0x68] sm:$0xff]  }
 0x285   :  { %2212 = vmatprep.subr.bf16.mxu0 %v3441_v42  ;;  %3021 = vmatprep.subr.bf16.mxu1 %v3466_v61  ;;  %v3509_v61 = vld [vmem:[#allocation10 + $0x19c] ss:$12 sps:$4 sm:$0xff]  }
 0x287   :  { %1621 = vmatmul.mubr.bf16.vlgmr.msra.gmra.mrb[12].mxu1 %v1049_v44  ;;  %3140 = vmatmul.mubr.bf16.vlgmr.msra.gmra.mrb[12].mxu0 %v1049_v44 }
 0x288   :  { %2213 = vmatpush1.bf16.msra.mxu0 %v3439_v43  ;;  %3022 = vmatpush3.bf16.msra.mxu1 %v3467_v62  ;;  %v3507_v62 = vld [vmem:[#allocation10 + $0x198] ss:$12 sps:$4 sm:$0xff]  }
 0x289   :  { %2214 = vmatprep.subr.bf16.mxu0 %v3444_v45  ;;  %3023 = vmatprep.subr.bf16.mxu1 %v3471_v2  ;;  %v3513_v2 = vld [vmem:[#allocation10 + $0x1b4] ss:$12 sps:$4 sm:$0xff]  }
 0x28c   :  { %2215 = vmatpush1.bf16.msra.mxu0 %v3442_v46  ;;  %3024 = vmatpush3.bf16.msra.mxu1 %v3472_v4  ;;  %v3514_v4 = vld [vmem:[#allocation10 + $0x1b8] ss:$12 sps:$4 sm:$0xff]  }
 0x28d   :  { %2216 = vmatprep.subr.bf16.mxu0 %v3447_v48  ;;  %3025 = vmatprep.subr.bf16.mxu1 %v3476_v5  ;;  %v3517_v5 = vld [vmem:[#allocation10 + $0x1cc] ss:$12 sps:$4 sm:$0xff]  }
 0x290   :  { %2217 = vmatpush1.bf16.msra.mxu0 %v3445_v49  ;;  %3026 = vmatpush3.bf16.msra.mxu1 %v3477_v8  ;;  %v3521_v8 = vld [vmem:[#allocation10 + $0x1e4] ss:$12 sps:$4 sm:$0xff]  }
 0x291   :  { %2218 = vmatprep.subr.bf16.mxu0 %v3450_v50  ;;  %3027 = vmatprep.subr.bf16.mxu1 %v3481_v9  ;;  %v3522_v9 = vld [vmem:[#allocation10 + $0x1e8] ss:$12 sps:$4 sm:$0xff]  }
 0x294   :  { %2219 = vmatpush1.bf16.msra.mxu0 %v3448_v51  ;;  %3028 = vmatpush3.bf16.msra.mxu1 %v3482_v12  ;;  %v3526_v12 = vld [vmem:[#allocation10 + $0x200] ss:$12 sps:$4 sm:$0xff]  }
 0x295   :  { %2220 = vmatprep.subr.bf16.mxu0 %v3453_v52  ;;  %3029 = vmatprep.subr.bf16.mxu1 %v3486_v13  ;;  %v3529_v13 = vld [vmem:[#allocation10 + $0x214] ss:$12 sps:$4 sm:$0xff]  }
 0x298   :  { %2221 = vmatpush1.bf16.msra.mxu0 %v3451_v53  ;;  %3030 = vmatpush3.bf16.msra.mxu1 %v3487_v17  ;;  %v3533_v17 = vld [vmem:[#allocation10 + $0x22c] ss:$12 sps:$4 sm:$0xff]  }
 0x299   :  { %2222 = vmatprep.subr.bf16.mxu0 %v3456_v54  ;;  %3031 = vmatprep.subr.bf16.mxu1 %v3491_v19  ;;  %v3531_v19 = vld [vmem:[#allocation10 + $0x228] ss:$12 sps:$4 sm:$0xff]  }
 0x29c   :  { %2223 = vmatpush1.bf16.msra.mxu0 %v3454_v55  ;;  %3032 = vmatpush3.bf16.msra.mxu1 %v3492_v22 }
 0x29d   :  { %2224 = vmatprep.subr.bf16.mxu0 %v3459_v56  ;;  %3033 = vmatprep.subr.bf16.mxu1 %v3496_v25  ;;  %v3537_v25 = vld [vmem:[#allocation11] sm:$0xff]  }
 0x2a0   :  { %2225 = vmatpush1.bf16.msra.mxu0 %v3457_v57  ;;  %3034 = vmatpush3.bf16.msra.mxu1 %v3497_v27  ;;  %v3538_v27 = vld [vmem:[#allocation11 + $0x88] sm:$0xff]  }
 0x2a1   :  { %2226 = vmatprep.subr.bf16.mxu0 %v3462_v58  ;;  %3035 = vmatprep.subr.bf16.mxu1 %v3501_v29  ;;  %v3503_v58 = vld [vmem:[#allocation10 + $0x180] ss:$12 sps:$4 sm:$0xff]   ;;  %v3542_v29 = vld [vmem:[#allocation11 + $0x50] sm:$0xff]  }
 0x2a4   :  { %2227 = vmatpush1.bf16.msra.mxu0 %v3460_v59  ;;  %3036 = vmatpush3.bf16.msra.mxu1 %v3502_v31  ;;  %v3506_v59 = vld [vmem:[#allocation10 + $0x188] ss:$12 sps:$4 sm:$0xff]  }
 0x2a5   :  { %2228 = vmatprep.subr.bf16.mxu0 %v3465_v60  ;;  %3143 = vmatprep.subr.bf16.mxu1 %v3737_v0  ;;  %v3543_v31 = vld [vmem:[#allocation11 + $0x10] sm:$0xff]  }
 0x2a8   :  { %2229 = vmatpush1.bf16.msra.mxu0 %v3463_v63  ;;  %v3510_v63 = vld [vmem:[#allocation10 + $0x1a0] ss:$12 sps:$4 sm:$0xff]  }
 0x2a9   :  { %2230 = vmatprep.subr.bf16.mxu0 %v3470_v3  ;;  %v3511_v3 = vld [vmem:[#allocation10 + $0x1b0] ss:$12 sps:$4 sm:$0xff]  }
 0x2ac   :  { %2231 = vmatpush1.bf16.msra.mxu0 %v3468_v6  ;;  %v3515_v6 = vld [vmem:[#allocation10 + $0x1c8] ss:$12 sps:$4 sm:$0xff]  }
 0x2ad   :  { %2232 = vmatprep.subr.bf16.mxu0 %v3475_v7  ;;  %v3518_v7 = vld [vmem:[#allocation10 + $0x1d0] ss:$12 sps:$4 sm:$0xff]  }
 0x2b0   :  { %2233 = vmatpush1.bf16.msra.mxu0 %v3473_v10  ;;  %v3525_v10 = vld [vmem:[#allocation10 + $0x1fc] ss:$12 sps:$4 sm:$0xff]  }
 0x2b1   :  { %2234 = vmatprep.subr.bf16.mxu0 %v3480_v11  ;;  %v3523_v11 = vld [vmem:[#allocation10 + $0x1f8] ss:$12 sps:$4 sm:$0xff]  }
 0x2b4   :  { %2235 = vmatpush1.bf16.msra.mxu0 %v3478_v14  ;;  %v3527_v14 = vld [vmem:[#allocation10 + $0x210] ss:$12 sps:$4 sm:$0xff]  }
 0x2b5   :  { %2236 = vmatprep.subr.bf16.mxu0 %v3485_v15  ;;  %v3530_v15 = vld [vmem:[#allocation10 + $0x218] ss:$12 sps:$4 sm:$0xff]  }
 0x2b8   :  { %2237 = vmatpush1.bf16.msra.mxu0 %v3483_v20  ;;  %v3534_v20 = vld [vmem:[#allocation10 + $0x230] ss:$12 sps:$4 sm:$0xff]  }
 0x2b9   :  { %2238 = vmatprep.subr.bf16.mxu0 %v3490_v21 }
 0x2bc   :  { %2239 = vmatpush1.bf16.msra.mxu0 %v3488_v23  ;;  %v3535_v23 = vld [vmem:[#allocation11 + $0x80] sm:$0xff]  }
 0x2bd   :  { %2240 = vmatprep.subr.bf16.mxu0 %v3495_v24  ;;  %v3536_v24 = vld [vmem:[#allocation11 + $0x40] sm:$0xff]  }
 0x2c0   :  { %2241 = vmatpush1.bf16.msra.mxu0 %v3493_v26  ;;  %v3539_v26 = vld [vmem:[#allocation11 + $0x48] sm:$0xff]  }
 0x2c1   :  { %2242 = vmatprep.subr.bf16.mxu0 %v3500_v28  ;;  %v3540_v28 = vld [vmem:[#allocation11 + $0x8] sm:$0xff]  }
 0x2c4   :  { %2243 = vmatpush1.bf16.msra.mxu0 %v3498_v30  ;;  %v3541_v30 = vld [vmem:[#allocation11 + $0x90] sm:$0xff]  }
 0x2c5   :  { %2253 = vmatprep.subr.bf16.mxu0 %v3505_v32  ;;  %v3545_v32 = vld [vmem:[#allocation11 + $0x58] sm:$0xff]  }
 0x33a   :  { %v3006_v33 = vpop.f32.mrb[8].mxu0 }
 0x33b   :  { %v3007_v34 = vpop.f32.mrb[9].mxu0 }
 0x33c   :  { %v3008_v35 = vadd.f32 %v3007_v34, %v3006_v33  ;;  %v3009_v36 = vpop.f32.mrb[10].mxu0  ;;  %v3544_v33 = vld [vmem:[#allocation11 + $0x98] sm:$0xff]  }
 0x33d   :  { %v3010_v37 = vpop.f32.mrb[11].mxu0  ;;  %v3546_v34 = vld [vmem:[#allocation11 + $0x18] sm:$0xff]   ;;  %v3547_v36 = vld [vmem:[#allocation11 + $0xa0] sm:$0xff]  }
 0x33e   :  { %v1664_v42 = vadd.f32 %v3008_v35, %v1159_v39  ;;  %v3548_v35 = vld [vmem:[#allocation11 + $0x60] sm:$0xff]   ;;  %v3550_v39 = vld [vmem:[#allocation11 + $0xa8] sm:$0xff]  }
 0x33f   :  { %v3549_v37 = vld [vmem:[#allocation11 + $0x20] sm:$0xff]  }
 0x35a   :  { %v1622_v43 = vpop.f32.mrb[12].mxu1  ;;  %v1703_v44 = vpop.f32.mrb[12].mxu0 }
 0x35b   :  { %v3185_v45 = vadd.f32 %v1622_v43, %v1151_v40  ;;  %v3951_v46 = vadd.f32 %v1703_v44, %v1664_v42  ;;  %v1624_v48 = vpop.f32.mrb[13].mxu1  ;;  %v3141_v49 = vpop.f32.mrb[13].mxu0  ;;  %v3552_v40 = vld [vmem:[#allocation11 + $0x28] sm:$0xff]   ;;  %v3554_v42 = vld [vmem:[#allocation11 + $0x70] sm:$0xff]   ;;  %v3556_v44 = vld [vmem:[#allocation11 + $0xb8] sm:$0xff]  }
 0x35c   :  { %v3186_v50 = vadd.f32 %v1624_v48, %v1155_v41  ;;  %v1626_v51 = vpop.f32.mrb[14].mxu1  ;;  %v1706_v52 = vpop.f32.mrb[14].mxu0  ;;  %v3553_v41 = vld [vmem:[#allocation11 + $0xb0] sm:$0xff]  }
 0x35d   :  { %v1709_v53 = vmax.f32 %v3185_v45, 0.0  ;;  %v1627_v54 = vpop.f32.mrb[15].mxu1  ;;  %v3142_v55 = vpop.f32.mrb[15].mxu0  ;;  %v1711_v21 = vmax.f32 %v3951_v46, 0.0  ;;  %v3555_v43 = vld [vmem:[#allocation11 + $0x30] sm:$0xff]   ;;  %v3557_v45 = vld [vmem:[#allocation11 + $0x78] sm:$0xff]  }
 0x35e   :  { %v1710_v56 = vmax.f32 %v3186_v50, 0.0  ;;  %v3558_v46 = vld [vmem:[#allocation11 + $0x38] sm:$0xff]  }
 0x35f   :  { %v1712_v60 = vpack.c.bf16 %v1709_v53, %v1709_v53  ;;  %v1714_v22 = vpack.c.bf16 %v1711_v21, %v1711_v21  ;;  %v1811_v53 = vld [vmem:[%s4003_s8] sm:$0x7] }
 0x360   :  { %v1713_v57 = vpack.c.bf16 %v1710_v56, %v1710_v56  ;;  %v1824_v54 = vrot.slane %v1811_v53, %v3916_v47  ;;  %v1820_v55 = vrot.slane %v1811_v53, %v3904_v18 }
 0x362   :  { %2244 = vmatprep.mubr.bf16.mxu0 %v1713_v57  ;;  %2326 = vmatprep.mubr.bf16.mxu1 %v1713_v57 }
 0x363   :  { %2245 = vmatmul.mubr.bf16.vlgmr.msra.gmra.mrb[16].mxu0 %v1712_v60  ;;  %2327 = vmatmul.mubr.bf16.vlgmr.msra.gmra.mrb[16].mxu1 %v1712_v60 }
 0x364   :  { %2254 = vmatpush1.bf16.msra.mxu0 %v3503_v58  ;;  %3144 = vmatpush3.bf16.msra.mxu1 %v3506_v59 }
 0x365   :  { %2255 = vmatprep.subr.bf16.mxu0 %v3509_v61  ;;  %3145 = vmatprep.subr.bf16.mxu1 %v3737_v0 }
 0x366   :  { %2285 = vmatprep.mubr.bf16.mxu0 %v3738_v1  ;;  %3159 = vmatprep.mubr.msk.bf16.mxu1 %vm3739_vm0, %v3737_v0  ;;  %v3519_v1 = vld [vmem:[#allocation10 + $0x1e0] ss:$12 sps:$4 sm:$0xff]  }
 0x368   :  { %2256 = vmatpush1.bf16.msra.mxu0 %v3507_v62  ;;  %3146 = vmatpush3.bf16.msra.mxu1 %v3510_v63 }
 0x369   :  { %2257 = vmatprep.subr.bf16.mxu0 %v3513_v2  ;;  %3147 = vmatprep.subr.bf16.mxu1 %v3737_v0 }
 0x36c   :  { %2258 = vmatpush1.bf16.msra.mxu0 %v3511_v3  ;;  %3148 = vmatpush3.bf16.msra.mxu1 %v3514_v4 }
 0x36d   :  { %2259 = vmatprep.subr.bf16.mxu0 %v3517_v5  ;;  %3149 = vmatprep.subr.bf16.mxu1 %v3737_v0 }
 0x370   :  { %2260 = vmatpush1.bf16.msra.mxu0 %v3515_v6  ;;  %3150 = vmatpush3.bf16.msra.mxu1 %v3518_v7 }
 0x371   :  { %2261 = vmatprep.subr.bf16.mxu0 %v3521_v8  ;;  %3151 = vmatprep.subr.bf16.mxu1 %v3737_v0 }
 0x374   :  { %2262 = vmatpush1.bf16.msra.mxu0 %v3519_v1  ;;  %3152 = vmatpush3.bf16.msra.mxu1 %v3522_v9 }
 0x375   :  { %2263 = vmatprep.subr.bf16.mxu0 %v3525_v10  ;;  %3153 = vmatprep.subr.bf16.mxu1 %v3737_v0 }
 0x378   :  { %2264 = vmatpush1.bf16.msra.mxu0 %v3523_v11  ;;  %3154 = vmatpush3.bf16.msra.mxu1 %v3526_v12  ;;  %v2924_v12 = vld [vmem:[%s4005_s10] ss:$0 sm:$0xff] }
 0x379   :  { %2265 = vmatprep.subr.bf16.mxu0 %v3529_v13  ;;  %3155 = vmatprep.subr.bf16.mxu1 %v3737_v0 }
 0x37c   :  { %2266 = vmatpush1.bf16.msra.mxu0 %v3527_v14  ;;  %3156 = vmatpush3.bf16.msra.mxu1 %v3530_v15 }
 0x37d   :  { %2267 = vmatprep.subr.bf16.mxu0 %v3533_v17  ;;  %3157 = vmatprep.subr.bf16.mxu1 %v3737_v0 }
 0x380   :  { %2268 = vmatpush1.bf16.msra.mxu0 %v3531_v19  ;;  %3158 = vmatpush3.bf16.msra.mxu1 %v3534_v20 }
 0x381   :  { %3163 = vmatprep.subr.bf16.mxu0 %v3737_v0  ;;  %3052 = vmatprep.subr.bf16.mxu1 %v3536_v24 }
 0x383   :  { %2286 = vmatmul.mubr.bf16.vlgmr.msra.gmra.mrb[16].mxu0 %v1714_v22  ;;  %3160 = vmatmul.mubr.bf16.vlgmr.msra.gmra.mrb[20].mxu1 %v1714_v22 }
 0x384   :  { %3179 = vmatprep.mubr.msk.bf16.mxu0 %vm3739_vm0, %v3737_v0  ;;  %3164 = vmatpush3.bf16.msra.mxu0 %v3535_v23 }
 0x385   :  { %3053 = vmatpush3.bf16.msra.mxu1 %v3537_v25  ;;  %3165 = vmatprep.subr.bf16.mxu0 %v3737_v0 }
 0x386   :  { %3054 = vmatprep.subr.bf16.mxu1 %v3539_v26 }
 0x388   :  { %3166 = vmatpush3.bf16.msra.mxu0 %v3538_v27 }
 0x389   :  { %3055 = vmatpush3.bf16.msra.mxu1 %v3540_v28  ;;  %3167 = vmatprep.subr.bf16.mxu0 %v3737_v0 }
 0x38a   :  { %3056 = vmatprep.subr.bf16.mxu1 %v3542_v29 }
 0x38c   :  { %3168 = vmatpush3.bf16.msra.mxu0 %v3541_v30 }
 0x38d   :  { %3057 = vmatpush3.bf16.msra.mxu1 %v3543_v31  ;;  %3169 = vmatprep.subr.bf16.mxu0 %v3737_v0 }
 0x38e   :  { %3058 = vmatprep.subr.bf16.mxu1 %v3545_v32 }
 0x390   :  { %3170 = vmatpush3.bf16.msra.mxu0 %v3544_v33 }
 0x391   :  { %3059 = vmatpush3.bf16.msra.mxu1 %v3546_v34  ;;  %3171 = vmatprep.subr.bf16.mxu0 %v3737_v0 }
 0x392   :  { %3060 = vmatprep.subr.bf16.mxu1 %v3548_v35 }
 0x394   :  { %3172 = vmatpush3.bf16.msra.mxu0 %v3547_v36 }
 0x395   :  { %3061 = vmatpush3.bf16.msra.mxu1 %v3549_v37  ;;  %3173 = vmatprep.subr.bf16.mxu0 %v3737_v0 }
 0x396   :  { %3062 = vmatprep.subr.bf16.mxu1 %v3551_v38 }
 0x398   :  { %3174 = vmatpush3.bf16.msra.mxu0 %v3550_v39 }
 0x399   :  { %3063 = vmatpush3.bf16.msra.mxu1 %v3552_v40  ;;  %3175 = vmatprep.subr.bf16.mxu0 %v3737_v0 }
 0x39a   :  { %3064 = vmatprep.subr.bf16.mxu1 %v3554_v42 }
 0x39c   :  { %3176 = vmatpush3.bf16.msra.mxu0 %v3553_v41 }
 0x39d   :  { %3177 = vmatprep.subr.bf16.mxu0 %v3737_v0  ;;  %3065 = vmatpush3.bf16.msra.mxu1 %v3555_v43  ;;  %v1816_v0 = vrot.slane %v1811_v53, %v3897_v16 }
 0x39e   :  { %3066 = vmatprep.subr.bf16.mxu1 %v3557_v45 }
 0x3a0   :  { %3178 = vmatpush3.bf16.msra.mxu0 %v3556_v44 }
 0x3a1   :  { %3067 = vmatpush3.bf16.msra.mxu1 %v3558_v46 }
 0x436   :  { %v3037_v48 = vpop.f32.mrb[16].mxu1 }
 0x437   :  { %v3038_v49 = vpop.f32.mrb[17].mxu1 }
 0x438   :  { %v3039_v50 = vadd.f32 %v3038_v49, %v3037_v48  ;;  %v3040_v51 = vpop.f32.mrb[18].mxu1 }
 0x439   :  { %v3041_v52 = vpop.f32.mrb[19].mxu1 }
 0x43a   :  { %v2329_v56 = vadd.f32 %v3039_v50, %v1824_v54 }
 0x456   :  { %v2287_v57 = vpop.f32.mrb[16].mxu0  ;;  %v2368_v58 = vpop.f32.mrb[20].mxu1 }
 0x457   :  { %v3187_v59 = vadd.f32 %v2287_v57, %v1816_v0  ;;  %v2369_v60 = vadd.f32 %v2368_v58, %v2329_v56  ;;  %v2289_v61 = vpop.f32.mrb[17].mxu0  ;;  %v3161_v62 = vpop.f32.mrb[21].mxu1 }
 0x458   :  { %v3188_v63 = vadd.f32 %v2289_v61, %v1820_v55  ;;  %v2291_v2 = vpop.f32.mrb[18].mxu0  ;;  %v2371_v3 = vpop.f32.mrb[22].mxu1 }
 0x459   :  { %v2374_v4 = vmax.f32 %v3187_v59, 0.0  ;;  %v2376_v5 = vmax.f32 %v2369_v60, 0.0  ;;  %v2292_v6 = vpop.f32.mrb[19].mxu0  ;;  %v3162_v7 = vpop.f32.mrb[23].mxu1 }
 0x45a   :  { %v2375_v8 = vmax.f32 %v3188_v63, 0.0 }
 0x45b   :  { %v2379_v47 = vpack.c.bf16 %v2376_v5, %v2376_v5  ;;  %v2377_v16 = vpack.c.bf16 %v2374_v4, %v2374_v4 }
 0x45c   :  { %v2378_v1 = vpack.c.bf16 %v2375_v8, %v2375_v8 }
 0x45d   :  { %3180 = vmatmul.mubr.bf16.vlgmr.msra.gmra.mrb[20].mxu0 %v2379_v47 }
 0x45e   :  { %2611 = vmatprep.mubr.bf16.mxu1 %v2378_v1 }
 0x45f   :  { %2612 = vmatmul.mubr.bf16.vlgmr.msra.gmra.mrb[24].mxu1 %v2377_v16 }
 0x530   :  { %v2653_v18 = vpop.f32.mrb[20].mxu0 }
 0x531   :  { %v3181_v9 = vpop.f32.mrb[21].mxu0 }
 0x532   :  { %v3068_v10 = vpop.f32.mrb[24].mxu1  ;;  %v2656_v11 = vpop.f32.mrb[22].mxu0 }
 0x533   :  { %v3069_v13 = vpop.f32.mrb[25].mxu1  ;;  %v3182_v14 = vpop.f32.mrb[23].mxu0 }
 0x534   :  { %v3070_v15 = vadd.f32 %v3069_v13, %v3068_v10  ;;  %v3071_v17 = vpop.f32.mrb[26].mxu1 }
 0x535   :  { %v3072_v19 = vpop.f32.mrb[27].mxu1 }
 0x536   :  { %v2614_v20 = vadd.f32 %v3070_v15, %v2924_v12 }
 0x538   :  { %v2654_v21 = vadd.f32 %v2653_v18, %v2614_v20 }
 0x53a   :  { %v2949_v22 = vmul.f32 -1.442695, %v2654_v21 }
 0x53c   :  { %3559 = vpow2.f32 %v2949_v22 }
 0x546   :  { %v3560_v23 = vpop.eup %3559 }
 0x547   :  { %v2662_v24 = vadd.f32 1.0, %v3560_v23 }
 0x549   :  { %3561 = vrcp.f32 %v2662_v24 }
 0x553   :  { %v3562_v25 = vpop.eup %3561 }
 0x554   :  { %2665 = vst [vmem:[#allocation13] sm:$0xff] %v3562_v25 }
 0x555   :  { %3706 = shalt.err (!%p3703_p10)
}
 0x556   :  { %s3707_s20 = scalar_lea.hbm %s4006_s11, 128 }
 0x557   :  { %p3708_p11 = scmp.ne.s32.totalorder %s4006_s11, %s3707_s20  ;;  %p3711_p12 = scmp.lt.u32.totalorder %s3707_s20, %s4006_s11 }
 0x559   :  { %p3713_p13 = pnand %p3711_p12, %p3708_p11 }
 0x55b   :  { %3716 = shalt.err (!%p3713_p13)
}
 0x55c   :  { %2675 = dma.vmem_to_hbm [thread:$0]  %s2673_s19, 128, %s4006_s11, [#allocation4]  }
 0x55d   :  { %3725 = dma.done.wait [#allocation4], 128  }
 0x55e   :  { %3726 = vsyncadd [#allocation4], 4294967168 }
 0x55f   :  { %2679 = vsyncpa [#allocation3], 1 }
 0x560   :  { %2680 = vsyncpa [#allocation6], 1 }
 0x561   :  { %2681 = vsyncpa [#allocation9], 1 }
 0x562   :  { %2682 = vsyncpa [#allocation12], 1 }
 0x563   :  { %2683 = vsyncpa [#allocation4], 1 }

</bundles_post_ra>
